<compile_context>
chip_gen: v6e
topology: v6e:2x2x1
jax: 0.10.0
libtpu: 0.0.40
codegen_flags: <defaults>
</compile_context>

<pallas_src>
import functools

import numpy as np
import jax
import jax.numpy as jnp
from jax.experimental import pallas as pl
from jax.experimental.pallas import tpu as pltpu


# ----------------------------------------------------------------------------
# Static 0/1 operator matrices (built once, on host, with numpy)
# ----------------------------------------------------------------------------
def _conv_shift_mats(n, h, w):
    """S[t] (t = di*3+dj) maps flattened (n,h,w) rows to the shifted source row of a
    3x3, stride-1, pad-1 conv tap; out-of-bounds taps stay 0 (zero padding)."""
    m = n * h * w
    s = np.zeros((9, m, m), np.float32)
    for di in range(3):
        for dj in range(3):
            t = di * 3 + dj
            for b in range(n):
                for ho in range(h):
                    hi = ho + di - 1
                    if not (0 <= hi < h):
                        continue
                    for wo in range(w):
                        wi = wo + dj - 1
                        if not (0 <= wi < w):
                            continue
                        s[t, b * h * w + ho * w + wo, b * h * w + hi * w + wi] = 1.0
    return s


def _pool_select_mats(n, h, w):
    """P[k] (k = di*2+dj) selects the (di,dj) corner of each 2x2 stride-2 window."""
    ho, wo = h // 2, w // 2
    p = np.zeros((4, n * ho * wo, n * h * w), np.float32)
    for di in range(2):
        for dj in range(2):
            k = di * 2 + dj
            for b in range(n):
                for i in range(ho):
                    for j in range(wo):
                        p[k, b * ho * wo + i * wo + j,
                          b * h * w + (2 * i + di) * w + (2 * j + dj)] = 1.0
    return p


# ----------------------------------------------------------------------------
# Fused Pallas kernel: whole network in one launch
# ----------------------------------------------------------------------------
def _mymodel_fused_kernel(
    x_ref,
    s1_ref, w1_ref, b1_ref, p1_ref,
    s2_ref, w2_ref, b2_ref, p2_ref,
    s3_ref, w3_ref, b3_ref, p3_ref,
    wf1_ref, bf1_ref, wf2_ref, bf2_ref, wf3_ref, bf3_ref,
    o_ref,
):
    f32 = jnp.float32
    bf16 = jnp.bfloat16

    def conv3x3_relu(x_bf, s_ref, w_ref, b_ref):
        # x_bf: (M, Cin) bf16; s: (9, M, M) bf16; w: (9, Cin, Cout) bf16; b: (1, Cout) f32
        m = s_ref.shape[1]
        cout = w_ref.shape[2]
        acc = jnp.zeros((m, cout), f32)
        for t in range(9):  # static unrolled loop over the 3x3 taps
            shifted = jnp.dot(s_ref[t], x_bf, preferred_element_type=f32).astype(bf16)
            acc = acc + jnp.dot(shifted, w_ref[t], preferred_element_type=f32)
        return jnp.maximum(acc + b_ref[...], 0.0)

    def maxpool2x2(x_bf, p_ref):
        # x_bf: (M_in, C) bf16; p: (4, M_out, M_in) bf16
        out = jnp.dot(p_ref[0], x_bf, preferred_element_type=f32)
        for k in range(1, 4):
            out = jnp.maximum(out, jnp.dot(p_ref[k], x_bf, preferred_element_type=f32))
        return out

    def linear(x_bf, w_ref, b_ref):
        return jnp.dot(x_bf, w_ref[...], preferred_element_type=f32) + b_ref[...]

    x = x_ref[...]                                               # (N*64, 64) bf16
    h = conv3x3_relu(x, s1_ref, w1_ref, b1_ref)                  # (N*64, h)   f32
    h = maxpool2x2(h.astype(bf16), p1_ref)                       # (N*16, h)
    h = conv3x3_relu(h.astype(bf16), s2_ref, w2_ref, b2_ref)     # (N*16, 2h)
    h = maxpool2x2(h.astype(bf16), p2_ref)                       # (N*4,  2h)
    h = conv3x3_relu(h.astype(bf16), s3_ref, w3_ref, b3_ref)     # (N*4,  4h)
    h = maxpool2x2(h.astype(bf16), p3_ref)                       # (N,    4h)  == flatten

    h = jnp.maximum(linear(h.astype(bf16), wf1_ref, bf1_ref), 0.0)   # (N, 5h)
    # TODO(synk): dropout p=0.2 -> identity (eval mode)
    h = jnp.maximum(linear(h.astype(bf16), wf2_ref, bf2_ref), 0.0)   # (N, 50)
    # TODO(synk): dropout p=0.2 -> identity (eval mode)
    logits = linear(h.astype(bf16), wf3_ref, bf3_ref)                # (N, n_classes)

    m = jnp.max(logits, axis=-1, keepdims=True)
    e = jnp.exp(logits - m)
    o_ref[...] = (e / jnp.sum(e, axis=-1, keepdims=True)).astype(o_ref.dtype)


# ----------------------------------------------------------------------------
# Parameter init (PyTorch layouts) + one-time preparation for the kernel
# ----------------------------------------------------------------------------
def init_params(key, hidden_dim=8, kernel_size=3, n_classes=10):
    ks = jax.random.split(key, 12)
    h, k = hidden_dim, kernel_size

    def w_init(rng, shape, fan_in):
        return jax.random.normal(rng, shape, jnp.float32) * (1.0 / jnp.sqrt(fan_in))

    return {
        "conv1_w": w_init(ks[0], (h, 64, k, k), 64 * k * k),
        "conv1_b": w_init(ks[1], (h,), 64 * k * k),
        "conv2_w": w_init(ks[2], (2 * h, h, k, k), h * k * k),
        "conv2_b": w_init(ks[3], (2 * h,), h * k * k),
        "conv3_w": w_init(ks[4], (4 * h, 2 * h, k, k), 2 * h * k * k),
        "conv3_b": w_init(ks[5], (4 * h,), 2 * h * k * k),
        # after three 2x2 pools: 8x8 -> 4x4 -> 2x2 -> 1x1 => flatten dim = 4*h
        "fc1_w": w_init(ks[6], (5 * h, 4 * h), 4 * h),
        "fc1_b": w_init(ks[7], (5 * h,), 4 * h),
        "fc2_w": w_init(ks[8], (50, 5 * h), 5 * h),
        "fc2_b": w_init(ks[9], (50,), 5 * h),
        "fc3_w": w_init(ks[10], (n_classes, 50), 50),
        "fc3_b": w_init(ks[11], (n_classes,), 50),
    }


def prepare_plan(params, batch, n_classes=10):
    """One-time weight re-layout (conv taps, fc transposes, bf16 casts) + constant
    shift/pool-select matrices.  Nothing here re-runs per forward call."""
    bf16 = jnp.bfloat16

    def conv_taps(w_oihw):  # (Cout, Cin, 3, 3) -> (9, Cin, Cout)
        cout, cin, kh, kw = w_oihw.shape
        assert kh == 3 and kw == 3
        return jnp.transpose(w_oihw, (2, 3, 1, 0)).reshape(kh * kw, cin, cout).astype(bf16)

    def fc_mat(w):  # (out, in) -> (in, out)
        return jnp.asarray(w.T, bf16)

    def bias(b):
        return jnp.asarray(b, jnp.float32).reshape(1, -1)

    consts = [
        jnp.asarray(_conv_shift_mats(batch, 8, 8), bf16),
        conv_taps(params["conv1_w"]), bias(params["conv1_b"]),
        jnp.asarray(_pool_select_mats(batch, 8, 8), bf16),
        jnp.asarray(_conv_shift_mats(batch, 4, 4), bf16),
        conv_taps(params["conv2_w"]), bias(params["conv2_b"]),
        jnp.asarray(_pool_select_mats(batch, 4, 4), bf16),
        jnp.asarray(_conv_shift_mats(batch, 2, 2), bf16),
        conv_taps(params["conv3_w"]), bias(params["conv3_b"]),
        jnp.asarray(_pool_select_mats(batch, 2, 2), bf16),
        fc_mat(params["fc1_w"]), bias(params["fc1_b"]),
        fc_mat(params["fc2_w"]), bias(params["fc2_b"]),
        fc_mat(params["fc3_w"]), bias(params["fc3_b"]),
    ]
    return {"inputs": consts, "n_classes": n_classes}


def make_forward(plan):
    consts = plan["inputs"]
    n_classes = plan["n_classes"]
    vmem_spec = pl.BlockSpec(memory_space=pltpu.MemorySpace.VMEM)

    @jax.jit
    def forward(images_nchw):
        n, c, hh, ww = images_nchw.shape
        # NCHW -> NHWC, flatten spatial into rows, channels on the lane dim; bf16 operands.
        x = jnp.transpose(images_nchw, (0, 2, 3, 1)).reshape(n * hh * ww, c).astype(jnp.bfloat16)
        return pl.pallas_call(
            _mymodel_fused_kernel,
            out_shape=jax.ShapeDtypeStruct((n, n_classes), jnp.float32),
            in_specs=[vmem_spec] * (1 + len(consts)),
            out_specs=vmem_spec,
        )(x, *consts)

    return forward


# ----------------------------------------------------------------------------
# Pure-JAX (f32) reference for validation
# ----------------------------------------------------------------------------
def reference_forward(params, images):
    x = images.astype(jnp.float32)

    def conv(x, w, b):
        y = jax.lax.conv_general_dilated(
            x, w, (1, 1), ((1, 1), (1, 1)),
            dimension_numbers=("NCHW", "OIHW", "NCHW"))
        return jax.nn.relu(y + b.reshape(1, -1, 1, 1))

    def pool(x):
        return jax.lax.reduce_window(x, -jnp.inf, jax.lax.max,
                                     (1, 1, 2, 2), (1, 1, 2, 2), "VALID")

    x = pool(conv(x, params["conv1_w"], params["conv1_b"]))
    x = pool(conv(x, params["conv2_w"], params["conv2_b"]))
    x = pool(conv(x, params["conv3_w"], params["conv3_b"]))
    x = x.reshape(x.shape[0], -1)
    x = jax.nn.relu(x @ params["fc1_w"].T + params["fc1_b"])
    x = jax.nn.relu(x @ params["fc2_w"].T + params["fc2_b"])
    return jax.nn.softmax(x @ params["fc3_w"].T + params["fc3_b"], axis=-1)


if __name__ == "__main__":
    key = jax.random.PRNGKey(0)
    pkey, xkey = jax.random.split(key)

    hidden_dim, kernel_size, n_classes = 8, 3, 10
    batch = 2
    params = init_params(pkey, hidden_dim, kernel_size, n_classes)

    # conv1 requires 64 input channels and an 8x8 spatial image (per compute_image_size)
    images = jax.random.normal(xkey, (batch, 64, 8, 8), jnp.float32)

    plan = prepare_plan(params, batch, n_classes)
    forward = make_forward(plan)

    scores = jax.block_until_ready(forward(images))

    assert scores.shape == (batch, n_classes)
    assert bool(jnp.all(jnp.isfinite(scores)))
    # softmax rows sum to ~1
    assert bool(jnp.allclose(jnp.sum(scores, axis=-1), 1.0, atol=1e-5))
    # match the f32 reference (bf16 MXU operands -> loose tolerance)
    ref = jax.block_until_ready(reference_forward(params, images))
    assert bool(jnp.allclose(scores, ref, atol=5e-2))

    print("KERNEL_OK")
</pallas_src>

<mosaic_0001>
module attributes {stable_mosaic.version = 11 : i64} {
  func.func @_mymodel_fused_kernel(%arg0: memref<128x64xbf16, #tpu.memory_space<vmem>>, %arg1: memref<9x128x128xbf16, #tpu.memory_space<vmem>>, %arg2: memref<9x64x8xbf16, #tpu.memory_space<vmem>>, %arg3: memref<1x8xf32, #tpu.memory_space<vmem>>, %arg4: memref<4x32x128xbf16, #tpu.memory_space<vmem>>, %arg5: memref<9x32x32xbf16, #tpu.memory_space<vmem>>, %arg6: memref<9x8x16xbf16, #tpu.memory_space<vmem>>, %arg7: memref<1x16xf32, #tpu.memory_space<vmem>>, %arg8: memref<4x8x32xbf16, #tpu.memory_space<vmem>>, %arg9: memref<9x8x8xbf16, #tpu.memory_space<vmem>>, %arg10: memref<9x16x32xbf16, #tpu.memory_space<vmem>>, %arg11: memref<1x32xf32, #tpu.memory_space<vmem>>, %arg12: memref<4x2x8xbf16, #tpu.memory_space<vmem>>, %arg13: memref<32x40xbf16, #tpu.memory_space<vmem>>, %arg14: memref<1x40xf32, #tpu.memory_space<vmem>>, %arg15: memref<40x50xbf16, #tpu.memory_space<vmem>>, %arg16: memref<1x50xf32, #tpu.memory_space<vmem>>, %arg17: memref<50x10xbf16, #tpu.memory_space<vmem>>, %arg18: memref<1x10xf32, #tpu.memory_space<vmem>>, %arg19: memref<2x10xf32, #tpu.memory_space<vmem>>) attributes {dimension_semantics = [], scalar_prefetch = 0 : i64, scratch_operands = 0 : i64, tpu.core_type = #tpu.core_type<tc>} {
    %c0 = arith.constant 0 : index
    %c0_0 = arith.constant 0 : index
    %0 = vector.load %arg0[%c0, %c0_0] : memref<128x64xbf16, #tpu.memory_space<vmem>>, vector<128x64xbf16>
    %cst = arith.constant 0.000000e+00 : f32
    %1 = vector.broadcast %cst : f32 to vector<128x8xf32>
    %c0_1 = arith.constant 0 : index
    %c0_2 = arith.constant 0 : index
    %c0_3 = arith.constant 0 : index
    %2 = vector.load %arg1[%c0_1, %c0_2, %c0_3] : memref<9x128x128xbf16, #tpu.memory_space<vmem>>, vector<1x128x128xbf16>
    %3 = vector.shape_cast %2 : vector<1x128x128xbf16> to vector<128x128xbf16>
    %cst_4 = arith.constant dense<0.000000e+00> : vector<128x64xf32>
    %4 = tpu.matmul %3, %0, %cst_4 {dimension_numbers = #tpu.dot_dimension_numbers<[1], [0], [0], [1], [0, 0, 1, 1], [], []>} : vector<128x128xbf16>, vector<128x64xbf16>, vector<128x64xf32> -> vector<128x64xf32>
    %5 = arith.truncf %4 : vector<128x64xf32> to vector<128x64xbf16>
    %c0_5 = arith.constant 0 : index
    %c0_6 = arith.constant 0 : index
    %c0_7 = arith.constant 0 : index
    %6 = vector.load %arg2[%c0_5, %c0_6, %c0_7] : memref<9x64x8xbf16, #tpu.memory_space<vmem>>, vector<1x64x8xbf16>
    %7 = vector.shape_cast %6 : vector<1x64x8xbf16> to vector<64x8xbf16>
    %cst_8 = arith.constant dense<0.000000e+00> : vector<128x8xf32>
    %8 = tpu.matmul %5, %7, %cst_8 {dimension_numbers = #tpu.dot_dimension_numbers<[1], [0], [0], [1], [0, 0, 1, 1], [], []>} : vector<128x64xbf16>, vector<64x8xbf16>, vector<128x8xf32> -> vector<128x8xf32>
    %9 = arith.addf %1, %8 : vector<128x8xf32>
    %c1 = arith.constant 1 : index
    %c0_9 = arith.constant 0 : index
    %c0_10 = arith.constant 0 : index
    %10 = vector.load %arg1[%c1, %c0_9, %c0_10] : memref<9x128x128xbf16, #tpu.memory_space<vmem>>, vector<1x128x128xbf16>
    %11 = vector.shape_cast %10 : vector<1x128x128xbf16> to vector<128x128xbf16>
    %cst_11 = arith.constant dense<0.000000e+00> : vector<128x64xf32>
    %12 = tpu.matmul %11, %0, %cst_11 {dimension_numbers = #tpu.dot_dimension_numbers<[1], [0], [0], [1], [0, 0, 1, 1], [], []>} : vector<128x128xbf16>, vector<128x64xbf16>, vector<128x64xf32> -> vector<128x64xf32>
    %13 = arith.truncf %12 : vector<128x64xf32> to vector<128x64xbf16>
    %c1_12 = arith.constant 1 : index
    %c0_13 = arith.constant 0 : index
    %c0_14 = arith.constant 0 : index
    %14 = vector.load %arg2[%c1_12, %c0_13, %c0_14] : memref<9x64x8xbf16, #tpu.memory_space<vmem>>, vector<1x64x8xbf16>
    %15 = vector.shape_cast %14 : vector<1x64x8xbf16> to vector<64x8xbf16>
    %cst_15 = arith.constant dense<0.000000e+00> : vector<128x8xf32>
    %16 = tpu.matmul %13, %15, %cst_15 {dimension_numbers = #tpu.dot_dimension_numbers<[1], [0], [0], [1], [0, 0, 1, 1], [], []>} : vector<128x64xbf16>, vector<64x8xbf16>, vector<128x8xf32> -> vector<128x8xf32>
    %17 = arith.addf %9, %16 : vector<128x8xf32>
    %c2 = arith.constant 2 : index
    %c0_16 = arith.constant 0 : index
    %c0_17 = arith.constant 0 : index
    %18 = vector.load %arg1[%c2, %c0_16, %c0_17] : memref<9x128x128xbf16, #tpu.memory_space<vmem>>, vector<1x128x128xbf16>
    %19 = vector.shape_cast %18 : vector<1x128x128xbf16> to vector<128x128xbf16>
    %cst_18 = arith.constant dense<0.000000e+00> : vector<128x64xf32>
    %20 = tpu.matmul %19, %0, %cst_18 {dimension_numbers = #tpu.dot_dimension_numbers<[1], [0], [0], [1], [0, 0, 1, 1], [], []>} : vector<128x128xbf16>, vector<128x64xbf16>, vector<128x64xf32> -> vector<128x64xf32>
    %21 = arith.truncf %20 : vector<128x64xf32> to vector<128x64xbf16>
    %c2_19 = arith.constant 2 : index
    %c0_20 = arith.constant 0 : index
    %c0_21 = arith.constant 0 : index
    %22 = vector.load %arg2[%c2_19, %c0_20, %c0_21] : memref<9x64x8xbf16, #tpu.memory_space<vmem>>, vector<1x64x8xbf16>
    %23 = vector.shape_cast %22 : vector<1x64x8xbf16> to vector<64x8xbf16>
    %cst_22 = arith.constant dense<0.000000e+00> : vector<128x8xf32>
    %24 = tpu.matmul %21, %23, %cst_22 {dimension_numbers = #tpu.dot_dimension_numbers<[1], [0], [0], [1], [0, 0, 1, 1], [], []>} : vector<128x64xbf16>, vector<64x8xbf16>, vector<128x8xf32> -> vector<128x8xf32>
    %25 = arith.addf %17, %24 : vector<128x8xf32>
    %c3 = arith.constant 3 : index
    %c0_23 = arith.constant 0 : index
    %c0_24 = arith.constant 0 : index
    %26 = vector.load %arg1[%c3, %c0_23, %c0_24] : memref<9x128x128xbf16, #tpu.memory_space<vmem>>, vector<1x128x128xbf16>
    %27 = vector.shape_cast %26 : vector<1x128x128xbf16> to vector<128x128xbf16>
    %cst_25 = arith.constant dense<0.000000e+00> : vector<128x64xf32>
    %28 = tpu.matmul %27, %0, %cst_25 {dimension_numbers = #tpu.dot_dimension_numbers<[1], [0], [0], [1], [0, 0, 1, 1], [], []>} : vector<128x128xbf16>, vector<128x64xbf16>, vector<128x64xf32> -> vector<128x64xf32>
    %29 = arith.truncf %28 : vector<128x64xf32> to vector<128x64xbf16>
    %c3_26 = arith.constant 3 : index
    %c0_27 = arith.constant 0 : index
    %c0_28 = arith.constant 0 : index
    %30 = vector.load %arg2[%c3_26, %c0_27, %c0_28] : memref<9x64x8xbf16, #tpu.memory_space<vmem>>, vector<1x64x8xbf16>
    %31 = vector.shape_cast %30 : vector<1x64x8xbf16> to vector<64x8xbf16>
    %cst_29 = arith.constant dense<0.000000e+00> : vector<128x8xf32>
    %32 = tpu.matmul %29, %31, %cst_29 {dimension_numbers = #tpu.dot_dimension_numbers<[1], [0], [0], [1], [0, 0, 1, 1], [], []>} : vector<128x64xbf16>, vector<64x8xbf16>, vector<128x8xf32> -> vector<128x8xf32>
    %33 = arith.addf %25, %32 : vector<128x8xf32>
    %c4 = arith.constant 4 : index
    %c0_30 = arith.constant 0 : index
    %c0_31 = arith.constant 0 : index
    %34 = vector.load %arg1[%c4, %c0_30, %c0_31] : memref<9x128x128xbf16, #tpu.memory_space<vmem>>, vector<1x128x128xbf16>
    %35 = vector.shape_cast %34 : vector<1x128x128xbf16> to vector<128x128xbf16>
    %cst_32 = arith.constant dense<0.000000e+00> : vector<128x64xf32>
    %36 = tpu.matmul %35, %0, %cst_32 {dimension_numbers = #tpu.dot_dimension_numbers<[1], [0], [0], [1], [0, 0, 1, 1], [], []>} : vector<128x128xbf16>, vector<128x64xbf16>, vector<128x64xf32> -> vector<128x64xf32>
    %37 = arith.truncf %36 : vector<128x64xf32> to vector<128x64xbf16>
    %c4_33 = arith.constant 4 : index
    %c0_34 = arith.constant 0 : index
    %c0_35 = arith.constant 0 : index
    %38 = vector.load %arg2[%c4_33, %c0_34, %c0_35] : memref<9x64x8xbf16, #tpu.memory_space<vmem>>, vector<1x64x8xbf16>
    %39 = vector.shape_cast %38 : vector<1x64x8xbf16> to vector<64x8xbf16>
    %cst_36 = arith.constant dense<0.000000e+00> : vector<128x8xf32>
    %40 = tpu.matmul %37, %39, %cst_36 {dimension_numbers = #tpu.dot_dimension_numbers<[1], [0], [0], [1], [0, 0, 1, 1], [], []>} : vector<128x64xbf16>, vector<64x8xbf16>, vector<128x8xf32> -> vector<128x8xf32>
    %41 = arith.addf %33, %40 : vector<128x8xf32>
    %c5 = arith.constant 5 : index
    %c0_37 = arith.constant 0 : index
    %c0_38 = arith.constant 0 : index
    %42 = vector.load %arg1[%c5, %c0_37, %c0_38] : memref<9x128x128xbf16, #tpu.memory_space<vmem>>, vector<1x128x128xbf16>
    %43 = vector.shape_cast %42 : vector<1x128x128xbf16> to vector<128x128xbf16>
    %cst_39 = arith.constant dense<0.000000e+00> : vector<128x64xf32>
    %44 = tpu.matmul %43, %0, %cst_39 {dimension_numbers = #tpu.dot_dimension_numbers<[1], [0], [0], [1], [0, 0, 1, 1], [], []>} : vector<128x128xbf16>, vector<128x64xbf16>, vector<128x64xf32> -> vector<128x64xf32>
    %45 = arith.truncf %44 : vector<128x64xf32> to vector<128x64xbf16>
    %c5_40 = arith.constant 5 : index
    %c0_41 = arith.constant 0 : index
    %c0_42 = arith.constant 0 : index
    %46 = vector.load %arg2[%c5_40, %c0_41, %c0_42] : memref<9x64x8xbf16, #tpu.memory_space<vmem>>, vector<1x64x8xbf16>
    %47 = vector.shape_cast %46 : vector<1x64x8xbf16> to vector<64x8xbf16>
    %cst_43 = arith.constant dense<0.000000e+00> : vector<128x8xf32>
    %48 = tpu.matmul %45, %47, %cst_43 {dimension_numbers = #tpu.dot_dimension_numbers<[1], [0], [0], [1], [0, 0, 1, 1], [], []>} : vector<128x64xbf16>, vector<64x8xbf16>, vector<128x8xf32> -> vector<128x8xf32>
    %49 = arith.addf %41, %48 : vector<128x8xf32>
    %c6 = arith.constant 6 : index
    %c0_44 = arith.constant 0 : index
    %c0_45 = arith.constant 0 : index
    %50 = vector.load %arg1[%c6, %c0_44, %c0_45] : memref<9x128x128xbf16, #tpu.memory_space<vmem>>, vector<1x128x128xbf16>
    %51 = vector.shape_cast %50 : vector<1x128x128xbf16> to vector<128x128xbf16>
    %cst_46 = arith.constant dense<0.000000e+00> : vector<128x64xf32>
    %52 = tpu.matmul %51, %0, %cst_46 {dimension_numbers = #tpu.dot_dimension_numbers<[1], [0], [0], [1], [0, 0, 1, 1], [], []>} : vector<128x128xbf16>, vector<128x64xbf16>, vector<128x64xf32> -> vector<128x64xf32>
    %53 = arith.truncf %52 : vector<128x64xf32> to vector<128x64xbf16>
    %c6_47 = arith.constant 6 : index
    %c0_48 = arith.constant 0 : index
    %c0_49 = arith.constant 0 : index
    %54 = vector.load %arg2[%c6_47, %c0_48, %c0_49] : memref<9x64x8xbf16, #tpu.memory_space<vmem>>, vector<1x64x8xbf16>
    %55 = vector.shape_cast %54 : vector<1x64x8xbf16> to vector<64x8xbf16>
    %cst_50 = arith.constant dense<0.000000e+00> : vector<128x8xf32>
    %56 = tpu.matmul %53, %55, %cst_50 {dimension_numbers = #tpu.dot_dimension_numbers<[1], [0], [0], [1], [0, 0, 1, 1], [], []>} : vector<128x64xbf16>, vector<64x8xbf16>, vector<128x8xf32> -> vector<128x8xf32>
    %57 = arith.addf %49, %56 : vector<128x8xf32>
    %c7 = arith.constant 7 : index
    %c0_51 = arith.constant 0 : index
    %c0_52 = arith.constant 0 : index
    %58 = vector.load %arg1[%c7, %c0_51, %c0_52] : memref<9x128x128xbf16, #tpu.memory_space<vmem>>, vector<1x128x128xbf16>
    %59 = vector.shape_cast %58 : vector<1x128x128xbf16> to vector<128x128xbf16>
    %cst_53 = arith.constant dense<0.000000e+00> : vector<128x64xf32>
    %60 = tpu.matmul %59, %0, %cst_53 {dimension_numbers = #tpu.dot_dimension_numbers<[1], [0], [0], [1], [0, 0, 1, 1], [], []>} : vector<128x128xbf16>, vector<128x64xbf16>, vector<128x64xf32> -> vector<128x64xf32>
    %61 = arith.truncf %60 : vector<128x64xf32> to vector<128x64xbf16>
    %c7_54 = arith.constant 7 : index
    %c0_55 = arith.constant 0 : index
    %c0_56 = arith.constant 0 : index
    %62 = vector.load %arg2[%c7_54, %c0_55, %c0_56] : memref<9x64x8xbf16, #tpu.memory_space<vmem>>, vector<1x64x8xbf16>
    %63 = vector.shape_cast %62 : vector<1x64x8xbf16> to vector<64x8xbf16>
    %cst_57 = arith.constant dense<0.000000e+00> : vector<128x8xf32>
    %64 = tpu.matmul %61, %63, %cst_57 {dimension_numbers = #tpu.dot_dimension_numbers<[1], [0], [0], [1], [0, 0, 1, 1], [], []>} : vector<128x64xbf16>, vector<64x8xbf16>, vector<128x8xf32> -> vector<128x8xf32>
    %65 = arith.addf %57, %64 : vector<128x8xf32>
    %c8 = arith.constant 8 : index
    %c0_58 = arith.constant 0 : index
    %c0_59 = arith.constant 0 : index
    %66 = vector.load %arg1[%c8, %c0_58, %c0_59] : memref<9x128x128xbf16, #tpu.memory_space<vmem>>, vector<1x128x128xbf16>
    %67 = vector.shape_cast %66 : vector<1x128x128xbf16> to vector<128x128xbf16>
    %cst_60 = arith.constant dense<0.000000e+00> : vector<128x64xf32>
    %68 = tpu.matmul %67, %0, %cst_60 {dimension_numbers = #tpu.dot_dimension_numbers<[1], [0], [0], [1], [0, 0, 1, 1], [], []>} : vector<128x128xbf16>, vector<128x64xbf16>, vector<128x64xf32> -> vector<128x64xf32>
    %69 = arith.truncf %68 : vector<128x64xf32> to vector<128x64xbf16>
    %c8_61 = arith.constant 8 : index
    %c0_62 = arith.constant 0 : index
    %c0_63 = arith.constant 0 : index
    %70 = vector.load %arg2[%c8_61, %c0_62, %c0_63] : memref<9x64x8xbf16, #tpu.memory_space<vmem>>, vector<1x64x8xbf16>
    %71 = vector.shape_cast %70 : vector<1x64x8xbf16> to vector<64x8xbf16>
    %cst_64 = arith.constant dense<0.000000e+00> : vector<128x8xf32>
    %72 = tpu.matmul %69, %71, %cst_64 {dimension_numbers = #tpu.dot_dimension_numbers<[1], [0], [0], [1], [0, 0, 1, 1], [], []>} : vector<128x64xbf16>, vector<64x8xbf16>, vector<128x8xf32> -> vector<128x8xf32>
    %73 = arith.addf %65, %72 : vector<128x8xf32>
    %c0_65 = arith.constant 0 : index
    %c0_66 = arith.constant 0 : index
    %74 = vector.load %arg3[%c0_65, %c0_66] : memref<1x8xf32, #tpu.memory_space<vmem>>, vector<1x8xf32>
    %75 = vector.broadcast %74 : vector<1x8xf32> to vector<128x8xf32>
    %76 = arith.addf %73, %75 : vector<128x8xf32>
    %cst_67 = arith.constant 0.000000e+00 : f32
    %77 = vector.broadcast %cst_67 : f32 to vector<128x8xf32>
    %78 = arith.maximumf %76, %77 : vector<128x8xf32>
    %79 = arith.truncf %78 : vector<128x8xf32> to vector<128x8xbf16>
    %c0_68 = arith.constant 0 : index
    %c0_69 = arith.constant 0 : index
    %c0_70 = arith.constant 0 : index
    %80 = vector.load %arg4[%c0_68, %c0_69, %c0_70] : memref<4x32x128xbf16, #tpu.memory_space<vmem>>, vector<1x32x128xbf16>
    %81 = vector.shape_cast %80 : vector<1x32x128xbf16> to vector<32x128xbf16>
    %cst_71 = arith.constant dense<0.000000e+00> : vector<32x8xf32>
    %82 = tpu.matmul %81, %79, %cst_71 {dimension_numbers = #tpu.dot_dimension_numbers<[1], [0], [0], [1], [0, 0, 1, 1], [], []>} : vector<32x128xbf16>, vector<128x8xbf16>, vector<32x8xf32> -> vector<32x8xf32>
    %c1_72 = arith.constant 1 : index
    %c0_73 = arith.constant 0 : index
    %c0_74 = arith.constant 0 : index
    %83 = vector.load %arg4[%c1_72, %c0_73, %c0_74] : memref<4x32x128xbf16, #tpu.memory_space<vmem>>, vector<1x32x128xbf16>
    %84 = vector.shape_cast %83 : vector<1x32x128xbf16> to vector<32x128xbf16>
    %cst_75 = arith.constant dense<0.000000e+00> : vector<32x8xf32>
    %85 = tpu.matmul %84, %79, %cst_75 {dimension_numbers = #tpu.dot_dimension_numbers<[1], [0], [0], [1], [0, 0, 1, 1], [], []>} : vector<32x128xbf16>, vector<128x8xbf16>, vector<32x8xf32> -> vector<32x8xf32>
    %86 = arith.maximumf %82, %85 : vector<32x8xf32>
    %c2_76 = arith.constant 2 : index
    %c0_77 = arith.constant 0 : index
    %c0_78 = arith.constant 0 : index
    %87 = vector.load %arg4[%c2_76, %c0_77, %c0_78] : memref<4x32x128xbf16, #tpu.memory_space<vmem>>, vector<1x32x128xbf16>
    %88 = vector.shape_cast %87 : vector<1x32x128xbf16> to vector<32x128xbf16>
    %cst_79 = arith.constant dense<0.000000e+00> : vector<32x8xf32>
    %89 = tpu.matmul %88, %79, %cst_79 {dimension_numbers = #tpu.dot_dimension_numbers<[1], [0], [0], [1], [0, 0, 1, 1], [], []>} : vector<32x128xbf16>, vector<128x8xbf16>, vector<32x8xf32> -> vector<32x8xf32>
    %90 = arith.maximumf %86, %89 : vector<32x8xf32>
    %c3_80 = arith.constant 3 : index
    %c0_81 = arith.constant 0 : index
    %c0_82 = arith.constant 0 : index
    %91 = vector.load %arg4[%c3_80, %c0_81, %c0_82] : memref<4x32x128xbf16, #tpu.memory_space<vmem>>, vector<1x32x128xbf16>
    %92 = vector.shape_cast %91 : vector<1x32x128xbf16> to vector<32x128xbf16>
    %cst_83 = arith.constant dense<0.000000e+00> : vector<32x8xf32>
    %93 = tpu.matmul %92, %79, %cst_83 {dimension_numbers = #tpu.dot_dimension_numbers<[1], [0], [0], [1], [0, 0, 1, 1], [], []>} : vector<32x128xbf16>, vector<128x8xbf16>, vector<32x8xf32> -> vector<32x8xf32>
    %94 = arith.maximumf %90, %93 : vector<32x8xf32>
    %95 = arith.truncf %94 : vector<32x8xf32> to vector<32x8xbf16>
    %cst_84 = arith.constant 0.000000e+00 : f32
    %96 = vector.broadcast %cst_84 : f32 to vector<32x16xf32>
    %c0_85 = arith.constant 0 : index
    %c0_86 = arith.constant 0 : index
    %c0_87 = arith.constant 0 : index
    %97 = vector.load %arg5[%c0_85, %c0_86, %c0_87] : memref<9x32x32xbf16, #tpu.memory_space<vmem>>, vector<1x32x32xbf16>
    %98 = vector.shape_cast %97 : vector<1x32x32xbf16> to vector<32x32xbf16>
    %cst_88 = arith.constant dense<0.000000e+00> : vector<32x8xf32>
    %99 = tpu.matmul %98, %95, %cst_88 {dimension_numbers = #tpu.dot_dimension_numbers<[1], [0], [0], [1], [0, 0, 1, 1], [], []>} : vector<32x32xbf16>, vector<32x8xbf16>, vector<32x8xf32> -> vector<32x8xf32>
    %100 = arith.truncf %99 : vector<32x8xf32> to vector<32x8xbf16>
    %c0_89 = arith.constant 0 : index
    %c0_90 = arith.constant 0 : index
    %c0_91 = arith.constant 0 : index
    %101 = vector.load %arg6[%c0_89, %c0_90, %c0_91] : memref<9x8x16xbf16, #tpu.memory_space<vmem>>, vector<1x8x16xbf16>
    %102 = vector.shape_cast %101 : vector<1x8x16xbf16> to vector<8x16xbf16>
    %cst_92 = arith.constant dense<0.000000e+00> : vector<32x16xf32>
    %103 = tpu.matmul %100, %102, %cst_92 {dimension_numbers = #tpu.dot_dimension_numbers<[1], [0], [0], [1], [0, 0, 1, 1], [], []>} : vector<32x8xbf16>, vector<8x16xbf16>, vector<32x16xf32> -> vector<32x16xf32>
    %104 = arith.addf %96, %103 : vector<32x16xf32>
    %c1_93 = arith.constant 1 : index
    %c0_94 = arith.constant 0 : index
    %c0_95 = arith.constant 0 : index
    %105 = vector.load %arg5[%c1_93, %c0_94, %c0_95] : memref<9x32x32xbf16, #tpu.memory_space<vmem>>, vector<1x32x32xbf16>
    %106 = vector.shape_cast %105 : vector<1x32x32xbf16> to vector<32x32xbf16>
    %cst_96 = arith.constant dense<0.000000e+00> : vector<32x8xf32>
    %107 = tpu.matmul %106, %95, %cst_96 {dimension_numbers = #tpu.dot_dimension_numbers<[1], [0], [0], [1], [0, 0, 1, 1], [], []>} : vector<32x32xbf16>, vector<32x8xbf16>, vector<32x8xf32> -> vector<32x8xf32>
    %108 = arith.truncf %107 : vector<32x8xf32> to vector<32x8xbf16>
    %c1_97 = arith.constant 1 : index
    %c0_98 = arith.constant 0 : index
    %c0_99 = arith.constant 0 : index
    %109 = vector.load %arg6[%c1_97, %c0_98, %c0_99] : memref<9x8x16xbf16, #tpu.memory_space<vmem>>, vector<1x8x16xbf16>
    %110 = vector.shape_cast %109 : vector<1x8x16xbf16> to vector<8x16xbf16>
    %cst_100 = arith.constant dense<0.000000e+00> : vector<32x16xf32>
    %111 = tpu.matmul %108, %110, %cst_100 {dimension_numbers = #tpu.dot_dimension_numbers<[1], [0], [0], [1], [0, 0, 1, 1], [], []>} : vector<32x8xbf16>, vector<8x16xbf16>, vector<32x16xf32> -> vector<32x16xf32>
    %112 = arith.addf %104, %111 : vector<32x16xf32>
    %c2_101 = arith.constant 2 : index
    %c0_102 = arith.constant 0 : index
    %c0_103 = arith.constant 0 : index
    %113 = vector.load %arg5[%c2_101, %c0_102, %c0_103] : memref<9x32x32xbf16, #tpu.memory_space<vmem>>, vector<1x32x32xbf16>
    %114 = vector.shape_cast %113 : vector<1x32x32xbf16> to vector<32x32xbf16>
    %cst_104 = arith.constant dense<0.000000e+00> : vector<32x8xf32>
    %115 = tpu.matmul %114, %95, %cst_104 {dimension_numbers = #tpu.dot_dimension_numbers<[1], [0], [0], [1], [0, 0, 1, 1], [], []>} : vector<32x32xbf16>, vector<32x8xbf16>, vector<32x8xf32> -> vector<32x8xf32>
    %116 = arith.truncf %115 : vector<32x8xf32> to vector<32x8xbf16>
    %c2_105 = arith.constant 2 : index
    %c0_106 = arith.constant 0 : index
    %c0_107 = arith.constant 0 : index
    %117 = vector.load %arg6[%c2_105, %c0_106, %c0_107] : memref<9x8x16xbf16, #tpu.memory_space<vmem>>, vector<1x8x16xbf16>
    %118 = vector.shape_cast %117 : vector<1x8x16xbf16> to vector<8x16xbf16>
    %cst_108 = arith.constant dense<0.000000e+00> : vector<32x16xf32>
    %119 = tpu.matmul %116, %118, %cst_108 {dimension_numbers = #tpu.dot_dimension_numbers<[1], [0], [0], [1], [0, 0, 1, 1], [], []>} : vector<32x8xbf16>, vector<8x16xbf16>, vector<32x16xf32> -> vector<32x16xf32>
    %120 = arith.addf %112, %119 : vector<32x16xf32>
    %c3_109 = arith.constant 3 : index
    %c0_110 = arith.constant 0 : index
    %c0_111 = arith.constant 0 : index
    %121 = vector.load %arg5[%c3_109, %c0_110, %c0_111] : memref<9x32x32xbf16, #tpu.memory_space<vmem>>, vector<1x32x32xbf16>
    %122 = vector.shape_cast %121 : vector<1x32x32xbf16> to vector<32x32xbf16>
    %cst_112 = arith.constant dense<0.000000e+00> : vector<32x8xf32>
    %123 = tpu.matmul %122, %95, %cst_112 {dimension_numbers = #tpu.dot_dimension_numbers<[1], [0], [0], [1], [0, 0, 1, 1], [], []>} : vector<32x32xbf16>, vector<32x8xbf16>, vector<32x8xf32> -> vector<32x8xf32>
    %124 = arith.truncf %123 : vector<32x8xf32> to vector<32x8xbf16>
    %c3_113 = arith.constant 3 : index
    %c0_114 = arith.constant 0 : index
    %c0_115 = arith.constant 0 : index
    %125 = vector.load %arg6[%c3_113, %c0_114, %c0_115] : memref<9x8x16xbf16, #tpu.memory_space<vmem>>, vector<1x8x16xbf16>
    %126 = vector.shape_cast %125 : vector<1x8x16xbf16> to vector<8x16xbf16>
    %cst_116 = arith.constant dense<0.000000e+00> : vector<32x16xf32>
    %127 = tpu.matmul %124, %126, %cst_116 {dimension_numbers = #tpu.dot_dimension_numbers<[1], [0], [0], [1], [0, 0, 1, 1], [], []>} : vector<32x8xbf16>, vector<8x16xbf16>, vector<32x16xf32> -> vector<32x16xf32>
    %128 = arith.addf %120, %127 : vector<32x16xf32>
    %c4_117 = arith.constant 4 : index
    %c0_118 = arith.constant 0 : index
    %c0_119 = arith.constant 0 : index
    %129 = vector.load %arg5[%c4_117, %c0_118, %c0_119] : memref<9x32x32xbf16, #tpu.memory_space<vmem>>, vector<1x32x32xbf16>
    %130 = vector.shape_cast %129 : vector<1x32x32xbf16> to vector<32x32xbf16>
    %cst_120 = arith.constant dense<0.000000e+00> : vector<32x8xf32>
    %131 = tpu.matmul %130, %95, %cst_120 {dimension_numbers = #tpu.dot_dimension_numbers<[1], [0], [0], [1], [0, 0, 1, 1], [], []>} : vector<32x32xbf16>, vector<32x8xbf16>, vector<32x8xf32> -> vector<32x8xf32>
    %132 = arith.truncf %131 : vector<32x8xf32> to vector<32x8xbf16>
    %c4_121 = arith.constant 4 : index
    %c0_122 = arith.constant 0 : index
    %c0_123 = arith.constant 0 : index
    %133 = vector.load %arg6[%c4_121, %c0_122, %c0_123] : memref<9x8x16xbf16, #tpu.memory_space<vmem>>, vector<1x8x16xbf16>
    %134 = vector.shape_cast %133 : vector<1x8x16xbf16> to vector<8x16xbf16>
    %cst_124 = arith.constant dense<0.000000e+00> : vector<32x16xf32>
    %135 = tpu.matmul %132, %134, %cst_124 {dimension_numbers = #tpu.dot_dimension_numbers<[1], [0], [0], [1], [0, 0, 1, 1], [], []>} : vector<32x8xbf16>, vector<8x16xbf16>, vector<32x16xf32> -> vector<32x16xf32>
    %136 = arith.addf %128, %135 : vector<32x16xf32>
    %c5_125 = arith.constant 5 : index
    %c0_126 = arith.constant 0 : index
    %c0_127 = arith.constant 0 : index
    %137 = vector.load %arg5[%c5_125, %c0_126, %c0_127] : memref<9x32x32xbf16, #tpu.memory_space<vmem>>, vector<1x32x32xbf16>
    %138 = vector.shape_cast %137 : vector<1x32x32xbf16> to vector<32x32xbf16>
    %cst_128 = arith.constant dense<0.000000e+00> : vector<32x8xf32>
    %139 = tpu.matmul %138, %95, %cst_128 {dimension_numbers = #tpu.dot_dimension_numbers<[1], [0], [0], [1], [0, 0, 1, 1], [], []>} : vector<32x32xbf16>, vector<32x8xbf16>, vector<32x8xf32> -> vector<32x8xf32>
    %140 = arith.truncf %139 : vector<32x8xf32> to vector<32x8xbf16>
    %c5_129 = arith.constant 5 : index
    %c0_130 = arith.constant 0 : index
    %c0_131 = arith.constant 0 : index
    %141 = vector.load %arg6[%c5_129, %c0_130, %c0_131] : memref<9x8x16xbf16, #tpu.memory_space<vmem>>, vector<1x8x16xbf16>
    %142 = vector.shape_cast %141 : vector<1x8x16xbf16> to vector<8x16xbf16>
    %cst_132 = arith.constant dense<0.000000e+00> : vector<32x16xf32>
    %143 = tpu.matmul %140, %142, %cst_132 {dimension_numbers = #tpu.dot_dimension_numbers<[1], [0], [0], [1], [0, 0, 1, 1], [], []>} : vector<32x8xbf16>, vector<8x16xbf16>, vector<32x16xf32> -> vector<32x16xf32>
    %144 = arith.addf %136, %143 : vector<32x16xf32>
    %c6_133 = arith.constant 6 : index
    %c0_134 = arith.constant 0 : index
    %c0_135 = arith.constant 0 : index
    %145 = vector.load %arg5[%c6_133, %c0_134, %c0_135] : memref<9x32x32xbf16, #tpu.memory_space<vmem>>, vector<1x32x32xbf16>
    %146 = vector.shape_cast %145 : vector<1x32x32xbf16> to vector<32x32xbf16>
    %cst_136 = arith.constant dense<0.000000e+00> : vector<32x8xf32>
    %147 = tpu.matmul %146, %95, %cst_136 {dimension_numbers = #tpu.dot_dimension_numbers<[1], [0], [0], [1], [0, 0, 1, 1], [], []>} : vector<32x32xbf16>, vector<32x8xbf16>, vector<32x8xf32> -> vector<32x8xf32>
    %148 = arith.truncf %147 : vector<32x8xf32> to vector<32x8xbf16>
    %c6_137 = arith.constant 6 : index
    %c0_138 = arith.constant 0 : index
    %c0_139 = arith.constant 0 : index
    %149 = vector.load %arg6[%c6_137, %c0_138, %c0_139] : memref<9x8x16xbf16, #tpu.memory_space<vmem>>, vector<1x8x16xbf16>
    %150 = vector.shape_cast %149 : vector<1x8x16xbf16> to vector<8x16xbf16>
    %cst_140 = arith.constant dense<0.000000e+00> : vector<32x16xf32>
    %151 = tpu.matmul %148, %150, %cst_140 {dimension_numbers = #tpu.dot_dimension_numbers<[1], [0], [0], [1], [0, 0, 1, 1], [], []>} : vector<32x8xbf16>, vector<8x16xbf16>, vector<32x16xf32> -> vector<32x16xf32>
    %152 = arith.addf %144, %151 : vector<32x16xf32>
    %c7_141 = arith.constant 7 : index
    %c0_142 = arith.constant 0 : index
    %c0_143 = arith.constant 0 : index
    %153 = vector.load %arg5[%c7_141, %c0_142, %c0_143] : memref<9x32x32xbf16, #tpu.memory_space<vmem>>, vector<1x32x32xbf16>
    %154 = vector.shape_cast %153 : vector<1x32x32xbf16> to vector<32x32xbf16>
    %cst_144 = arith.constant dense<0.000000e+00> : vector<32x8xf32>
    %155 = tpu.matmul %154, %95, %cst_144 {dimension_numbers = #tpu.dot_dimension_numbers<[1], [0], [0], [1], [0, 0, 1, 1], [], []>} : vector<32x32xbf16>, vector<32x8xbf16>, vector<32x8xf32> -> vector<32x8xf32>
    %156 = arith.truncf %155 : vector<32x8xf32> to vector<32x8xbf16>
    %c7_145 = arith.constant 7 : index
    %c0_146 = arith.constant 0 : index
    %c0_147 = arith.constant 0 : index
    %157 = vector.load %arg6[%c7_145, %c0_146, %c0_147] : memref<9x8x16xbf16, #tpu.memory_space<vmem>>, vector<1x8x16xbf16>
    %158 = vector.shape_cast %157 : vector<1x8x16xbf16> to vector<8x16xbf16>
    %cst_148 = arith.constant dense<0.000000e+00> : vector<32x16xf32>
    %159 = tpu.matmul %156, %158, %cst_148 {dimension_numbers = #tpu.dot_dimension_numbers<[1], [0], [0], [1], [0, 0, 1, 1], [], []>} : vector<32x8xbf16>, vector<8x16xbf16>, vector<32x16xf32> -> vector<32x16xf32>
    %160 = arith.addf %152, %159 : vector<32x16xf32>
    %c8_149 = arith.constant 8 : index
    %c0_150 = arith.constant 0 : index
    %c0_151 = arith.constant 0 : index
    %161 = vector.load %arg5[%c8_149, %c0_150, %c0_151] : memref<9x32x32xbf16, #tpu.memory_space<vmem>>, vector<1x32x32xbf16>
    %162 = vector.shape_cast %161 : vector<1x32x32xbf16> to vector<32x32xbf16>
    %cst_152 = arith.constant dense<0.000000e+00> : vector<32x8xf32>
    %163 = tpu.matmul %162, %95, %cst_152 {dimension_numbers = #tpu.dot_dimension_numbers<[1], [0], [0], [1], [0, 0, 1, 1], [], []>} : vector<32x32xbf16>, vector<32x8xbf16>, vector<32x8xf32> -> vector<32x8xf32>
    %164 = arith.truncf %163 : vector<32x8xf32> to vector<32x8xbf16>
    %c8_153 = arith.constant 8 : index
    %c0_154 = arith.constant 0 : index
    %c0_155 = arith.constant 0 : index
    %165 = vector.load %arg6[%c8_153, %c0_154, %c0_155] : memref<9x8x16xbf16, #tpu.memory_space<vmem>>, vector<1x8x16xbf16>
    %166 = vector.shape_cast %165 : vector<1x8x16xbf16> to vector<8x16xbf16>
    %cst_156 = arith.constant dense<0.000000e+00> : vector<32x16xf32>
    %167 = tpu.matmul %164, %166, %cst_156 {dimension_numbers = #tpu.dot_dimension_numbers<[1], [0], [0], [1], [0, 0, 1, 1], [], []>} : vector<32x8xbf16>, vector<8x16xbf16>, vector<32x16xf32> -> vector<32x16xf32>
    %168 = arith.addf %160, %167 : vector<32x16xf32>
    %c0_157 = arith.constant 0 : index
    %c0_158 = arith.constant 0 : index
    %169 = vector.load %arg7[%c0_157, %c0_158] : memref<1x16xf32, #tpu.memory_space<vmem>>, vector<1x16xf32>
    %170 = vector.broadcast %169 : vector<1x16xf32> to vector<32x16xf32>
    %171 = arith.addf %168, %170 : vector<32x16xf32>
    %cst_159 = arith.constant 0.000000e+00 : f32
    %172 = vector.broadcast %cst_159 : f32 to vector<32x16xf32>
    %173 = arith.maximumf %171, %172 : vector<32x16xf32>
    %174 = arith.truncf %173 : vector<32x16xf32> to vector<32x16xbf16>
    %c0_160 = arith.constant 0 : index
    %c0_161 = arith.constant 0 : index
    %c0_162 = arith.constant 0 : index
    %175 = vector.load %arg8[%c0_160, %c0_161, %c0_162] : memref<4x8x32xbf16, #tpu.memory_space<vmem>>, vector<1x8x32xbf16>
    %176 = vector.shape_cast %175 : vector<1x8x32xbf16> to vector<8x32xbf16>
    %cst_163 = arith.constant dense<0.000000e+00> : vector<8x16xf32>
    %177 = tpu.matmul %176, %174, %cst_163 {dimension_numbers = #tpu.dot_dimension_numbers<[1], [0], [0], [1], [0, 0, 1, 1], [], []>} : vector<8x32xbf16>, vector<32x16xbf16>, vector<8x16xf32> -> vector<8x16xf32>
    %c1_164 = arith.constant 1 : index
    %c0_165 = arith.constant 0 : index
    %c0_166 = arith.constant 0 : index
    %178 = vector.load %arg8[%c1_164, %c0_165, %c0_166] : memref<4x8x32xbf16, #tpu.memory_space<vmem>>, vector<1x8x32xbf16>
    %179 = vector.shape_cast %178 : vector<1x8x32xbf16> to vector<8x32xbf16>
    %cst_167 = arith.constant dense<0.000000e+00> : vector<8x16xf32>
    %180 = tpu.matmul %179, %174, %cst_167 {dimension_numbers = #tpu.dot_dimension_numbers<[1], [0], [0], [1], [0, 0, 1, 1], [], []>} : vector<8x32xbf16>, vector<32x16xbf16>, vector<8x16xf32> -> vector<8x16xf32>
    %181 = arith.maximumf %177, %180 : vector<8x16xf32>
    %c2_168 = arith.constant 2 : index
    %c0_169 = arith.constant 0 : index
    %c0_170 = arith.constant 0 : index
    %182 = vector.load %arg8[%c2_168, %c0_169, %c0_170] : memref<4x8x32xbf16, #tpu.memory_space<vmem>>, vector<1x8x32xbf16>
    %183 = vector.shape_cast %182 : vector<1x8x32xbf16> to vector<8x32xbf16>
    %cst_171 = arith.constant dense<0.000000e+00> : vector<8x16xf32>
    %184 = tpu.matmul %183, %174, %cst_171 {dimension_numbers = #tpu.dot_dimension_numbers<[1], [0], [0], [1], [0, 0, 1, 1], [], []>} : vector<8x32xbf16>, vector<32x16xbf16>, vector<8x16xf32> -> vector<8x16xf32>
    %185 = arith.maximumf %181, %184 : vector<8x16xf32>
    %c3_172 = arith.constant 3 : index
    %c0_173 = arith.constant 0 : index
    %c0_174 = arith.constant 0 : index
    %186 = vector.load %arg8[%c3_172, %c0_173, %c0_174] : memref<4x8x32xbf16, #tpu.memory_space<vmem>>, vector<1x8x32xbf16>
    %187 = vector.shape_cast %186 : vector<1x8x32xbf16> to vector<8x32xbf16>
    %cst_175 = arith.constant dense<0.000000e+00> : vector<8x16xf32>
    %188 = tpu.matmul %187, %174, %cst_175 {dimension_numbers = #tpu.dot_dimension_numbers<[1], [0], [0], [1], [0, 0, 1, 1], [], []>} : vector<8x32xbf16>, vector<32x16xbf16>, vector<8x16xf32> -> vector<8x16xf32>
    %189 = arith.maximumf %185, %188 : vector<8x16xf32>
    %190 = arith.truncf %189 : vector<8x16xf32> to vector<8x16xbf16>
    %cst_176 = arith.constant 0.000000e+00 : f32
    %191 = vector.broadcast %cst_176 : f32 to vector<8x32xf32>
    %c0_177 = arith.constant 0 : index
    %c0_178 = arith.constant 0 : index
    %c0_179 = arith.constant 0 : index
    %192 = vector.load %arg9[%c0_177, %c0_178, %c0_179] : memref<9x8x8xbf16, #tpu.memory_space<vmem>>, vector<1x8x8xbf16>
    %193 = vector.shape_cast %192 : vector<1x8x8xbf16> to vector<8x8xbf16>
    %cst_180 = arith.constant dense<0.000000e+00> : vector<8x16xf32>
    %194 = tpu.matmul %193, %190, %cst_180 {dimension_numbers = #tpu.dot_dimension_numbers<[1], [0], [0], [1], [0, 0, 1, 1], [], []>} : vector<8x8xbf16>, vector<8x16xbf16>, vector<8x16xf32> -> vector<8x16xf32>
    %195 = arith.truncf %194 : vector<8x16xf32> to vector<8x16xbf16>
    %c0_181 = arith.constant 0 : index
    %c0_182 = arith.constant 0 : index
    %c0_183 = arith.constant 0 : index
    %196 = vector.load %arg10[%c0_181, %c0_182, %c0_183] : memref<9x16x32xbf16, #tpu.memory_space<vmem>>, vector<1x16x32xbf16>
    %197 = vector.shape_cast %196 : vector<1x16x32xbf16> to vector<16x32xbf16>
    %cst_184 = arith.constant dense<0.000000e+00> : vector<8x32xf32>
    %198 = tpu.matmul %195, %197, %cst_184 {dimension_numbers = #tpu.dot_dimension_numbers<[1], [0], [0], [1], [0, 0, 1, 1], [], []>} : vector<8x16xbf16>, vector<16x32xbf16>, vector<8x32xf32> -> vector<8x32xf32>
    %199 = arith.addf %191, %198 : vector<8x32xf32>
    %c1_185 = arith.constant 1 : index
    %c0_186 = arith.constant 0 : index
    %c0_187 = arith.constant 0 : index
    %200 = vector.load %arg9[%c1_185, %c0_186, %c0_187] : memref<9x8x8xbf16, #tpu.memory_space<vmem>>, vector<1x8x8xbf16>
    %201 = vector.shape_cast %200 : vector<1x8x8xbf16> to vector<8x8xbf16>
    %cst_188 = arith.constant dense<0.000000e+00> : vector<8x16xf32>
    %202 = tpu.matmul %201, %190, %cst_188 {dimension_numbers = #tpu.dot_dimension_numbers<[1], [0], [0], [1], [0, 0, 1, 1], [], []>} : vector<8x8xbf16>, vector<8x16xbf16>, vector<8x16xf32> -> vector<8x16xf32>
    %203 = arith.truncf %202 : vector<8x16xf32> to vector<8x16xbf16>
    %c1_189 = arith.constant 1 : index
    %c0_190 = arith.constant 0 : index
    %c0_191 = arith.constant 0 : index
    %204 = vector.load %arg10[%c1_189, %c0_190, %c0_191] : memref<9x16x32xbf16, #tpu.memory_space<vmem>>, vector<1x16x32xbf16>
    %205 = vector.shape_cast %204 : vector<1x16x32xbf16> to vector<16x32xbf16>
    %cst_192 = arith.constant dense<0.000000e+00> : vector<8x32xf32>
    %206 = tpu.matmul %203, %205, %cst_192 {dimension_numbers = #tpu.dot_dimension_numbers<[1], [0], [0], [1], [0, 0, 1, 1], [], []>} : vector<8x16xbf16>, vector<16x32xbf16>, vector<8x32xf32> -> vector<8x32xf32>
    %207 = arith.addf %199, %206 : vector<8x32xf32>
    %c2_193 = arith.constant 2 : index
    %c0_194 = arith.constant 0 : index
    %c0_195 = arith.constant 0 : index
    %208 = vector.load %arg9[%c2_193, %c0_194, %c0_195] : memref<9x8x8xbf16, #tpu.memory_space<vmem>>, vector<1x8x8xbf16>
    %209 = vector.shape_cast %208 : vector<1x8x8xbf16> to vector<8x8xbf16>
    %cst_196 = arith.constant dense<0.000000e+00> : vector<8x16xf32>
    %210 = tpu.matmul %209, %190, %cst_196 {dimension_numbers = #tpu.dot_dimension_numbers<[1], [0], [0], [1], [0, 0, 1, 1], [], []>} : vector<8x8xbf16>, vector<8x16xbf16>, vector<8x16xf32> -> vector<8x16xf32>
    %211 = arith.truncf %210 : vector<8x16xf32> to vector<8x16xbf16>
    %c2_197 = arith.constant 2 : index
    %c0_198 = arith.constant 0 : index
    %c0_199 = arith.constant 0 : index
    %212 = vector.load %arg10[%c2_197, %c0_198, %c0_199] : memref<9x16x32xbf16, #tpu.memory_space<vmem>>, vector<1x16x32xbf16>
    %213 = vector.shape_cast %212 : vector<1x16x32xbf16> to vector<16x32xbf16>
    %cst_200 = arith.constant dense<0.000000e+00> : vector<8x32xf32>
    %214 = tpu.matmul %211, %213, %cst_200 {dimension_numbers = #tpu.dot_dimension_numbers<[1], [0], [0], [1], [0, 0, 1, 1], [], []>} : vector<8x16xbf16>, vector<16x32xbf16>, vector<8x32xf32> -> vector<8x32xf32>
    %215 = arith.addf %207, %214 : vector<8x32xf32>
    %c3_201 = arith.constant 3 : index
    %c0_202 = arith.constant 0 : index
    %c0_203 = arith.constant 0 : index
    %216 = vector.load %arg9[%c3_201, %c0_202, %c0_203] : memref<9x8x8xbf16, #tpu.memory_space<vmem>>, vector<1x8x8xbf16>
    %217 = vector.shape_cast %216 : vector<1x8x8xbf16> to vector<8x8xbf16>
    %cst_204 = arith.constant dense<0.000000e+00> : vector<8x16xf32>
    %218 = tpu.matmul %217, %190, %cst_204 {dimension_numbers = #tpu.dot_dimension_numbers<[1], [0], [0], [1], [0, 0, 1, 1], [], []>} : vector<8x8xbf16>, vector<8x16xbf16>, vector<8x16xf32> -> vector<8x16xf32>
    %219 = arith.truncf %218 : vector<8x16xf32> to vector<8x16xbf16>
    %c3_205 = arith.constant 3 : index
    %c0_206 = arith.constant 0 : index
    %c0_207 = arith.constant 0 : index
    %220 = vector.load %arg10[%c3_205, %c0_206, %c0_207] : memref<9x16x32xbf16, #tpu.memory_space<vmem>>, vector<1x16x32xbf16>
    %221 = vector.shape_cast %220 : vector<1x16x32xbf16> to vector<16x32xbf16>
    %cst_208 = arith.constant dense<0.000000e+00> : vector<8x32xf32>
    %222 = tpu.matmul %219, %221, %cst_208 {dimension_numbers = #tpu.dot_dimension_numbers<[1], [0], [0], [1], [0, 0, 1, 1], [], []>} : vector<8x16xbf16>, vector<16x32xbf16>, vector<8x32xf32> -> vector<8x32xf32>
    %223 = arith.addf %215, %222 : vector<8x32xf32>
    %c4_209 = arith.constant 4 : index
    %c0_210 = arith.constant 0 : index
    %c0_211 = arith.constant 0 : index
    %224 = vector.load %arg9[%c4_209, %c0_210, %c0_211] : memref<9x8x8xbf16, #tpu.memory_space<vmem>>, vector<1x8x8xbf16>
    %225 = vector.shape_cast %224 : vector<1x8x8xbf16> to vector<8x8xbf16>
    %cst_212 = arith.constant dense<0.000000e+00> : vector<8x16xf32>
    %226 = tpu.matmul %225, %190, %cst_212 {dimension_numbers = #tpu.dot_dimension_numbers<[1], [0], [0], [1], [0, 0, 1, 1], [], []>} : vector<8x8xbf16>, vector<8x16xbf16>, vector<8x16xf32> -> vector<8x16xf32>
    %227 = arith.truncf %226 : vector<8x16xf32> to vector<8x16xbf16>
    %c4_213 = arith.constant 4 : index
    %c0_214 = arith.constant 0 : index
    %c0_215 = arith.constant 0 : index
    %228 = vector.load %arg10[%c4_213, %c0_214, %c0_215] : memref<9x16x32xbf16, #tpu.memory_space<vmem>>, vector<1x16x32xbf16>
    %229 = vector.shape_cast %228 : vector<1x16x32xbf16> to vector<16x32xbf16>
    %cst_216 = arith.constant dense<0.000000e+00> : vector<8x32xf32>
    %230 = tpu.matmul %227, %229, %cst_216 {dimension_numbers = #tpu.dot_dimension_numbers<[1], [0], [0], [1], [0, 0, 1, 1], [], []>} : vector<8x16xbf16>, vector<16x32xbf16>, vector<8x32xf32> -> vector<8x32xf32>
    %231 = arith.addf %223, %230 : vector<8x32xf32>
    %c5_217 = arith.constant 5 : index
    %c0_218 = arith.constant 0 : index
    %c0_219 = arith.constant 0 : index
    %232 = vector.load %arg9[%c5_217, %c0_218, %c0_219] : memref<9x8x8xbf16, #tpu.memory_space<vmem>>, vector<1x8x8xbf16>
    %233 = vector.shape_cast %232 : vector<1x8x8xbf16> to vector<8x8xbf16>
    %cst_220 = arith.constant dense<0.000000e+00> : vector<8x16xf32>
    %234 = tpu.matmul %233, %190, %cst_220 {dimension_numbers = #tpu.dot_dimension_numbers<[1], [0], [0], [1], [0, 0, 1, 1], [], []>} : vector<8x8xbf16>, vector<8x16xbf16>, vector<8x16xf32> -> vector<8x16xf32>
    %235 = arith.truncf %234 : vector<8x16xf32> to vector<8x16xbf16>
    %c5_221 = arith.constant 5 : index
    %c0_222 = arith.constant 0 : index
    %c0_223 = arith.constant 0 : index
    %236 = vector.load %arg10[%c5_221, %c0_222, %c0_223] : memref<9x16x32xbf16, #tpu.memory_space<vmem>>, vector<1x16x32xbf16>
    %237 = vector.shape_cast %236 : vector<1x16x32xbf16> to vector<16x32xbf16>
    %cst_224 = arith.constant dense<0.000000e+00> : vector<8x32xf32>
    %238 = tpu.matmul %235, %237, %cst_224 {dimension_numbers = #tpu.dot_dimension_numbers<[1], [0], [0], [1], [0, 0, 1, 1], [], []>} : vector<8x16xbf16>, vector<16x32xbf16>, vector<8x32xf32> -> vector<8x32xf32>
    %239 = arith.addf %231, %238 : vector<8x32xf32>
    %c6_225 = arith.constant 6 : index
    %c0_226 = arith.constant 0 : index
    %c0_227 = arith.constant 0 : index
    %240 = vector.load %arg9[%c6_225, %c0_226, %c0_227] : memref<9x8x8xbf16, #tpu.memory_space<vmem>>, vector<1x8x8xbf16>
    %241 = vector.shape_cast %240 : vector<1x8x8xbf16> to vector<8x8xbf16>
    %cst_228 = arith.constant dense<0.000000e+00> : vector<8x16xf32>
    %242 = tpu.matmul %241, %190, %cst_228 {dimension_numbers = #tpu.dot_dimension_numbers<[1], [0], [0], [1], [0, 0, 1, 1], [], []>} : vector<8x8xbf16>, vector<8x16xbf16>, vector<8x16xf32> -> vector<8x16xf32>
    %243 = arith.truncf %242 : vector<8x16xf32> to vector<8x16xbf16>
    %c6_229 = arith.constant 6 : index
    %c0_230 = arith.constant 0 : index
    %c0_231 = arith.constant 0 : index
    %244 = vector.load %arg10[%c6_229, %c0_230, %c0_231] : memref<9x16x32xbf16, #tpu.memory_space<vmem>>, vector<1x16x32xbf16>
    %245 = vector.shape_cast %244 : vector<1x16x32xbf16> to vector<16x32xbf16>
    %cst_232 = arith.constant dense<0.000000e+00> : vector<8x32xf32>
    %246 = tpu.matmul %243, %245, %cst_232 {dimension_numbers = #tpu.dot_dimension_numbers<[1], [0], [0], [1], [0, 0, 1, 1], [], []>} : vector<8x16xbf16>, vector<16x32xbf16>, vector<8x32xf32> -> vector<8x32xf32>
    %247 = arith.addf %239, %246 : vector<8x32xf32>
    %c7_233 = arith.constant 7 : index
    %c0_234 = arith.constant 0 : index
    %c0_235 = arith.constant 0 : index
    %248 = vector.load %arg9[%c7_233, %c0_234, %c0_235] : memref<9x8x8xbf16, #tpu.memory_space<vmem>>, vector<1x8x8xbf16>
    %249 = vector.shape_cast %248 : vector<1x8x8xbf16> to vector<8x8xbf16>
    %cst_236 = arith.constant dense<0.000000e+00> : vector<8x16xf32>
    %250 = tpu.matmul %249, %190, %cst_236 {dimension_numbers = #tpu.dot_dimension_numbers<[1], [0], [0], [1], [0, 0, 1, 1], [], []>} : vector<8x8xbf16>, vector<8x16xbf16>, vector<8x16xf32> -> vector<8x16xf32>
    %251 = arith.truncf %250 : vector<8x16xf32> to vector<8x16xbf16>
    %c7_237 = arith.constant 7 : index
    %c0_238 = arith.constant 0 : index
    %c0_239 = arith.constant 0 : index
    %252 = vector.load %arg10[%c7_237, %c0_238, %c0_239] : memref<9x16x32xbf16, #tpu.memory_space<vmem>>, vector<1x16x32xbf16>
    %253 = vector.shape_cast %252 : vector<1x16x32xbf16> to vector<16x32xbf16>
    %cst_240 = arith.constant dense<0.000000e+00> : vector<8x32xf32>
    %254 = tpu.matmul %251, %253, %cst_240 {dimension_numbers = #tpu.dot_dimension_numbers<[1], [0], [0], [1], [0, 0, 1, 1], [], []>} : vector<8x16xbf16>, vector<16x32xbf16>, vector<8x32xf32> -> vector<8x32xf32>
    %255 = arith.addf %247, %254 : vector<8x32xf32>
    %c8_241 = arith.constant 8 : index
    %c0_242 = arith.constant 0 : index
    %c0_243 = arith.constant 0 : index
    %256 = vector.load %arg9[%c8_241, %c0_242, %c0_243] : memref<9x8x8xbf16, #tpu.memory_space<vmem>>, vector<1x8x8xbf16>
    %257 = vector.shape_cast %256 : vector<1x8x8xbf16> to vector<8x8xbf16>
    %cst_244 = arith.constant dense<0.000000e+00> : vector<8x16xf32>
    %258 = tpu.matmul %257, %190, %cst_244 {dimension_numbers = #tpu.dot_dimension_numbers<[1], [0], [0], [1], [0, 0, 1, 1], [], []>} : vector<8x8xbf16>, vector<8x16xbf16>, vector<8x16xf32> -> vector<8x16xf32>
    %259 = arith.truncf %258 : vector<8x16xf32> to vector<8x16xbf16>
    %c8_245 = arith.constant 8 : index
    %c0_246 = arith.constant 0 : index
    %c0_247 = arith.constant 0 : index
    %260 = vector.load %arg10[%c8_245, %c0_246, %c0_247] : memref<9x16x32xbf16, #tpu.memory_space<vmem>>, vector<1x16x32xbf16>
    %261 = vector.shape_cast %260 : vector<1x16x32xbf16> to vector<16x32xbf16>
    %cst_248 = arith.constant dense<0.000000e+00> : vector<8x32xf32>
    %262 = tpu.matmul %259, %261, %cst_248 {dimension_numbers = #tpu.dot_dimension_numbers<[1], [0], [0], [1], [0, 0, 1, 1], [], []>} : vector<8x16xbf16>, vector<16x32xbf16>, vector<8x32xf32> -> vector<8x32xf32>
    %263 = arith.addf %255, %262 : vector<8x32xf32>
    %c0_249 = arith.constant 0 : index
    %c0_250 = arith.constant 0 : index
    %264 = vector.load %arg11[%c0_249, %c0_250] : memref<1x32xf32, #tpu.memory_space<vmem>>, vector<1x32xf32>
    %265 = vector.broadcast %264 : vector<1x32xf32> to vector<8x32xf32>
    %266 = arith.addf %263, %265 : vector<8x32xf32>
    %cst_251 = arith.constant 0.000000e+00 : f32
    %267 = vector.broadcast %cst_251 : f32 to vector<8x32xf32>
    %268 = arith.maximumf %266, %267 : vector<8x32xf32>
    %269 = arith.truncf %268 : vector<8x32xf32> to vector<8x32xbf16>
    %c0_252 = arith.constant 0 : index
    %c0_253 = arith.constant 0 : index
    %c0_254 = arith.constant 0 : index
    %270 = vector.load %arg12[%c0_252, %c0_253, %c0_254] : memref<4x2x8xbf16, #tpu.memory_space<vmem>>, vector<1x2x8xbf16>
    %271 = vector.shape_cast %270 : vector<1x2x8xbf16> to vector<2x8xbf16>
    %cst_255 = arith.constant dense<0.000000e+00> : vector<2x32xf32>
    %272 = tpu.matmul %271, %269, %cst_255 {dimension_numbers = #tpu.dot_dimension_numbers<[1], [0], [0], [1], [0, 0, 1, 1], [], []>} : vector<2x8xbf16>, vector<8x32xbf16>, vector<2x32xf32> -> vector<2x32xf32>
    %c1_256 = arith.constant 1 : index
    %c0_257 = arith.constant 0 : index
    %c0_258 = arith.constant 0 : index
    %273 = vector.load %arg12[%c1_256, %c0_257, %c0_258] : memref<4x2x8xbf16, #tpu.memory_space<vmem>>, vector<1x2x8xbf16>
    %274 = vector.shape_cast %273 : vector<1x2x8xbf16> to vector<2x8xbf16>
    %cst_259 = arith.constant dense<0.000000e+00> : vector<2x32xf32>
    %275 = tpu.matmul %274, %269, %cst_259 {dimension_numbers = #tpu.dot_dimension_numbers<[1], [0], [0], [1], [0, 0, 1, 1], [], []>} : vector<2x8xbf16>, vector<8x32xbf16>, vector<2x32xf32> -> vector<2x32xf32>
    %276 = arith.maximumf %272, %275 : vector<2x32xf32>
    %c2_260 = arith.constant 2 : index
    %c0_261 = arith.constant 0 : index
    %c0_262 = arith.constant 0 : index
    %277 = vector.load %arg12[%c2_260, %c0_261, %c0_262] : memref<4x2x8xbf16, #tpu.memory_space<vmem>>, vector<1x2x8xbf16>
    %278 = vector.shape_cast %277 : vector<1x2x8xbf16> to vector<2x8xbf16>
    %cst_263 = arith.constant dense<0.000000e+00> : vector<2x32xf32>
    %279 = tpu.matmul %278, %269, %cst_263 {dimension_numbers = #tpu.dot_dimension_numbers<[1], [0], [0], [1], [0, 0, 1, 1], [], []>} : vector<2x8xbf16>, vector<8x32xbf16>, vector<2x32xf32> -> vector<2x32xf32>
    %280 = arith.maximumf %276, %279 : vector<2x32xf32>
    %c3_264 = arith.constant 3 : index
    %c0_265 = arith.constant 0 : index
    %c0_266 = arith.constant 0 : index
    %281 = vector.load %arg12[%c3_264, %c0_265, %c0_266] : memref<4x2x8xbf16, #tpu.memory_space<vmem>>, vector<1x2x8xbf16>
    %282 = vector.shape_cast %281 : vector<1x2x8xbf16> to vector<2x8xbf16>
    %cst_267 = arith.constant dense<0.000000e+00> : vector<2x32xf32>
    %283 = tpu.matmul %282, %269, %cst_267 {dimension_numbers = #tpu.dot_dimension_numbers<[1], [0], [0], [1], [0, 0, 1, 1], [], []>} : vector<2x8xbf16>, vector<8x32xbf16>, vector<2x32xf32> -> vector<2x32xf32>
    %284 = arith.maximumf %280, %283 : vector<2x32xf32>
    %285 = arith.truncf %284 : vector<2x32xf32> to vector<2x32xbf16>
    %c0_268 = arith.constant 0 : index
    %c0_269 = arith.constant 0 : index
    %286 = vector.load %arg13[%c0_268, %c0_269] : memref<32x40xbf16, #tpu.memory_space<vmem>>, vector<32x40xbf16>
    %cst_270 = arith.constant dense<0.000000e+00> : vector<2x40xf32>
    %287 = tpu.matmul %285, %286, %cst_270 {dimension_numbers = #tpu.dot_dimension_numbers<[1], [0], [0], [1], [0, 0, 1, 1], [], []>} : vector<2x32xbf16>, vector<32x40xbf16>, vector<2x40xf32> -> vector<2x40xf32>
    %c0_271 = arith.constant 0 : index
    %c0_272 = arith.constant 0 : index
    %288 = vector.load %arg14[%c0_271, %c0_272] : memref<1x40xf32, #tpu.memory_space<vmem>>, vector<1x40xf32>
    %289 = vector.broadcast %288 : vector<1x40xf32> to vector<2x40xf32>
    %290 = arith.addf %287, %289 : vector<2x40xf32>
    %cst_273 = arith.constant 0.000000e+00 : f32
    %291 = vector.broadcast %cst_273 : f32 to vector<2x40xf32>
    %292 = arith.maximumf %290, %291 : vector<2x40xf32>
    %293 = arith.truncf %292 : vector<2x40xf32> to vector<2x40xbf16>
    %c0_274 = arith.constant 0 : index
    %c0_275 = arith.constant 0 : index
    %294 = vector.load %arg15[%c0_274, %c0_275] : memref<40x50xbf16, #tpu.memory_space<vmem>>, vector<40x50xbf16>
    %cst_276 = arith.constant dense<0.000000e+00> : vector<2x50xf32>
    %295 = tpu.matmul %293, %294, %cst_276 {dimension_numbers = #tpu.dot_dimension_numbers<[1], [0], [0], [1], [0, 0, 1, 1], [], []>} : vector<2x40xbf16>, vector<40x50xbf16>, vector<2x50xf32> -> vector<2x50xf32>
    %c0_277 = arith.constant 0 : index
    %c0_278 = arith.constant 0 : index
    %296 = vector.load %arg16[%c0_277, %c0_278] : memref<1x50xf32, #tpu.memory_space<vmem>>, vector<1x50xf32>
    %297 = vector.broadcast %296 : vector<1x50xf32> to vector<2x50xf32>
    %298 = arith.addf %295, %297 : vector<2x50xf32>
    %cst_279 = arith.constant 0.000000e+00 : f32
    %299 = vector.broadcast %cst_279 : f32 to vector<2x50xf32>
    %300 = arith.maximumf %298, %299 : vector<2x50xf32>
    %301 = arith.truncf %300 : vector<2x50xf32> to vector<2x50xbf16>
    %c0_280 = arith.constant 0 : index
    %c0_281 = arith.constant 0 : index
    %302 = vector.load %arg17[%c0_280, %c0_281] : memref<50x10xbf16, #tpu.memory_space<vmem>>, vector<50x10xbf16>
    %cst_282 = arith.constant dense<0.000000e+00> : vector<2x10xf32>
    %303 = tpu.matmul %301, %302, %cst_282 {dimension_numbers = #tpu.dot_dimension_numbers<[1], [0], [0], [1], [0, 0, 1, 1], [], []>} : vector<2x50xbf16>, vector<50x10xbf16>, vector<2x10xf32> -> vector<2x10xf32>
    %c0_283 = arith.constant 0 : index
    %c0_284 = arith.constant 0 : index
    %304 = vector.load %arg18[%c0_283, %c0_284] : memref<1x10xf32, #tpu.memory_space<vmem>>, vector<1x10xf32>
    %305 = vector.broadcast %304 : vector<1x10xf32> to vector<2x10xf32>
    %306 = arith.addf %303, %305 : vector<2x10xf32>
    %cst_285 = arith.constant dense<0xFF800000> : vector<2xf32>
    %307 = vector.multi_reduction <maximumf>, %306, %cst_285 [1] : vector<2x10xf32> to vector<2xf32>
    %308 = vector.shape_cast %307 : vector<2xf32> to vector<2x1xf32>
    %309 = vector.broadcast %308 : vector<2x1xf32> to vector<2x10xf32>
    %310 = arith.subf %306, %309 : vector<2x10xf32>
    %311 = math.exp %310 : vector<2x10xf32>
    %cst_286 = arith.constant dense<0.000000e+00> : vector<2xf32>
    %312 = vector.multi_reduction <add>, %311, %cst_286 [1] : vector<2x10xf32> to vector<2xf32>
    %313 = vector.shape_cast %312 : vector<2xf32> to vector<2x1xf32>
    %314 = vector.broadcast %313 : vector<2x1xf32> to vector<2x10xf32>
    %315 = arith.divf %311, %314 : vector<2x10xf32>
    %c0_287 = arith.constant 0 : index
    %c0_288 = arith.constant 0 : index
    %316 = vector.load %arg19[%c0_287, %c0_288] : memref<2x10xf32, #tpu.memory_space<vmem>>, vector<2x10xf32>
    tpu.vector_store %arg19[%c0_287, %c0_288], %315 {strides = array<i32>} : memref<2x10xf32, #tpu.memory_space<vmem>>, vector<2x10xf32>,
    return
  }
}

</mosaic_0001>

<bundles_post_ra>
// kernel: forward.1
= control target key start
LH: loop header
LB: loop body
LE: loop exit
PB: predicated region body
PF: predicated region fallthrough
CT: control target
= control target key end

     0   :  { %s9576_s0 = inlined_call_operand.vmem [shape: bf16[128,64], index: 0, kind: input, shape index: {}]   ;;  %s9577_s1 = inlined_call_operand.hbm [shape: bf16[9,128,128], index: 1, kind: input, shape index: {}]   ;;  %s9578_s2 = inlined_call_operand.hbm [shape: bf16[9,64,8], index: 2, kind: input, shape index: {}]   ;;  %s9579_s3 = inlined_call_operand.hbm [shape: f32[1,8], index: 3, kind: input, shape index: {}]   ;;  %s9580_s4 = inlined_call_operand.hbm [shape: bf16[4,32,128], index: 4, kind: input, shape index: {}]   ;;  %s9581_s5 = inlined_call_operand.vmem [shape: bf16[9,32,32], index: 5, kind: input, shape index: {}]   ;;  %s9582_s6 = inlined_call_operand.hbm [shape: bf16[9,8,16], index: 6, kind: input, shape index: {}]   ;;  %s9583_s7 = inlined_call_operand.hbm [shape: f32[1,16], index: 7, kind: input, shape index: {}]   ;;  %s9584_s8 = inlined_call_operand.hbm [shape: bf16[4,8,32], index: 8, kind: input, shape index: {}]   ;;  %s9585_s9 = inlined_call_operand.vmem [shape: bf16[9,8,8], index: 9, kind: input, shape index: {}]   ;;  %s9586_s10 = inlined_call_operand.hbm [shape: bf16[9,16,32], index: 10, kind: input, shape index: {}]   ;;  %s9587_s11 = inlined_call_operand.hbm [shape: f32[1,32], index: 11, kind: input, shape index: {}]   ;;  %s9588_s12 = inlined_call_operand.vmem [shape: bf16[4,2,8], index: 12, kind: input, shape index: {}]   ;;  %s9589_s13 = inlined_call_operand.hbm [shape: bf16[32,40], index: 13, kind: input, shape index: {}]   ;;  %s9590_s14 = inlined_call_operand.vmem [shape: f32[1,40], index: 14, kind: input, shape index: {}]   ;;  %s9591_s15 = inlined_call_operand.hbm [shape: bf16[40,50], index: 15, kind: input, shape index: {}]   ;;  %s9592_s16 = inlined_call_operand.vmem [shape: f32[1,50], index: 16, kind: input, shape index: {}]   ;;  %s9593_s17 = inlined_call_operand.vmem [shape: bf16[50,10], index: 17, kind: input, shape index: {}]   ;;  %s9594_s18 = inlined_call_operand.vmem [shape: f32[1,10], index: 18, kind: input, shape index: {}]   ;;  %s9595_s19 = inlined_call_operand.hbm [shape: f32[2,10], index: 19, kind: output, shape index: {}]  }
   0x1   :  { %9597 = sst [smem:[#allocation28_spill]] %s9576_s0 }
   0x2   :  { %9598 = sst [smem:[#allocation29_spill]] %s9577_s1 }
   0x3   :  { %9599 = sst [smem:[#allocation30_spill]] %s9578_s2 }
   0x4   :  { %9600 = sst [smem:[#allocation31_spill]] %s9579_s3 }
   0x5   :  { %24 = vsyncpa [#allocation3], 0 }
   0x6   :  { %25 = vsyncpa [#allocation6], 0 }
   0x7   :  { %26 = vsyncpa [#allocation9], 0 }
   0x8   :  { %27 = vsyncpa [#allocation12], 0 }
   0x9   :  { %28 = vsyncpa [#allocation15], 0 }
   0xa   :  { %29 = vsyncpa [#allocation18], 0 }
   0xb   :  { %30 = vsyncpa [#allocation4], 0  ;;  %s8510_s0 = smov [#allocation5]   ;;  %s8511_s20 = smov [#allocation8]  }
   0xc   :  { %s50_s30 = sshll.u32 %s8510_s0, 4  ;;  %s72_s21 = sshll.u32 %s8511_s20, 4  ;;  %s51_s30 = int_to_ptr.vmem [resolvable:$true] %s50_s30  ;;  %s73_s21 = int_to_ptr.vmem [resolvable:$true] %s72_s21 }
   0xd   :  { %s8264_s1 = scalar_lea.vmem %s51_s30, 4608  ;;  %p8269_p1 = scmp.lt.s32.totalorder %s51_s30, %s51_s30 }
   0xe   :  { %p8265_p0 = scmp.ne.s32.totalorder %s51_s30, %s8264_s1  ;;  %p8270_p2 = scmp.lt.s32.totalorder %s8264_s1, %s8264_s1 }
  0x10   :  { %p8271_p3 = por %p8270_p2, %p8269_p1 }
  0x12   :  { %p8272_p4 = pnand %p8271_p3, %p8265_p0 }
  0x14   :  { %8275 = shalt.err (!%p8272_p4)
}
  0x15   :  { %s8512_s22 = smov 64   ;;  %s8513_s2 = smov 4  }
  0x16   :  { %s9601_s25 = sld [smem:[#allocation30_spill]]  ;;  %s8284_s3 = scalar_lea.vmem %s73_s21, 1024 }
  0x17   :  { %p8285_p5 = scmp.ne.s32.totalorder %s73_s21, %s8284_s3  ;;  %p8289_p6 = scmp.lt.s32.totalorder %s73_s21, %s73_s21 }
  0x18   :  { %p8290_p7 = scmp.lt.s32.totalorder %s8284_s3, %s8284_s3 }
  0x1a   :  { %p8291_p8 = por %p8290_p7, %p8289_p6 }
  0x1c   :  { %56 = dma.hbm_to_vmem [thread:$0]  %s9601_s25, 4608, %s51_s30, [#allocation6], %s8512_s22, %s8512_s22, %s8513_s2  }
  0x1d   :  { %p8292_p9 = pnand %p8291_p8, %p8285_p5 }
  0x1f   :  { %8295 = shalt.err (!%p8292_p9)
}
  0x20   :  { %78 = dma.hbm_to_vmem [thread:$0]  %s9580_s4, 1024, %s73_s21, [#allocation9], %s8512_s22, %s8512_s22, %s8513_s2  }
  0x21   :  { %s8514_s28 = smov [#allocation11]   ;;  %s8515_s0 = smov [#allocation14]  }
  0x22   :  { %s99_s29 = sshll.u32 %s8514_s28, 4  ;;  %s122_s20 = sshll.u32 %s8515_s0, 4  ;;  %s100_s29 = int_to_ptr.vmem [resolvable:$true] %s99_s29  ;;  %s123_s20 = int_to_ptr.vmem [resolvable:$true] %s122_s20 }
  0x23   :  { %s8304_s30 = scalar_lea.vmem %s100_s29, 16  ;;  %s8308_s1 = scalar_lea.vmem %s100_s29, 32 }
  0x24   :  { %p8305_p10 = scmp.ne.s32.totalorder %s100_s29, %s8304_s30  ;;  %p8309_p11 = scmp.lt.s32.totalorder %s100_s29, %s100_s29 }
  0x25   :  { %p8310_p12 = scmp.lt.s32.totalorder %s8308_s1, %s8304_s30 }
  0x27   :  { %p8311_p13 = por %p8310_p12, %p8309_p11 }
  0x29   :  { %p8312_p0 = pnand %p8311_p13, %p8305_p10 }
  0x2b   :  { %8315 = shalt.err (!%p8312_p0)
}
  0x2c   :  { %102 = dma.hbm_to_vmem [thread:$0]  %s9583_s7, 16, %s100_s29, [#allocation12]  }
  0x2d   :  { %s8324_s25 = scalar_lea.vmem %s123_s20, 1152  ;;  %p8329_p2 = scmp.lt.s32.totalorder %s123_s20, %s123_s20 }
  0x2e   :  { %p8325_p1 = scmp.ne.s32.totalorder %s123_s20, %s8324_s25  ;;  %p8330_p3 = scmp.lt.s32.totalorder %s8324_s25, %s8324_s25 }
  0x30   :  { %p8331_p4 = por %p8330_p3, %p8329_p2 }
  0x32   :  { %p8332_p5 = pnand %p8331_p4, %p8325_p1 }
  0x34   :  { %8335 = shalt.err (!%p8332_p5)
}
  0x35   :  { %128 = dma.hbm_to_vmem [thread:$0]  %s9586_s10, 1152, %s123_s20, [#allocation15], %s8512_s22, %s8512_s22, %s8513_s2  }
  0x36   :  { %s8516_s3 = smov [#allocation17]   ;;  %s8517_s27 = smov [#allocation2]  }
  0x37   :  { %s146_s26 = sshll.u32 %s8516_s3, 4  ;;  %s38_s28 = sshll.u32 %s8517_s27, 4  ;;  %s147_s26 = int_to_ptr.vmem [resolvable:$true] %s146_s26  ;;  %s39_s28 = int_to_ptr.vmem [resolvable:$true] %s38_s28 }
  0x38   :  { %s8344_s7 = scalar_lea.vmem %s147_s26, 256  ;;  %p8349_p7 = scmp.lt.s32.totalorder %s147_s26, %s147_s26 }
  0x39   :  { %p8345_p6 = scmp.ne.s32.totalorder %s147_s26, %s8344_s7  ;;  %p8350_p8 = scmp.lt.s32.totalorder %s8344_s7, %s8344_s7 }
  0x3b   :  { %p8351_p9 = por %p8350_p8, %p8349_p7 }
  0x3d   :  { %p8352_p10 = pnand %p8351_p9, %p8345_p6 }
  0x3f   :  { %8355 = shalt.err (!%p8352_p10)
}
  0x40   :  { %152 = dma.hbm_to_vmem [thread:$0]  %s9589_s13, 256, %s147_s26, [#allocation18], %s8512_s22, %s8512_s22, %s8513_s2  }
  0x41   :  { %s8364_s10 = scalar_lea.vmem %s39_s28, 9216  ;;  %p8369_p12 = scmp.lt.s32.totalorder %s39_s28, %s39_s28 }
  0x42   :  { %p8365_p11 = scmp.ne.s32.totalorder %s39_s28, %s8364_s10  ;;  %p8370_p13 = scmp.lt.s32.totalorder %s8364_s10, %s8364_s10 }
  0x44   :  { %p8371_p0 = por %p8370_p13, %p8369_p12 }
  0x46   :  { %p8372_p1 = pnand %p8371_p0, %p8365_p11 }
  0x48   :  { %8375 = shalt.err (!%p8372_p1)
}
  0x49   :  { %s9602_s1 = sld [smem:[#allocation29_spill]]  ;;  %s8518_s23 = smov [#allocation7]  }
  0x4a   :  { %s63_s24 = sshll.u32 %s8518_s23, 4  ;;  %s8519_s25 = smov [#allocation10]   ;;  %s64_s24 = int_to_ptr.vmem [resolvable:$true] %s63_s24 }
  0x4b   :  { %s86_s4 = sshll.u32 %s8519_s25, 4  ;;  %s8384_s13 = scalar_lea.vmem %s64_s24, 16  ;;  %s87_s4 = int_to_ptr.vmem [resolvable:$true] %s86_s4 }
  0x4c   :  { %p8385_p2 = scmp.ne.s32.totalorder %s64_s24, %s8384_s13  ;;  %s8388_s21 = scalar_lea.vmem %s64_s24, 32 }
  0x4d   :  { %p8389_p3 = scmp.lt.s32.totalorder %s64_s24, %s64_s24  ;;  %p8390_p4 = scmp.lt.s32.totalorder %s8388_s21, %s8384_s13 }
  0x4f   :  { %44 = dma.hbm_to_vmem [thread:$0]  %s9602_s1, 9216, %s39_s28, [#allocation3], %s8512_s22, %s8512_s22, %s8513_s2  }
  0x50   :  { %p8391_p5 = por %p8390_p4, %p8389_p3 }
  0x52   :  { %p8392_p6 = pnand %p8391_p5, %p8385_p2 }
  0x54   :  { %8395 = shalt.err (!%p8392_p6)
}
  0x55   :  { %s9603_s27 = sld [smem:[#allocation31_spill]]  ;;  %s8404_s7 = scalar_lea.vmem %s87_s4, 576 }
  0x56   :  { %p8405_p7 = scmp.ne.s32.totalorder %s87_s4, %s8404_s7  ;;  %p8409_p8 = scmp.lt.s32.totalorder %s87_s4, %s87_s4 }
  0x57   :  { %p8410_p9 = scmp.lt.s32.totalorder %s8404_s7, %s8404_s7 }
  0x59   :  { %p8411_p10 = por %p8410_p9, %p8409_p8 }
  0x5b   :  { %66 = dma.hbm_to_vmem [thread:$0]  %s9603_s27, 16, %s64_s24, [#allocation6]  }
  0x5c   :  { %p8412_p11 = pnand %p8411_p10, %p8405_p7 }
  0x5e   :  { %8415 = shalt.err (!%p8412_p11)
}
  0x5f   :  { %92 = dma.hbm_to_vmem [thread:$0]  %s9582_s6, 576, %s87_s4, [#allocation9], %s8512_s22, %s8512_s22, %s8513_s2  }
  0x60   :  { %s8520_s0 = smov [#allocation13]   ;;  %s8521_s20 = smov [#allocation16]  }
  0x61   :  { %s108_s10 = sshll.u32 %s8520_s0, 4  ;;  %s135_s30 = sshll.u32 %s8521_s20, 4  ;;  %s109_s10 = int_to_ptr.vmem [resolvable:$true] %s108_s10  ;;  %s136_s30 = int_to_ptr.vmem [resolvable:$true] %s135_s30 }
  0x62   :  { %s8424_s1 = scalar_lea.vmem %s109_s10, 256  ;;  %p8429_p13 = scmp.lt.s32.totalorder %s109_s10, %s109_s10 }
  0x63   :  { %p8425_p12 = scmp.ne.s32.totalorder %s109_s10, %s8424_s1  ;;  %p8430_p0 = scmp.lt.s32.totalorder %s8424_s1, %s8424_s1 }
  0x65   :  { %p8431_p1 = por %p8430_p0, %p8429_p13 }
  0x67   :  { %p8432_p2 = pnand %p8431_p1, %p8425_p12 }
  0x69   :  { %8435 = shalt.err (!%p8432_p2)
}
  0x6a   :  { %114 = dma.hbm_to_vmem [thread:$0]  %s9584_s8, 256, %s109_s10, [#allocation12], %s8512_s22, %s8512_s22, %s8513_s2  }
  0x6b   :  { %s8444_s6 = scalar_lea.vmem %s136_s30, 16  ;;  %s8448_s25 = scalar_lea.vmem %s136_s30, 32 }
  0x6c   :  { %p8445_p3 = scmp.ne.s32.totalorder %s136_s30, %s8444_s6  ;;  %p8449_p4 = scmp.lt.s32.totalorder %s136_s30, %s136_s30 }
  0x6d   :  { %p8450_p5 = scmp.lt.s32.totalorder %s8448_s25, %s8444_s6 }
  0x6f   :  { %p8451_p6 = por %p8450_p5, %p8449_p4 }
  0x71   :  { %p8452_p7 = pnand %p8451_p6, %p8445_p3 }
  0x73   :  { %8455 = shalt.err (!%p8452_p7)
}
  0x74   :  { %138 = dma.hbm_to_vmem [thread:$0]  %s9587_s11, 16, %s136_s30, [#allocation15]  }
  0x75   :  { %s8522_s21 = smov [#allocation19]  }
  0x76   :  { %s160_s3 = sshll.u32 %s8522_s21, 4  ;;  %s161_s3 = int_to_ptr.vmem [resolvable:$true] %s160_s3 }
  0x77   :  { %s8464_s26 = scalar_lea.vmem %s161_s3, 320  ;;  %p8469_p9 = scmp.lt.s32.totalorder %s161_s3, %s161_s3 }
  0x78   :  { %p8465_p8 = scmp.ne.s32.totalorder %s161_s3, %s8464_s26  ;;  %p8470_p10 = scmp.lt.s32.totalorder %s8464_s26, %s8464_s26 }
  0x7a   :  { %p8471_p11 = por %p8470_p10, %p8469_p9 }
  0x7c   :  { %p8472_p12 = pnand %p8471_p11, %p8465_p8 }
  0x7e   :  { %8475 = shalt.err (!%p8472_p12)
}
  0x7f   :  { %166 = dma.hbm_to_vmem [thread:$0]  %s9591_s15, 320, %s161_s3, [#allocation18], %s8512_s22, %s8512_s22, %s8513_s2  }
  0x80   :  { %8496 = dma.done.wait [#allocation3], 9216  }
  0x81   :  { %8497 = vsyncadd [#allocation3], 4294958080 }
  0x82   :  { %8498 = dma.done.wait [#allocation6], 4624  }
  0x83   :  { %8499 = vsyncadd [#allocation6], 4294962672 }
  0x84   :  { %8500 = dma.done.wait [#allocation9], 1600  }
  0x85   :  { %8501 = vsyncadd [#allocation9], 4294965696 }
  0x86   :  { %8502 = dma.done.wait [#allocation12], 272  }
  0x87   :  { %8503 = vsyncadd [#allocation12], 4294967024 }
  0x88   :  { %8504 = dma.done.wait [#allocation15], 1168  }
  0x89   :  { %8505 = vsyncadd [#allocation15], 4294966128 }
  0x8a   :  { %8506 = dma.done.wait [#allocation18], 576  }
  0x8b   :  { %8507 = vsyncadd [#allocation18], 4294966720  ;;  %s9604_s28 = sld [smem:[#allocation28_spill]]  ;;  %v8092_v4 = vld [vmem:[#allocation2] sm:$0xff]   ;;  %v8108_v10 = vld [vmem:[#allocation5 + $0x38] sm:$0xff]   ;;  %vm651_vm0 = vcmask 523264  }
  0x8c   :  { %v8093_v5 = vld [vmem:[#allocation2 + $0x40] sm:$0xff]   ;;  %7171 = vmatprep.mubr.bf16.mxu0 %v8092_v4  ;;  %v8094_v11 = vld [vmem:[#allocation2 + $0x8] sm:$0xff]   ;;  %v8110_v13 = vld [vmem:[#allocation5 + $0x18] sm:$0xff]   ;;  %vm3776_vm1 = vcmask 1043456   ;;  %vm3636_vm2 = vcmask 261120   ;;  %vm3769_vm3 = vcmask 64512  }
  0x8d   :  { %7203 = vmatprep.mubr.bf16.mxu1 %v8093_v5  ;;  %v8095_v12 = vld [vmem:[#allocation2 + $0x48] sm:$0xff]   ;;  %v8096_v14 = vld [vmem:[#allocation2 + $0x10] sm:$0xff]   ;;  %v8098_v19 = vld [vmem:[#allocation2 + $0x18] sm:$0xff]   ;;  %vm8524_vm4 = vmmov 0   ;;  %vm5144_vm5 = vcmask 130048   ;;  %vm6309_vm6 = vcmask 1040384  }
  0x8e   :  { %v8097_v15 = vld [vmem:[#allocation2 + $0x50] sm:$0xff]   ;;  %v8111_v18 = vld [vmem:[#allocation5 + $0x28] sm:$0xff]   ;;  %v8099_v20 = vld [vmem:[#allocation2 + $0x58] sm:$0xff]   ;;  %vm6221_vm7 = vcmask 326656   ;;  %vm6305_vm8 = vcmask 408576   ;;  %vm6353_vm9 = vcmask 74752  }
  0x8f   :  { %v8109_v16 = vld [vmem:[#allocation5 + $0x30] sm:$0xff]   ;;  %v8100_v21 = vld [vmem:[#allocation2 + $0x20] sm:$0xff]   ;;  %v8102_v23 = vld [vmem:[#allocation2 + $0x28] sm:$0xff]  }
  0x90   :  { %v8112_v17 = vld [vmem:[#allocation5 + $0x10] sm:$0xff]   ;;  %v8101_v22 = vld [vmem:[#allocation2 + $0x60] sm:$0xff]   ;;  %v8103_v24 = vld [vmem:[#allocation2 + $0x68] sm:$0xff]  }
  0x91   :  { %v8686_v0 = vld [vmem:[%s9604_s28 + $0x38] sm:$0xff]   ;;  %v8691_v1 = vld [vmem:[%s9604_s28 + $0x30] sm:$0xff]   ;;  %v8702_v2 = vld [vmem:[%s9604_s28 + $0x28] sm:$0xff]  }
  0x92   :  { %7155 = vmatprep.subr.bf16.mxu0 %v8686_v0  ;;  %7187 = vmatprep.subr.bf16.mxu1 %v8686_v0  ;;  %v8709_v3 = vld [vmem:[%s9604_s28 + $0x20] sm:$0xff]   ;;  %v8720_v6 = vld [vmem:[%s9604_s28 + $0x18] sm:$0xff]   ;;  %v8729_v7 = vld [vmem:[%s9604_s28 + $0x10] sm:$0xff]  }
  0x93   :  { %7156 = vmatpush3.bf16.msra.mxu0 %v8686_v0  ;;  %7188 = vmatpush3.bf16.msra.mxu1 %v8686_v0  ;;  %v8738_v8 = vld [vmem:[%s9604_s28 + $0x8] sm:$0xff]   ;;  %v8747_v9 = vld [vmem:[%s9604_s28] sm:$0xff]   ;;  %v8104_v25 = vld [vmem:[#allocation2 + $0x30] sm:$0xff]  }
  0x94   :  { %7157 = vmatprep.subr.bf16.mxu0 %v8691_v1  ;;  %7189 = vmatprep.subr.bf16.mxu1 %v8691_v1  ;;  %v8105_v26 = vld [vmem:[#allocation2 + $0x70] sm:$0xff]   ;;  %v8106_v27 = vld [vmem:[#allocation2 + $0x38] sm:$0xff]   ;;  %v8113_v29 = vld [vmem:[#allocation5 + $0x8] sm:$0xff]  }
  0x95   :  { %v8107_v28 = vld [vmem:[#allocation2 + $0x78] sm:$0xff]   ;;  %v8114_v30 = vld [vmem:[#allocation5 + $0x20] sm:$0xff]  }
  0x96   :  { %v8115_v31 = vld [vmem:[#allocation5] sm:$0xff]  }
  0x97   :  { %7158 = vmatpush3.bf16.msra.mxu0 %v8691_v1  ;;  %7190 = vmatpush3.bf16.msra.mxu1 %v8691_v1 }
  0x98   :  { %7159 = vmatprep.subr.bf16.mxu0 %v8702_v2  ;;  %7191 = vmatprep.subr.bf16.mxu1 %v8702_v2 }
  0x9b   :  { %7160 = vmatpush3.bf16.msra.mxu0 %v8702_v2  ;;  %7192 = vmatpush3.bf16.msra.mxu1 %v8702_v2 }
  0x9c   :  { %7161 = vmatprep.subr.bf16.mxu0 %v8709_v3  ;;  %7193 = vmatprep.subr.bf16.mxu1 %v8709_v3 }
  0x9f   :  { %7162 = vmatpush3.bf16.msra.mxu0 %v8709_v3  ;;  %7194 = vmatpush3.bf16.msra.mxu1 %v8709_v3 }
  0xa0   :  { %7163 = vmatprep.subr.bf16.mxu0 %v8720_v6  ;;  %7195 = vmatprep.subr.bf16.mxu1 %v8720_v6 }
  0xa3   :  { %7164 = vmatpush3.bf16.msra.mxu0 %v8720_v6  ;;  %7196 = vmatpush3.bf16.msra.mxu1 %v8720_v6 }
  0xa4   :  { %7165 = vmatprep.subr.bf16.mxu0 %v8729_v7  ;;  %7197 = vmatprep.subr.bf16.mxu1 %v8729_v7 }
  0xa7   :  { %7166 = vmatpush3.bf16.msra.mxu0 %v8729_v7  ;;  %7198 = vmatpush3.bf16.msra.mxu1 %v8729_v7 }
  0xa8   :  { %7167 = vmatprep.subr.bf16.mxu0 %v8738_v8  ;;  %7199 = vmatprep.subr.bf16.mxu1 %v8738_v8 }
  0xab   :  { %7168 = vmatpush3.bf16.msra.mxu0 %v8738_v8  ;;  %7200 = vmatpush3.bf16.msra.mxu1 %v8738_v8 }
  0xac   :  { %7169 = vmatprep.subr.bf16.mxu0 %v8747_v9  ;;  %7201 = vmatprep.subr.bf16.mxu1 %v8747_v9 }
  0xaf   :  { %7170 = vmatpush3.bf16.msra.mxu0 %v8747_v9  ;;  %7202 = vmatpush3.bf16.msra.mxu1 %v8747_v9 }
  0xb0   :  { %7219 = vmatprep.subr.bf16.mxu0 %v8108_v10  ;;  %7243 = vmatprep.subr.bf16.mxu1 %v8110_v13 }
  0xb2   :  { %7172 = vmatmul.mubr.bf16.vlgmr.msra.gmra.mxu0 %v8094_v11  ;;  %7204 = vmatmul.mubr.bf16.vlgmr.msra.gmra.mxu1 %v8095_v12 }
  0xb3   :  { %7175 = vmatprep.mubr.bf16.mxu0 %v8096_v14  ;;  %7207 = vmatprep.mubr.bf16.mxu1 %v8097_v15 }
  0xb4   :  { %7220 = vmatpush3.bf16.msra.mxu0 %v8108_v10  ;;  %7244 = vmatpush3.bf16.msra.mxu1 %v8110_v13 }
  0xb5   :  { %7221 = vmatprep.subr.bf16.mxu0 %v8109_v16  ;;  %7245 = vmatprep.subr.bf16.mxu1 %v8112_v17 }
  0xb8   :  { %7222 = vmatpush3.bf16.msra.mxu0 %v8109_v16  ;;  %7246 = vmatpush3.bf16.msra.mxu1 %v8112_v17 }
  0xb9   :  { %7223 = vmatprep.subr.bf16.mxu0 %v8111_v18  ;;  %7247 = vmatprep.subr.bf16.mxu1 %v8113_v29 }
  0xba   :  { %7176 = vmatmul.mubr.bf16.gmra.mxu0 %v8098_v19  ;;  %7208 = vmatmul.mubr.bf16.gmra.mxu1 %v8099_v20 }
  0xbb   :  { %7179 = vmatprep.mubr.bf16.mxu0 %v8100_v21  ;;  %7211 = vmatprep.mubr.bf16.mxu1 %v8101_v22 }
  0xbc   :  { %7224 = vmatpush3.bf16.msra.mxu0 %v8111_v18  ;;  %7248 = vmatpush3.bf16.msra.mxu1 %v8113_v29  ;;  %v8121_v29 = vld [vmem:[#allocation2 + $0xa8] sm:$0xff]  }
  0xbd   :  { %7225 = vmatprep.subr.bf16.mxu0 %v8114_v30  ;;  %7249 = vmatprep.subr.bf16.mxu1 %v8115_v31 }
  0xc0   :  { %7226 = vmatpush3.bf16.msra.mxu0 %v8114_v30  ;;  %7250 = vmatpush3.bf16.msra.mxu1 %v8115_v31  ;;  %v8122_v30 = vld [vmem:[#allocation2 + $0xb0] sm:$0xff]   ;;  %v8806_v31 = vld [vmem:[%s9604_s28 + $0x38] sm:$0xff]  }
  0xc1   :  { %7267 = vmatprep.subr.bf16.mxu0 %v8686_v0 }
  0xc2   :  { %7180 = vmatmul.mubr.bf16.gmra.mxu0 %v8102_v23  ;;  %7212 = vmatmul.mubr.bf16.gmra.mxu1 %v8103_v24  ;;  %v8116_v23 = vld [vmem:[#allocation2 + $0x80] sm:$0xff]  }
  0xc3   :  { %7183 = vmatprep.mubr.bf16.mxu0 %v8104_v25  ;;  %7215 = vmatprep.mubr.bf16.mxu1 %v8105_v26  ;;  %v8117_v25 = vld [vmem:[#allocation2 + $0x88] sm:$0xff]   ;;  %v8118_v26 = vld [vmem:[#allocation2 + $0x90] sm:$0xff]  }
  0xca   :  { %7184 = vmatmul.mubr.bf16.gmra.mxu0 %v8106_v27  ;;  %7216 = vmatmul.mubr.bf16.gmra.mxu1 %v8107_v28  ;;  %v8119_v27 = vld [vmem:[#allocation2 + $0x98] sm:$0xff]   ;;  %v8120_v28 = vld [vmem:[#allocation2 + $0xa0] sm:$0xff]  }
 0x172   :  { %v7173_v32 = vpop.f32.mrf.mxu0  ;;  %v7205_v33 = vpop.f32.mrf.mxu1 }
 0x174   :  { %v369_v34 = vpop.f32.mrf.mxu0  ;;  %v547_v35 = vpop.f32.mrf.mxu1 }
 0x176   :  { %v7174_v36 = vpop.f32.mrf.mxu0  ;;  %v7206_v37 = vpop.f32.mrf.mxu1 }
 0x177   :  { %v433_v38 = vpack.c.bf16 %v7174_v36, %v7173_v32  ;;  %v611_v43 = vpack.c.bf16 %v7206_v37, %v7205_v33  ;;  %v8813_v32 = vld [vmem:[%s9604_s28 + $0x30] sm:$0xff]   ;;  %v8127_v33 = vld [vmem:[#allocation2 + $0xd8] sm:$0xff]   ;;  %v8827_v36 = vld [vmem:[%s9604_s28 + $0x20] sm:$0xff]  }
 0x178   :  { %v372_v39 = vpop.f32.mrf.mxu0  ;;  %v550_v40 = vpop.f32.mrf.mxu1  ;;  %v8129_v37 = vld [vmem:[#allocation2 + $0xe8] sm:$0xff]  }
 0x179   :  { %v432_v41 = vpack.c.bf16 %v372_v39, %v369_v34  ;;  %v610_v42 = vpack.c.bf16 %v550_v40, %v547_v35  ;;  %v8128_v34 = vld [vmem:[#allocation2 + $0xe0] sm:$0xff]   ;;  %v8820_v35 = vld [vmem:[%s9604_s28 + $0x28] sm:$0xff]   ;;  %v8160_v39 = vld [vmem:[#allocation5 + $0x58] sm:$0xff]  }
 0x17a   :  { %v7177_v44 = vpop.f32.mrf.mxu0  ;;  %v7209_v45 = vpop.f32.mrf.mxu1  ;;  %7299 = vmatprep.subr.bf16.mxu1 %v8160_v39  ;;  %v8131_v40 = vld [vmem:[#allocation2 + $0xf8] sm:$0xff]  }
 0x17b   :  { %7227 = vmatprep.mubr.msk.bf16.mxu0 %vm651_vm0, %v610_v42  ;;  %7251 = vmatprep.mubr.msk.bf16.mxu1 %vm651_vm0, %v432_v41  ;;  %v8132_v41 = vld [vmem:[#allocation2 + $0x100] sm:$0xff]   ;;  %v8163_v42 = vld [vmem:[#allocation5 + $0x50] sm:$0xff]  }
 0x17c   :  { %v385_v46 = vpop.f32.mrf.mxu0  ;;  %v563_v47 = vpop.f32.mrf.mxu1  ;;  %7228 = vmatmul.mubr.msk.bf16.vlgmr.msra.gmra.mxu0 %vm651_vm0, %v611_v43  ;;  %7252 = vmatmul.mubr.msk.bf16.vlgmr.msra.gmra.mxu1 %vm651_vm0, %v433_v38  ;;  %v8130_v38 = vld [vmem:[#allocation2 + $0xf0] sm:$0xff]  }
 0x17d   :  { %7268 = vmatpush3.bf16.msra.mxu0 %v8686_v0  ;;  %7300 = vmatpush3.bf16.msra.mxu1 %v8160_v39  ;;  %v8134_v43 = vld [vmem:[#allocation2 + $0x110] sm:$0xff]  }
 0x17e   :  { %v7178_v48 = vpop.f32.mrf.mxu0  ;;  %v7210_v49 = vpop.f32.mrf.mxu1  ;;  %7269 = vmatprep.subr.bf16.mxu0 %v8691_v1  ;;  %7301 = vmatprep.subr.bf16.mxu1 %v8163_v42 }
 0x17f   :  { %v435_v50 = vpack.c.bf16 %v7178_v48, %v7177_v44  ;;  %v613_v55 = vpack.c.bf16 %v7210_v49, %v7209_v45  ;;  %v8166_v44 = vld [vmem:[#allocation5 + $0x48] sm:$0xff]   ;;  %v8136_v45 = vld [vmem:[#allocation2 + $0x120] sm:$0xff]   ;;  %v8853_v48 = vld [vmem:[#allocation5 + $0x78] sm:$0xff]  }
 0x180   :  { %v388_v51 = vpop.f32.mrf.mxu0  ;;  %v566_v52 = vpop.f32.mrf.mxu1  ;;  %v8859_v49 = vld [vmem:[%s9604_s28 + $0x10] sm:$0xff]  }
 0x181   :  { %v434_v53 = vpack.c.bf16 %v388_v51, %v385_v46  ;;  %v612_v54 = vpack.c.bf16 %v566_v52, %v563_v47  ;;  %7270 = vmatpush3.bf16.msra.mxu0 %v8691_v1  ;;  %7302 = vmatpush3.bf16.msra.mxu1 %v8163_v42  ;;  %v8138_v46 = vld [vmem:[#allocation2 + $0x130] sm:$0xff]   ;;  %v8850_v47 = vld [vmem:[%s9604_s28 + $0x18] sm:$0xff]   ;;  %v8140_v51 = vld [vmem:[#allocation2 + $0x140] sm:$0xff]  }
 0x182   :  { %v7181_v56 = vpop.f32.mrf.mxu0  ;;  %v7213_v57 = vpop.f32.mrf.mxu1  ;;  %7271 = vmatprep.subr.bf16.mxu0 %v8702_v2  ;;  %7303 = vmatprep.subr.bf16.mxu1 %v8166_v44  ;;  %v8867_v52 = vld [vmem:[%s9604_s28 + $0x8] sm:$0xff]  }
 0x183   :  { %7231 = vmatprep.mubr.msk.bf16.mxu0 %vm651_vm0, %v612_v54  ;;  %7255 = vmatprep.mubr.msk.bf16.mxu1 %vm651_vm0, %v434_v53  ;;  %v8874_v53 = vld [vmem:[%s9604_s28] sm:$0xff]   ;;  %v8141_v54 = vld [vmem:[#allocation2 + $0x148] sm:$0xff]  }
 0x184   :  { %v401_v58 = vpop.f32.mrf.mxu0  ;;  %v579_v59 = vpop.f32.mrf.mxu1  ;;  %7232 = vmatmul.mubr.msk.bf16.gmra.mxu0 %vm651_vm0, %v613_v55  ;;  %7256 = vmatmul.mubr.msk.bf16.gmra.mxu1 %vm651_vm0, %v435_v50  ;;  %v8139_v50 = vld [vmem:[#allocation2 + $0x138] sm:$0xff]   ;;  %v8142_v55 = vld [vmem:[#allocation2 + $0x150] sm:$0xff]  }
 0x185   :  { %7272 = vmatpush3.bf16.msra.mxu0 %v8702_v2  ;;  %7304 = vmatpush3.bf16.msra.mxu1 %v8166_v44 }
 0x186   :  { %v7182_v60 = vpop.f32.mrf.mxu0  ;;  %v7214_v61 = vpop.f32.mrf.mxu1  ;;  %7273 = vmatprep.subr.bf16.mxu0 %v8709_v3 }
 0x187   :  { %v437_v62 = vpack.c.bf16 %v7182_v60, %v7181_v56  ;;  %v615_v11 = vpack.c.bf16 %v7214_v61, %v7213_v57  ;;  %v8143_v56 = vld [vmem:[#allocation2 + $0x158] sm:$0xff]   ;;  %v8144_v57 = vld [vmem:[#allocation2 + $0x160] sm:$0xff]  }
 0x188   :  { %v404_v63 = vpop.f32.mrf.mxu0  ;;  %v582_v4 = vpop.f32.mrf.mxu1  ;;  %v8147_v60 = vld [vmem:[#allocation2 + $0x178] sm:$0xff]   ;;  %v8148_v61 = vld [vmem:[#allocation2 + $0x180] sm:$0xff]  }
 0x189   :  { %v436_v5 = vpack.c.bf16 %v404_v63, %v401_v58  ;;  %v614_v10 = vpack.c.bf16 %v582_v4, %v579_v59  ;;  %7274 = vmatpush3.bf16.msra.mxu0 %v8709_v3  ;;  %v8145_v58 = vld [vmem:[#allocation2 + $0x168] sm:$0xff]   ;;  %v8146_v59 = vld [vmem:[#allocation2 + $0x170] sm:$0xff]   ;;  %v8151_v4 = vld [vmem:[#allocation2 + $0x198] sm:$0xff]  }
 0x18a   :  { %v7185_v12 = vpop.f32.mrf.mxu0  ;;  %v7217_v13 = vpop.f32.mrf.mxu1  ;;  %7275 = vmatprep.subr.bf16.mxu0 %v8720_v6  ;;  %v8150_v63 = vld [vmem:[#allocation2 + $0x190] sm:$0xff]  }
 0x18b   :  { %7235 = vmatprep.mubr.msk.bf16.mxu0 %vm651_vm0, %v614_v10  ;;  %7259 = vmatprep.mubr.msk.bf16.mxu1 %vm651_vm0, %v436_v5  ;;  %v8152_v5 = vld [vmem:[#allocation2 + $0x1a0] sm:$0xff]   ;;  %v8153_v10 = vld [vmem:[#allocation2 + $0x1a8] sm:$0xff]  }
 0x18c   :  { %v417_v14 = vpop.f32.mrf.mxu0  ;;  %v595_v15 = vpop.f32.mrf.mxu1  ;;  %7236 = vmatmul.mubr.msk.bf16.gmra.mxu0 %vm651_vm0, %v615_v11  ;;  %7260 = vmatmul.mubr.msk.bf16.gmra.mxu1 %vm651_vm0, %v437_v62  ;;  %v8149_v62 = vld [vmem:[#allocation2 + $0x188] sm:$0xff]   ;;  %v8154_v11 = vld [vmem:[#allocation2 + $0x1b0] sm:$0xff]  }
 0x18d   :  { %7276 = vmatpush3.bf16.msra.mxu0 %v8720_v6 }
 0x18e   :  { %v7186_v16 = vpop.f32.mrf.mxu0  ;;  %v7218_v17 = vpop.f32.mrf.mxu1  ;;  %7277 = vmatprep.subr.bf16.mxu0 %v8729_v7 }
 0x18f   :  { %v439_v18 = vpack.c.bf16 %v7186_v16, %v7185_v12  ;;  %v617_v24 = vpack.c.bf16 %v7218_v17, %v7217_v13  ;;  %v8155_v12 = vld [vmem:[#allocation2 + $0x1b8] sm:$0xff]   ;;  %v8156_v13 = vld [vmem:[#allocation2 + $0x1c0] sm:$0xff]  }
 0x190   :  { %v420_v19 = vpop.f32.mrf.mxu0  ;;  %v598_v20 = vpop.f32.mrf.mxu1 }
 0x191   :  { %v438_v21 = vpack.c.bf16 %v420_v19, %v417_v14  ;;  %v616_v22 = vpack.c.bf16 %v598_v20, %v595_v15  ;;  %7278 = vmatpush3.bf16.msra.mxu0 %v8729_v7  ;;  %v8157_v14 = vld [vmem:[#allocation2 + $0x1c8] sm:$0xff]   ;;  %v8158_v15 = vld [vmem:[#allocation2 + $0x1d0] sm:$0xff]  }
 0x192   :  { %7279 = vmatprep.subr.bf16.mxu0 %v8738_v8 }
 0x193   :  { %7239 = vmatprep.mubr.msk.bf16.mxu0 %vm651_vm0, %v616_v22  ;;  %7263 = vmatprep.mubr.msk.bf16.mxu1 %vm651_vm0, %v438_v21 }
 0x194   :  { %7240 = vmatmul.mubr.msk.bf16.gmra.mxu0 %vm651_vm0, %v617_v24  ;;  %7264 = vmatmul.mubr.msk.bf16.gmra.mxu1 %vm651_vm0, %v439_v18  ;;  %v8159_v24 = vld [vmem:[#allocation2 + $0x1d8] sm:$0xff]  }
 0x195   :  { %7280 = vmatpush3.bf16.msra.mxu0 %v8738_v8  ;;  %7283 = vmatprep.mubr.bf16.mxu0 %v8116_v23 }
 0x196   :  { %7281 = vmatprep.subr.bf16.mxu0 %v8747_v9 }
 0x199   :  { %7282 = vmatpush3.bf16.msra.mxu0 %v8747_v9 }
 0x19a   :  { %7323 = vmatprep.subr.bf16.mxu0 %v8686_v0 }
 0x19c   :  { %7284 = vmatmul.mubr.bf16.vlgmr.msra.gmra.mxu0 %v8117_v25 }
 0x19d   :  { %7324 = vmatpush3.bf16.msra.mxu0 %v8686_v0  ;;  %7287 = vmatprep.mubr.bf16.mxu0 %v8118_v26  ;;  %v8123_v0 = vld [vmem:[#allocation2 + $0xb8] sm:$0xff]   ;;  %v8161_v26 = vld [vmem:[#allocation2 + $0x1e0] sm:$0xff]  }
 0x19e   :  { %7325 = vmatprep.subr.bf16.mxu0 %v8691_v1 }
 0x1a1   :  { %7326 = vmatpush3.bf16.msra.mxu0 %v8691_v1  ;;  %v8124_v1 = vld [vmem:[#allocation2 + $0xc0] sm:$0xff]  }
 0x1a2   :  { %7327 = vmatprep.subr.bf16.mxu0 %v8702_v2 }
 0x1a4   :  { %7288 = vmatmul.mubr.bf16.gmra.mxu0 %v8119_v27 }
 0x1a5   :  { %7328 = vmatpush3.bf16.msra.mxu0 %v8702_v2  ;;  %7291 = vmatprep.mubr.bf16.mxu0 %v8120_v28  ;;  %v8125_v2 = vld [vmem:[#allocation2 + $0xc8] sm:$0xff]  }
 0x1a6   :  { %7329 = vmatprep.subr.bf16.mxu0 %v8709_v3 }
 0x1a9   :  { %7330 = vmatpush3.bf16.msra.mxu0 %v8709_v3  ;;  %v8126_v3 = vld [vmem:[#allocation2 + $0xd0] sm:$0xff]  }
 0x1aa   :  { %7331 = vmatprep.subr.bf16.mxu0 %v8720_v6 }
 0x1ac   :  { %7292 = vmatmul.mubr.bf16.gmra.mxu0 %v8121_v29 }
 0x1ad   :  { %7332 = vmatpush3.bf16.msra.mxu0 %v8720_v6  ;;  %7295 = vmatprep.mubr.bf16.mxu0 %v8122_v30 }
 0x1ae   :  { %7333 = vmatprep.subr.bf16.mxu0 %v8729_v7 }
 0x1b1   :  { %7334 = vmatpush3.bf16.msra.mxu0 %v8729_v7 }
 0x1b2   :  { %7335 = vmatprep.subr.bf16.mxu0 %v8738_v8 }
 0x1b4   :  { %7296 = vmatmul.mubr.bf16.gmra.mxu0 %v8123_v0 }
 0x1b5   :  { %7336 = vmatpush3.bf16.msra.mxu0 %v8738_v8  ;;  %7339 = vmatprep.mubr.bf16.mxu0 %v8124_v1 }
 0x1b6   :  { %7337 = vmatprep.subr.bf16.mxu0 %v8747_v9 }
 0x1b9   :  { %7338 = vmatpush3.bf16.msra.mxu0 %v8747_v9 }
 0x1ba   :  { %7379 = vmatprep.subr.bf16.mxu0 %v8806_v31 }
 0x1bc   :  { %7340 = vmatmul.mubr.bf16.vlgmr.msra.gmra.mxu0 %v8125_v2 }
 0x1bd   :  { %7380 = vmatpush3.bf16.msra.mxu0 %v8806_v31  ;;  %7343 = vmatprep.mubr.bf16.mxu0 %v8126_v3 }
 0x1be   :  { %7381 = vmatprep.subr.bf16.mxu0 %v8813_v32 }
 0x1c1   :  { %7382 = vmatpush3.bf16.msra.mxu0 %v8813_v32 }
 0x1c2   :  { %7383 = vmatprep.subr.bf16.mxu0 %v8820_v35 }
 0x1c4   :  { %7344 = vmatmul.mubr.bf16.gmra.mxu0 %v8127_v33  ;;  %v8162_v33 = vld [vmem:[#allocation2 + $0x1e8] sm:$0xff]  }
 0x1c5   :  { %7384 = vmatpush3.bf16.msra.mxu0 %v8820_v35  ;;  %7347 = vmatprep.mubr.bf16.mxu0 %v8128_v34 }
 0x1c6   :  { %7385 = vmatprep.subr.bf16.mxu0 %v8827_v36 }
 0x1c9   :  { %7386 = vmatpush3.bf16.msra.mxu0 %v8827_v36 }
 0x1ca   :  { %7387 = vmatprep.subr.bf16.mxu0 %v8720_v6 }
 0x1cc   :  { %7348 = vmatmul.mubr.bf16.gmra.mxu0 %v8129_v37  ;;  %v8164_v37 = vld [vmem:[#allocation2 + $0x1f0] sm:$0xff]  }
 0x1cd   :  { %7388 = vmatpush3.bf16.msra.mxu0 %v8720_v6  ;;  %7351 = vmatprep.mubr.bf16.mxu0 %v8130_v38  ;;  %v8133_v6 = vld [vmem:[#allocation2 + $0x108] sm:$0xff]  }
 0x1ce   :  { %7389 = vmatprep.subr.bf16.mxu0 %v8729_v7 }
 0x1d1   :  { %7390 = vmatpush3.bf16.msra.mxu0 %v8729_v7  ;;  %v8135_v7 = vld [vmem:[#allocation2 + $0x118] sm:$0xff]  }
 0x1d2   :  { %7391 = vmatprep.subr.bf16.mxu0 %v8738_v8 }
 0x1d4   :  { %7352 = vmatmul.mubr.bf16.gmra.mxu0 %v8131_v40 }
 0x1d5   :  { %7392 = vmatpush3.bf16.msra.mxu0 %v8738_v8  ;;  %7395 = vmatprep.mubr.bf16.mxu0 %v8132_v41  ;;  %v8169_v8 = vld [vmem:[#allocation5 + $0x40] sm:$0xff]  }
 0x1d6   :  { %7393 = vmatprep.subr.bf16.mxu0 %v8747_v9  ;;  %7305 = vmatprep.subr.bf16.mxu1 %v8169_v8 }
 0x1d7   :  { %7306 = vmatpush3.bf16.msra.mxu1 %v8169_v8 }
 0x1d8   :  { %7355 = vmatprep.subr.bf16.mxu1 %v8853_v48 }
 0x1d9   :  { %7394 = vmatpush3.bf16.msra.mxu0 %v8747_v9  ;;  %v8137_v9 = vld [vmem:[#allocation2 + $0x128] sm:$0xff]  }
 0x1da   :  { %7435 = vmatprep.subr.bf16.mxu0 %v8806_v31 }
 0x1dc   :  { %7396 = vmatmul.mubr.bf16.vlgmr.msra.gmra.mxu0 %v8133_v6 }
 0x1dd   :  { %7436 = vmatpush3.bf16.msra.mxu0 %v8806_v31  ;;  %7399 = vmatprep.mubr.bf16.mxu0 %v8134_v43 }
 0x1de   :  { %7437 = vmatprep.subr.bf16.mxu0 %v8813_v32 }
 0x1e1   :  { %7438 = vmatpush3.bf16.msra.mxu0 %v8813_v32 }
 0x1e2   :  { %7439 = vmatprep.subr.bf16.mxu0 %v8820_v35 }
 0x1e4   :  { %7400 = vmatmul.mubr.bf16.gmra.mxu0 %v8135_v7  ;;  %v8165_v7 = vld [vmem:[#allocation2 + $0x1f8] sm:$0xff]  }
 0x1e5   :  { %7440 = vmatpush3.bf16.msra.mxu0 %v8820_v35  ;;  %7403 = vmatprep.mubr.bf16.mxu0 %v8136_v45  ;;  %v8167_v45 = vld [vmem:[#allocation2 + $0x200] sm:$0xff]  }
 0x1e6   :  { %7441 = vmatprep.subr.bf16.mxu0 %v8827_v36 }
 0x1e9   :  { %7442 = vmatpush3.bf16.msra.mxu0 %v8827_v36 }
 0x1ea   :  { %7443 = vmatprep.subr.bf16.mxu0 %v8850_v47 }
 0x1ec   :  { %7404 = vmatmul.mubr.bf16.gmra.mxu0 %v8137_v9 }
 0x1ed   :  { %7444 = vmatpush3.bf16.msra.mxu0 %v8850_v47  ;;  %7407 = vmatprep.mubr.bf16.mxu0 %v8138_v46 }
 0x1ee   :  { %7445 = vmatprep.subr.bf16.mxu0 %v8859_v49 }
 0x1f1   :  { %7446 = vmatpush3.bf16.msra.mxu0 %v8859_v49 }
 0x1f2   :  { %7447 = vmatprep.subr.bf16.mxu0 %v8867_v52 }
 0x1f4   :  { %7408 = vmatmul.mubr.bf16.gmra.mxu0 %v8139_v50 }
 0x1f5   :  { %7448 = vmatpush3.bf16.msra.mxu0 %v8867_v52  ;;  %7451 = vmatprep.mubr.bf16.mxu0 %v8140_v51 }
 0x1f6   :  { %7449 = vmatprep.subr.bf16.mxu0 %v8874_v53 }
 0x1f9   :  { %7450 = vmatpush3.bf16.msra.mxu0 %v8874_v53 }
 0x1fa   :  { %7491 = vmatprep.subr.bf16.mxu0 %v8806_v31 }
 0x1fc   :  { %7452 = vmatmul.mubr.bf16.vlgmr.msra.gmra.mxu0 %v8141_v54 }
 0x1fd   :  { %7492 = vmatpush3.bf16.msra.mxu0 %v8806_v31  ;;  %7455 = vmatprep.mubr.bf16.mxu0 %v8142_v55 }
 0x1fe   :  { %7493 = vmatprep.subr.bf16.mxu0 %v8813_v32 }
 0x201   :  { %7494 = vmatpush3.bf16.msra.mxu0 %v8813_v32 }
 0x202   :  { %7495 = vmatprep.subr.bf16.mxu0 %v8820_v35 }
 0x204   :  { %7456 = vmatmul.mubr.bf16.gmra.mxu0 %v8143_v56 }
 0x205   :  { %7496 = vmatpush3.bf16.msra.mxu0 %v8820_v35  ;;  %7459 = vmatprep.mubr.bf16.mxu0 %v8144_v57 }
 0x206   :  { %7497 = vmatprep.subr.bf16.mxu0 %v8827_v36 }
 0x209   :  { %7498 = vmatpush3.bf16.msra.mxu0 %v8827_v36 }
 0x20a   :  { %7499 = vmatprep.subr.bf16.mxu0 %v8850_v47 }
 0x20c   :  { %7460 = vmatmul.mubr.bf16.gmra.mxu0 %v8145_v58  ;;  %v8168_v58 = vld [vmem:[#allocation2 + $0x208] sm:$0xff]  }
 0x20d   :  { %7500 = vmatpush3.bf16.msra.mxu0 %v8850_v47  ;;  %7463 = vmatprep.mubr.bf16.mxu0 %v8146_v59 }
 0x20e   :  { %7501 = vmatprep.subr.bf16.mxu0 %v8859_v49 }
 0x211   :  { %7502 = vmatpush3.bf16.msra.mxu0 %v8859_v49 }
 0x212   :  { %7503 = vmatprep.subr.bf16.mxu0 %v8867_v52 }
 0x214   :  { %7464 = vmatmul.mubr.bf16.gmra.mxu0 %v8147_v60  ;;  %v8170_v60 = vld [vmem:[#allocation2 + $0x210] sm:$0xff]  }
 0x215   :  { %7504 = vmatpush3.bf16.msra.mxu0 %v8867_v52  ;;  %7507 = vmatprep.mubr.bf16.mxu0 %v8148_v61 }
 0x216   :  { %7505 = vmatprep.subr.bf16.mxu0 %v8874_v53 }
 0x219   :  { %7506 = vmatpush3.bf16.msra.mxu0 %v8874_v53 }
 0x21a   :  { %7547 = vmatprep.subr.bf16.mxu0 %v8806_v31 }
 0x21c   :  { %7508 = vmatmul.mubr.bf16.vlgmr.msra.gmra.mxu0 %v8149_v62 }
 0x21d   :  { %7548 = vmatpush3.bf16.msra.mxu0 %v8806_v31  ;;  %7511 = vmatprep.mubr.bf16.mxu0 %v8150_v63 }
 0x21e   :  { %7549 = vmatprep.subr.bf16.mxu0 %v8813_v32 }
 0x221   :  { %7550 = vmatpush3.bf16.msra.mxu0 %v8813_v32 }
 0x222   :  { %7551 = vmatprep.subr.bf16.mxu0 %v8820_v35 }
 0x224   :  { %7512 = vmatmul.mubr.bf16.gmra.mxu0 %v8151_v4  ;;  %v8171_v4 = vld [vmem:[#allocation2 + $0x218] sm:$0xff]  }
 0x225   :  { %7552 = vmatpush3.bf16.msra.mxu0 %v8820_v35  ;;  %7515 = vmatprep.mubr.bf16.mxu0 %v8152_v5  ;;  %v8173_v5 = vld [vmem:[#allocation2 + $0x220] sm:$0xff]  }
 0x226   :  { %7553 = vmatprep.subr.bf16.mxu0 %v8827_v36 }
 0x229   :  { %7554 = vmatpush3.bf16.msra.mxu0 %v8827_v36 }
 0x22a   :  { %7555 = vmatprep.subr.bf16.mxu0 %v8850_v47 }
 0x22c   :  { %7516 = vmatmul.mubr.bf16.gmra.mxu0 %v8153_v10 }
 0x22d   :  { %7556 = vmatpush3.bf16.msra.mxu0 %v8850_v47  ;;  %7519 = vmatprep.mubr.bf16.mxu0 %v8154_v11 }
 0x22e   :  { %7557 = vmatprep.subr.bf16.mxu0 %v8859_v49 }
 0x231   :  { %7558 = vmatpush3.bf16.msra.mxu0 %v8859_v49 }
 0x232   :  { %7559 = vmatprep.subr.bf16.mxu0 %v8867_v52 }
 0x234   :  { %7520 = vmatmul.mubr.bf16.gmra.mxu0 %v8155_v12 }
 0x235   :  { %7560 = vmatpush3.bf16.msra.mxu0 %v8867_v52  ;;  %7563 = vmatprep.mubr.bf16.mxu0 %v8156_v13 }
 0x236   :  { %7561 = vmatprep.subr.bf16.mxu0 %v8874_v53 }
 0x239   :  { %7562 = vmatpush3.bf16.msra.mxu0 %v8874_v53 }
 0x23a   :  { %7603 = vmatprep.subr.bf16.mxu0 %v8806_v31 }
 0x23c   :  { %v7229_v16 = vpop.f32.mrf.mxu0  ;;  %v7253_v17 = vpop.f32.mrf.mxu1  ;;  %7564 = vmatmul.mubr.bf16.vlgmr.msra.gmra.mxu0 %v8157_v14  ;;  %v8175_v14 = vld [vmem:[#allocation5 + $0x70] sm:$0xff]  }
 0x23d   :  { %v8911_v18 = vadd.f32 %v7253_v17, %v7229_v16  ;;  %7604 = vmatpush3.bf16.msra.mxu0 %v8806_v31  ;;  %7567 = vmatprep.mubr.bf16.mxu0 %v8158_v15  ;;  %v8174_v16 = vld [vmem:[#allocation2 + $0x228] sm:$0xff]  }
 0x23e   :  { %v710_v19 = vpop.f32.mrf.mxu0  ;;  %v855_v20 = vpop.f32.mrf.mxu1  ;;  %7605 = vmatprep.subr.bf16.mxu0 %v8813_v32  ;;  %v8178_v17 = vld [vmem:[#allocation5 + $0x68] sm:$0xff]  }
 0x23f   :  { %v8915_v21 = vadd.f32 %v855_v20, %v710_v19  ;;  %v8176_v19 = vld [vmem:[#allocation2 + $0x230] sm:$0xff]  }
 0x240   :  { %v7230_v22 = vpop.f32.mrf.mxu0  ;;  %v7254_v23 = vpop.f32.mrf.mxu1 }
 0x241   :  { %v8917_v25 = vadd.f32 %v7254_v23, %v7230_v22  ;;  %7606 = vmatpush3.bf16.msra.mxu0 %v8813_v32 }
 0x242   :  { %v8920_v27 = vpop.f32.mrf.mxu0  ;;  %v8922_v28 = vpop.f32.mrf.mxu1  ;;  %7607 = vmatprep.subr.bf16.mxu0 %v8820_v35 }
 0x244   :  { %v7233_v29 = vpop.f32.mrf.mxu0  ;;  %v7257_v30 = vpop.f32.mrf.mxu1  ;;  %7568 = vmatmul.mubr.bf16.gmra.mxu0 %v8159_v24 }
 0x245   :  { %v8925_v0 = vadd.f32 %v7257_v30, %v7233_v29  ;;  %7608 = vmatpush3.bf16.msra.mxu0 %v8820_v35  ;;  %7571 = vmatprep.mubr.bf16.mxu0 %v8161_v26  ;;  %v8179_v26 = vld [vmem:[#allocation5 + $0x60] sm:$0xff]   ;;  %v8177_v30 = vld [vmem:[#allocation2 + $0x238] sm:$0xff]  }
 0x246   :  { %v726_v1 = vpop.f32.mrf.mxu0  ;;  %v871_v2 = vpop.f32.mrf.mxu1  ;;  %7609 = vmatprep.subr.bf16.mxu0 %v8827_v36 }
 0x247   :  { %v8929_v3 = vadd.f32 %v871_v2, %v726_v1  ;;  %v8180_v1 = vld [vmem:[#allocation5 + $0x98] sm:$0xff]  }
 0x248   :  { %v7234_v31 = vpop.f32.mrf.mxu0  ;;  %v7258_v32 = vpop.f32.mrf.mxu1 }
 0x249   :  { %v8931_v34 = vadd.f32 %v7258_v32, %v7234_v31  ;;  %7610 = vmatpush3.bf16.msra.mxu0 %v8827_v36 }
 0x24a   :  { %v8934_v38 = vpop.f32.mrf.mxu0  ;;  %v8936_v39 = vpop.f32.mrf.mxu1  ;;  %7611 = vmatprep.subr.bf16.mxu0 %v8850_v47 }
 0x24c   :  { %v7237_v35 = vpop.f32.mrf.mxu0  ;;  %v7261_v40 = vpop.f32.mrf.mxu1  ;;  %7572 = vmatmul.mubr.bf16.gmra.mxu0 %v8162_v33 }
 0x24d   :  { %v8939_v41 = vadd.f32 %v7261_v40, %v7237_v35  ;;  %7612 = vmatpush3.bf16.msra.mxu0 %v8850_v47  ;;  %7575 = vmatprep.mubr.bf16.mxu0 %v8164_v37 }
 0x24e   :  { %v742_v42 = vpop.f32.mrf.mxu0  ;;  %v887_v6 = vpop.f32.mrf.mxu1  ;;  %7613 = vmatprep.subr.bf16.mxu0 %v8859_v49 }
 0x24f   :  { %v8943_v36 = vadd.f32 %v887_v6, %v742_v42 }
 0x250   :  { %v7238_v43 = vpop.f32.mrf.mxu0  ;;  %v7262_v44 = vpop.f32.mrf.mxu1 }
 0x251   :  { %v8945_v8 = vadd.f32 %v7262_v44, %v7238_v43  ;;  %7614 = vmatpush3.bf16.msra.mxu0 %v8859_v49 }
 0x252   :  { %v8948_v9 = vpop.f32.mrf.mxu0  ;;  %v8950_v46 = vpop.f32.mrf.mxu1  ;;  %7615 = vmatprep.subr.bf16.mxu0 %v8867_v52 }
 0x254   :  { %v7241_v47 = vpop.f32.mrf.mxu0  ;;  %v7265_v50 = vpop.f32.mrf.mxu1  ;;  %7576 = vmatmul.mubr.bf16.gmra.mxu0 %v8165_v7 }
 0x255   :  { %v8953_v51 = vadd.f32 %v7265_v50, %v7241_v47  ;;  %7616 = vmatpush3.bf16.msra.mxu0 %v8867_v52  ;;  %7619 = vmatprep.mubr.bf16.mxu0 %v8167_v45 }
 0x256   :  { %v758_v54 = vpop.f32.mrf.mxu0  ;;  %v903_v55 = vpop.f32.mrf.mxu1  ;;  %7617 = vmatprep.subr.bf16.mxu0 %v8874_v53 }
 0x257   :  { %v8957_v49 = vadd.f32 %v903_v55, %v758_v54  ;;  %v8181_v55 = vld [vmem:[#allocation5 + $0x90] sm:$0xff]  }
 0x258   :  { %v7242_v56 = vpop.f32.mrf.mxu0  ;;  %v7266_v57 = vpop.f32.mrf.mxu1 }
 0x259   :  { %v8959_v59 = vadd.f32 %v7266_v57, %v7242_v56  ;;  %7618 = vmatpush3.bf16.msra.mxu0 %v8874_v53 }
 0x25a   :  { %v8962_v61 = vpop.f32.mrf.mxu0 }
 0x25c   :  { %v7285_v62 = vpop.f32.mrf.mxu0  ;;  %7620 = vmatmul.mubr.bf16.vlgmr.msra.gmra.mxu0 %v8168_v58  ;;  %v8182_v58 = vld [vmem:[#allocation5 + $0x88] sm:$0xff]  }
 0x25d   :  { %7623 = vmatprep.mubr.bf16.mxu0 %v8170_v60 }
 0x25e   :  { %v1017_v52 = vpop.f32.mrf.mxu0 }
 0x260   :  { %v7286_v63 = vpop.f32.mrf.mxu0 }
 0x261   :  { %v1081_v12 = vpack.c.bf16 %v7286_v63, %v7285_v62 }
 0x262   :  { %v1020_v10 = vpop.f32.mrf.mxu0 }
 0x263   :  { %v1080_v11 = vpack.c.bf16 %v1020_v10, %v1017_v52 }
 0x264   :  { %v7289_v13 = vpop.f32.mrf.mxu0  ;;  %7624 = vmatmul.mubr.bf16.gmra.mxu0 %v8171_v4  ;;  %v8183_v4 = vld [vmem:[#allocation5 + $0x80] sm:$0xff]  }
 0x265   :  { %7307 = vmatprep.mubr.msk.bf16.mxu1 %vm651_vm0, %v1080_v11  ;;  %7627 = vmatprep.mubr.bf16.mxu0 %v8173_v5  ;;  %v8184_v11 = vld [vmem:[#allocation5 + $0xb8] sm:$0xff]  }
 0x266   :  { %v1033_v53 = vpop.f32.mrf.mxu0  ;;  %7308 = vmatmul.mubr.msk.bf16.vlgmr.msra.gmra.mxu1 %vm651_vm0, %v1081_v12 }
 0x267   :  { %7356 = vmatpush3.bf16.msra.mxu1 %v8853_v48 }
 0x268   :  { %v7290_v15 = vpop.f32.mrf.mxu0  ;;  %7357 = vmatprep.subr.bf16.mxu1 %v8175_v14 }
 0x269   :  { %v1083_v23 = vpack.c.bf16 %v7290_v15, %v7289_v13 }
 0x26a   :  { %v1036_v20 = vpop.f32.mrf.mxu0 }
 0x26b   :  { %v1082_v22 = vpack.c.bf16 %v1036_v20, %v1033_v53  ;;  %7358 = vmatpush3.bf16.msra.mxu1 %v8175_v14 }
 0x26c   :  { %v7293_v24 = vpop.f32.mrf.mxu0  ;;  %7628 = vmatmul.mubr.bf16.gmra.mxu0 %v8174_v16  ;;  %7359 = vmatprep.subr.bf16.mxu1 %v8178_v17 }
 0x26d   :  { %7311 = vmatprep.mubr.msk.bf16.mxu1 %vm651_vm0, %v1082_v22  ;;  %7631 = vmatprep.mubr.bf16.mxu0 %v8176_v19 }
 0x26e   :  { %v1049_v29 = vpop.f32.mrf.mxu0  ;;  %7312 = vmatmul.mubr.msk.bf16.gmra.mxu1 %vm651_vm0, %v1083_v23 }
 0x26f   :  { %7360 = vmatpush3.bf16.msra.mxu1 %v8178_v17 }
 0x270   :  { %v7294_v48 = vpop.f32.mrf.mxu0  ;;  %7361 = vmatprep.subr.bf16.mxu1 %v8179_v26 }
 0x271   :  { %v1085_v32 = vpack.c.bf16 %v7294_v48, %v7293_v24 }
 0x272   :  { %v1052_v2 = vpop.f32.mrf.mxu0 }
 0x273   :  { %v1084_v31 = vpack.c.bf16 %v1052_v2, %v1049_v29  ;;  %7362 = vmatpush3.bf16.msra.mxu1 %v8179_v26 }
 0x274   :  { %v7297_v33 = vpop.f32.mrf.mxu0  ;;  %7632 = vmatmul.mubr.bf16.gmra.mxu0 %v8177_v30  ;;  %7411 = vmatprep.subr.bf16.mxu1 %v8180_v1 }
 0x275   :  { %7315 = vmatprep.mubr.msk.bf16.mxu1 %vm651_vm0, %v1084_v31 }
 0x276   :  { %v1065_v37 = vpop.f32.mrf.mxu0  ;;  %7316 = vmatmul.mubr.msk.bf16.gmra.mxu1 %vm651_vm0, %v1085_v32  ;;  %v8186_v32 = vld [vmem:[#allocation5 + $0xa8] sm:$0xff]  }
 0x278   :  { %v7298_v35 = vpop.f32.mrf.mxu0 }
 0x279   :  { %v1087_v6 = vpack.c.bf16 %v7298_v35, %v7297_v33 }
 0x27a   :  { %v1068_v40 = vpop.f32.mrf.mxu0 }
 0x27b   :  { %v1086_v42 = vpack.c.bf16 %v1068_v40, %v1065_v37 }
 0x27c   :  { %v7341_v43 = vpop.f32.mrf.mxu0 }
 0x27d   :  { %7319 = vmatprep.mubr.msk.bf16.mxu1 %vm651_vm0, %v1086_v42  ;;  %v8187_v42 = vld [vmem:[#allocation5 + $0xa0] sm:$0xff]  }
 0x27e   :  { %7320 = vmatmul.mubr.msk.bf16.gmra.mxu1 %vm651_vm0, %v1087_v6  ;;  %v1357_v44 = vpop.f32.mrf.mxu0 }
 0x280   :  { %v7342_v7 = vpop.f32.mrf.mxu0 }
 0x281   :  { %v1421_v50 = vpack.c.bf16 %v7342_v7, %v7341_v43 }
 0x282   :  { %v1360_v45 = vpop.f32.mrf.mxu0 }
 0x283   :  { %v1420_v47 = vpack.c.bf16 %v1360_v45, %v1357_v44  ;;  %v8188_v44 = vld [vmem:[#allocation5 + $0xd8] sm:$0xff]  }
 0x284   :  { %v7345_v54 = vpop.f32.mrf.mxu0 }
 0x285   :  { %7363 = vmatprep.mubr.msk.bf16.mxu1 %vm651_vm0, %v1420_v47 }
 0x286   :  { %v1373_v56 = vpop.f32.mrf.mxu0  ;;  %7364 = vmatmul.mubr.msk.bf16.vlgmr.msra.gmra.mxu1 %vm651_vm0, %v1421_v50 }
 0x287   :  { %7412 = vmatpush3.bf16.msra.mxu1 %v8180_v1  ;;  %v8185_v1 = vld [vmem:[#allocation5 + $0xb0] sm:$0xff]  }
 0x288   :  { %v7346_v57 = vpop.f32.mrf.mxu0  ;;  %7413 = vmatprep.subr.bf16.mxu1 %v8181_v55 }
 0x289   :  { %v1423_v52 = vpack.c.bf16 %v7346_v57, %v7345_v54 }
 0x28a   :  { %v1376_v60 = vpop.f32.mrf.mxu0 }
 0x28b   :  { %v1422_v62 = vpack.c.bf16 %v1376_v60, %v1373_v56  ;;  %7414 = vmatpush3.bf16.msra.mxu1 %v8181_v55 }
 0x28c   :  { %v7349_v63 = vpop.f32.mrf.mxu0  ;;  %7415 = vmatprep.subr.bf16.mxu1 %v8182_v58 }
 0x28d   :  { %7367 = vmatprep.mubr.msk.bf16.mxu1 %vm651_vm0, %v1422_v62 }
 0x28e   :  { %v1389_v5 = vpop.f32.mrf.mxu0  ;;  %7368 = vmatmul.mubr.msk.bf16.gmra.mxu1 %vm651_vm0, %v1423_v52 }
 0x28f   :  { %7416 = vmatpush3.bf16.msra.mxu1 %v8182_v58 }
 0x290   :  { %v7350_v10 = vpop.f32.mrf.mxu0  ;;  %7417 = vmatprep.subr.bf16.mxu1 %v8183_v4 }
 0x291   :  { %v1425_v14 = vpack.c.bf16 %v7350_v10, %v7349_v63 }
 0x292   :  { %v1392_v12 = vpop.f32.mrf.mxu0 }
 0x293   :  { %v1424_v13 = vpack.c.bf16 %v1392_v12, %v1389_v5  ;;  %7418 = vmatpush3.bf16.msra.mxu1 %v8183_v4 }
 0x294   :  { %v7353_v53 = vpop.f32.mrf.mxu0  ;;  %7467 = vmatprep.subr.bf16.mxu1 %v8184_v11 }
 0x295   :  { %7371 = vmatprep.mubr.msk.bf16.mxu1 %vm651_vm0, %v1424_v13 }
 0x296   :  { %v1405_v15 = vpop.f32.mrf.mxu0  ;;  %7372 = vmatmul.mubr.msk.bf16.gmra.mxu1 %vm651_vm0, %v1425_v14  ;;  %v8190_v14 = vld [vmem:[#allocation5 + $0xc8] sm:$0xff]  }
 0x298   :  { %v7354_v16 = vpop.f32.mrf.mxu0 }
 0x299   :  { %v1427_v20 = vpack.c.bf16 %v7354_v16, %v7353_v53 }
 0x29a   :  { %v1408_v17 = vpop.f32.mrf.mxu0 }
 0x29b   :  { %v1426_v19 = vpack.c.bf16 %v1408_v17, %v1405_v15 }
 0x29c   :  { %v7397_v22 = vpop.f32.mrf.mxu0 }
 0x29d   :  { %7375 = vmatprep.mubr.msk.bf16.mxu1 %vm651_vm0, %v1426_v19  ;;  %v8191_v19 = vld [vmem:[#allocation5 + $0xc0] sm:$0xff]  }
 0x29e   :  { %7376 = vmatmul.mubr.msk.bf16.gmra.mxu1 %vm651_vm0, %v1427_v20  ;;  %v1697_v23 = vpop.f32.mrf.mxu0 }
 0x2a0   :  { %v7398_v24 = vpop.f32.mrf.mxu0 }
 0x2a1   :  { %v1761_v48 = vpack.c.bf16 %v7398_v24, %v7397_v22 }
 0x2a2   :  { %v1700_v26 = vpop.f32.mrf.mxu0 }
 0x2a3   :  { %v1760_v29 = vpack.c.bf16 %v1700_v26, %v1697_v23  ;;  %v8192_v23 = vld [vmem:[#allocation5 + $0xf8] sm:$0xff]  }
 0x2a4   :  { %v7401_v30 = vpop.f32.mrf.mxu0 }
 0x2a5   :  { %7419 = vmatprep.mubr.msk.bf16.mxu1 %vm651_vm0, %v1760_v29 }
 0x2a6   :  { %v1713_v2 = vpop.f32.mrf.mxu0  ;;  %7420 = vmatmul.mubr.msk.bf16.vlgmr.msra.gmra.mxu1 %vm651_vm0, %v1761_v48 }
 0x2a7   :  { %7468 = vmatpush3.bf16.msra.mxu1 %v8184_v11  ;;  %v8189_v11 = vld [vmem:[#allocation5 + $0xd0] sm:$0xff]  }
 0x2a8   :  { %v7402_v31 = vpop.f32.mrf.mxu0  ;;  %7469 = vmatprep.subr.bf16.mxu1 %v8185_v1 }
 0x2a9   :  { %v1763_v35 = vpack.c.bf16 %v7402_v31, %v7401_v30 }
 0x2aa   :  { %v1716_v33 = vpop.f32.mrf.mxu0 }
 0x2ab   :  { %v1762_v37 = vpack.c.bf16 %v1716_v33, %v1713_v2  ;;  %7470 = vmatpush3.bf16.msra.mxu1 %v8185_v1 }
 0x2ac   :  { %v7405_v40 = vpop.f32.mrf.mxu0  ;;  %7471 = vmatprep.subr.bf16.mxu1 %v8186_v32 }
 0x2ad   :  { %7423 = vmatprep.mubr.msk.bf16.mxu1 %vm651_vm0, %v1762_v37 }
 0x2ae   :  { %v1729_v6 = vpop.f32.mrf.mxu0  ;;  %7424 = vmatmul.mubr.msk.bf16.gmra.mxu1 %vm651_vm0, %v1763_v35 }
 0x2af   :  { %7472 = vmatpush3.bf16.msra.mxu1 %v8186_v32 }
 0x2b0   :  { %v7406_v43 = vpop.f32.mrf.mxu0  ;;  %7473 = vmatprep.subr.bf16.mxu1 %v8187_v42 }
 0x2b1   :  { %v1765_v47 = vpack.c.bf16 %v7406_v43, %v7405_v40 }
 0x2b2   :  { %v1732_v7 = vpop.f32.mrf.mxu0 }
 0x2b3   :  { %v1764_v45 = vpack.c.bf16 %v1732_v7, %v1729_v6  ;;  %7474 = vmatpush3.bf16.msra.mxu1 %v8187_v42 }
 0x2b4   :  { %v7409_v50 = vpop.f32.mrf.mxu0  ;;  %7523 = vmatprep.subr.bf16.mxu1 %v8188_v44 }
 0x2b5   :  { %7427 = vmatprep.mubr.msk.bf16.mxu1 %vm651_vm0, %v1764_v45 }
 0x2b6   :  { %v1745_v54 = vpop.f32.mrf.mxu0  ;;  %7428 = vmatmul.mubr.msk.bf16.gmra.mxu1 %vm651_vm0, %v1765_v47  ;;  %v8194_v47 = vld [vmem:[#allocation5 + $0xe8] sm:$0xff]  }
 0x2b8   :  { %v7410_v55 = vpop.f32.mrf.mxu0 }
 0x2b9   :  { %v1767_v58 = vpack.c.bf16 %v7410_v55, %v7409_v50 }
 0x2ba   :  { %v1748_v56 = vpop.f32.mrf.mxu0 }
 0x2bb   :  { %v1766_v57 = vpack.c.bf16 %v1748_v56, %v1745_v54 }
 0x2bc   :  { %v7453_v60 = vpop.f32.mrf.mxu0 }
 0x2bd   :  { %7431 = vmatprep.mubr.msk.bf16.mxu1 %vm651_vm0, %v1766_v57  ;;  %v8195_v57 = vld [vmem:[#allocation5 + $0xe0] sm:$0xff]  }
 0x2be   :  { %7432 = vmatmul.mubr.msk.bf16.gmra.mxu1 %vm651_vm0, %v1767_v58  ;;  %v2037_v62 = vpop.f32.mrf.mxu0 }
 0x2c0   :  { %v7454_v52 = vpop.f32.mrf.mxu0 }
 0x2c1   :  { %v2101_v5 = vpack.c.bf16 %v7454_v52, %v7453_v60 }
 0x2c2   :  { %v2040_v63 = vpop.f32.mrf.mxu0 }
 0x2c3   :  { %v2100_v4 = vpack.c.bf16 %v2040_v63, %v2037_v62  ;;  %v8196_v62 = vld [vmem:[#allocation5 + $0x118] sm:$0xff]  }
 0x2c4   :  { %v7457_v10 = vpop.f32.mrf.mxu0 }
 0x2c5   :  { %7475 = vmatprep.mubr.msk.bf16.mxu1 %vm651_vm0, %v2100_v4 }
 0x2c6   :  { %v2053_v12 = vpop.f32.mrf.mxu0  ;;  %7476 = vmatmul.mubr.msk.bf16.vlgmr.msra.gmra.mxu1 %vm651_vm0, %v2101_v5 }
 0x2c7   :  { %7524 = vmatpush3.bf16.msra.mxu1 %v8188_v44  ;;  %v8193_v44 = vld [vmem:[#allocation5 + $0xf0] sm:$0xff]  }
 0x2c8   :  { %v7458_v13 = vpop.f32.mrf.mxu0  ;;  %7525 = vmatprep.subr.bf16.mxu1 %v8189_v11 }
 0x2c9   :  { %v2103_v16 = vpack.c.bf16 %v7458_v13, %v7457_v10 }
 0x2ca   :  { %v2056_v53 = vpop.f32.mrf.mxu0 }
 0x2cb   :  { %v2102_v15 = vpack.c.bf16 %v2056_v53, %v2053_v12  ;;  %7526 = vmatpush3.bf16.msra.mxu1 %v8189_v11 }
 0x2cc   :  { %v7461_v17 = vpop.f32.mrf.mxu0  ;;  %7527 = vmatprep.subr.bf16.mxu1 %v8190_v14 }
 0x2cd   :  { %7479 = vmatprep.mubr.msk.bf16.mxu1 %vm651_vm0, %v2102_v15 }
 0x2ce   :  { %v2069_v20 = vpop.f32.mrf.mxu0  ;;  %7480 = vmatmul.mubr.msk.bf16.gmra.mxu1 %vm651_vm0, %v2103_v16 }
 0x2cf   :  { %7528 = vmatpush3.bf16.msra.mxu1 %v8190_v14 }
 0x2d0   :  { %v7462_v22 = vpop.f32.mrf.mxu0  ;;  %7529 = vmatprep.subr.bf16.mxu1 %v8191_v19 }
 0x2d1   :  { %v2105_v29 = vpack.c.bf16 %v7462_v22, %v7461_v17 }
 0x2d2   :  { %v2072_v24 = vpop.f32.mrf.mxu0 }
 0x2d3   :  { %v2104_v26 = vpack.c.bf16 %v2072_v24, %v2069_v20  ;;  %7530 = vmatpush3.bf16.msra.mxu1 %v8191_v19 }
 0x2d4   :  { %v7465_v48 = vpop.f32.mrf.mxu0  ;;  %7579 = vmatprep.subr.bf16.mxu1 %v8192_v23 }
 0x2d5   :  { %7483 = vmatprep.mubr.msk.bf16.mxu1 %vm651_vm0, %v2104_v26 }
 0x2d6   :  { %v2085_v30 = vpop.f32.mrf.mxu0  ;;  %7484 = vmatmul.mubr.msk.bf16.gmra.mxu1 %vm651_vm0, %v2105_v29  ;;  %v8198_v29 = vld [vmem:[#allocation5 + $0x108] sm:$0xff]  }
 0x2d8   :  { %v7466_v1 = vpop.f32.mrf.mxu0 }
 0x2d9   :  { %v2107_v32 = vpack.c.bf16 %v7466_v1, %v7465_v48 }
 0x2da   :  { %v2088_v2 = vpop.f32.mrf.mxu0 }
 0x2db   :  { %v2106_v31 = vpack.c.bf16 %v2088_v2, %v2085_v30 }
 0x2dc   :  { %v7509_v33 = vpop.f32.mrf.mxu0 }
 0x2dd   :  { %7487 = vmatprep.mubr.msk.bf16.mxu1 %vm651_vm0, %v2106_v31  ;;  %v8199_v31 = vld [vmem:[#allocation5 + $0x100] sm:$0xff]  }
 0x2de   :  { %7488 = vmatmul.mubr.msk.bf16.gmra.mxu1 %vm651_vm0, %v2107_v32  ;;  %v2377_v37 = vpop.f32.mrf.mxu0 }
 0x2e0   :  { %v7510_v35 = vpop.f32.mrf.mxu0 }
 0x2e1   :  { %v2441_v6 = vpack.c.bf16 %v7510_v35, %v7509_v33 }
 0x2e2   :  { %v2380_v40 = vpop.f32.mrf.mxu0 }
 0x2e3   :  { %v2440_v42 = vpack.c.bf16 %v2380_v40, %v2377_v37 }
 0x2e4   :  { %v7513_v43 = vpop.f32.mrf.mxu0 }
 0x2e5   :  { %7531 = vmatprep.mubr.msk.bf16.mxu1 %vm651_vm0, %v2440_v42 }
 0x2e6   :  { %v2393_v7 = vpop.f32.mrf.mxu0  ;;  %7532 = vmatmul.mubr.msk.bf16.vlgmr.msra.gmra.mxu1 %vm651_vm0, %v2441_v6 }
 0x2e7   :  { %7580 = vmatpush3.bf16.msra.mxu1 %v8192_v23  ;;  %v8197_v23 = vld [vmem:[#allocation5 + $0x110] sm:$0xff]  }
 0x2e8   :  { %v7514_v45 = vpop.f32.mrf.mxu0  ;;  %7581 = vmatprep.subr.bf16.mxu1 %v8193_v44 }
 0x2e9   :  { %v2443_v55 = vpack.c.bf16 %v7514_v45, %v7513_v43 }
 0x2ea   :  { %v2396_v50 = vpop.f32.mrf.mxu0 }
 0x2eb   :  { %v2442_v54 = vpack.c.bf16 %v2396_v50, %v2393_v7  ;;  %7582 = vmatpush3.bf16.msra.mxu1 %v8193_v44 }
 0x2ec   :  { %v7517_v56 = vpop.f32.mrf.mxu0  ;;  %7583 = vmatprep.subr.bf16.mxu1 %v8194_v47 }
 0x2ed   :  { %7535 = vmatprep.mubr.msk.bf16.mxu1 %vm651_vm0, %v2442_v54 }
 0x2ee   :  { %v2409_v58 = vpop.f32.mrf.mxu0  ;;  %7536 = vmatmul.mubr.msk.bf16.gmra.mxu1 %vm651_vm0, %v2443_v55 }
 0x2ef   :  { %7584 = vmatpush3.bf16.msra.mxu1 %v8194_v47 }
 0x2f0   :  { %v7518_v60 = vpop.f32.mrf.mxu0  ;;  %7585 = vmatprep.subr.bf16.mxu1 %v8195_v57 }
 0x2f1   :  { %v2445_v4 = vpack.c.bf16 %v7518_v60, %v7517_v56 }
 0x2f2   :  { %v2412_v52 = vpop.f32.mrf.mxu0 }
 0x2f3   :  { %v2444_v63 = vpack.c.bf16 %v2412_v52, %v2409_v58  ;;  %7586 = vmatpush3.bf16.msra.mxu1 %v8195_v57  ;;  %v9013_v57 = vpop.f32.mrf.mxu1 }
 0x2f4   :  { %v7521_v5 = vpop.f32.mrf.mxu0  ;;  %7635 = vmatprep.subr.bf16.mxu1 %v8196_v62 }
 0x2f5   :  { %7539 = vmatprep.mubr.msk.bf16.mxu1 %vm651_vm0, %v2444_v63 }
 0x2f6   :  { %v2425_v10 = vpop.f32.mrf.mxu0  ;;  %7540 = vmatmul.mubr.msk.bf16.gmra.mxu1 %vm651_vm0, %v2445_v4 }
 0x2f8   :  { %v7522_v11 = vpop.f32.mrf.mxu0 }
 0x2f9   :  { %v2447_v14 = vpack.c.bf16 %v7522_v11, %v7521_v5 }
 0x2fa   :  { %v2428_v12 = vpop.f32.mrf.mxu0 }
 0x2fb   :  { %v2446_v13 = vpack.c.bf16 %v2428_v12, %v2425_v10 }
 0x2fc   :  { %v7565_v53 = vpop.f32.mrf.mxu0 }
 0x2fd   :  { %7543 = vmatprep.mubr.msk.bf16.mxu1 %vm651_vm0, %v2446_v13 }
 0x2fe   :  { %7544 = vmatmul.mubr.msk.bf16.gmra.mxu1 %vm651_vm0, %v2447_v14  ;;  %v2717_v15 = vpop.f32.mrf.mxu0 }
 0x300   :  { %v7566_v16 = vpop.f32.mrf.mxu0 }
 0x301   :  { %v2781_v20 = vpack.c.bf16 %v7566_v16, %v7565_v53 }
 0x302   :  { %v2720_v17 = vpop.f32.mrf.mxu0 }
 0x303   :  { %v2780_v19 = vpack.c.bf16 %v2720_v17, %v2717_v15 }
 0x304   :  { %v7569_v22 = vpop.f32.mrf.mxu0 }
 0x305   :  { %7587 = vmatprep.mubr.msk.bf16.mxu1 %vm651_vm0, %v2780_v19 }
 0x306   :  { %v2733_v24 = vpop.f32.mrf.mxu0  ;;  %7588 = vmatmul.mubr.msk.bf16.vlgmr.msra.gmra.mxu1 %vm651_vm0, %v2781_v20 }
 0x307   :  { %7636 = vmatpush3.bf16.msra.mxu1 %v8196_v62 }
 0x308   :  { %v7570_v26 = vpop.f32.mrf.mxu0  ;;  %7637 = vmatprep.subr.bf16.mxu1 %v8197_v23 }
 0x309   :  { %v2783_v1 = vpack.c.bf16 %v7570_v26, %v7569_v22 }
 0x30a   :  { %v2736_v48 = vpop.f32.mrf.mxu0 }
 0x30b   :  { %v2782_v30 = vpack.c.bf16 %v2736_v48, %v2733_v24  ;;  %7638 = vmatpush3.bf16.msra.mxu1 %v8197_v23 }
 0x30c   :  { %v7573_v2 = vpop.f32.mrf.mxu0  ;;  %7639 = vmatprep.subr.bf16.mxu1 %v8198_v29 }
 0x30d   :  { %7591 = vmatprep.mubr.msk.bf16.mxu1 %vm651_vm0, %v2782_v30 }
 0x30e   :  { %v2749_v32 = vpop.f32.mrf.mxu0  ;;  %7592 = vmatmul.mubr.msk.bf16.gmra.mxu1 %vm651_vm0, %v2783_v1 }
 0x30f   :  { %7640 = vmatpush3.bf16.msra.mxu1 %v8198_v29 }
 0x310   :  { %v7574_v33 = vpop.f32.mrf.mxu0  ;;  %7641 = vmatprep.subr.bf16.mxu1 %v8199_v31 }
 0x311   :  { %v2785_v40 = vpack.c.bf16 %v7574_v33, %v7573_v2 }
 0x312   :  { %v2752_v37 = vpop.f32.mrf.mxu0 }
 0x313   :  { %v2784_v35 = vpack.c.bf16 %v2752_v37, %v2749_v32  ;;  %7642 = vmatpush3.bf16.msra.mxu1 %v8199_v31 }
 0x314   :  { %v7577_v42 = vpop.f32.mrf.mxu0 }
 0x315   :  { %7595 = vmatprep.mubr.msk.bf16.mxu1 %vm651_vm0, %v2784_v35 }
 0x316   :  { %v2765_v6 = vpop.f32.mrf.mxu0  ;;  %7596 = vmatmul.mubr.msk.bf16.gmra.mxu1 %vm651_vm0, %v2785_v40 }
 0x318   :  { %v7578_v43 = vpop.f32.mrf.mxu0 }
 0x319   :  { %v2787_v45 = vpack.c.bf16 %v7578_v43, %v7577_v42 }
 0x31a   :  { %v2768_v44 = vpop.f32.mrf.mxu0 }
 0x31b   :  { %v2786_v7 = vpack.c.bf16 %v2768_v44, %v2765_v6 }
 0x31c   :  { %v7621_v47 = vpop.f32.mrf.mxu0 }
 0x31d   :  { %7599 = vmatprep.mubr.msk.bf16.mxu1 %vm651_vm0, %v2786_v7 }
 0x31e   :  { %7600 = vmatmul.mubr.msk.bf16.gmra.mxu1 %vm651_vm0, %v2787_v45  ;;  %v3057_v50 = vpop.f32.mrf.mxu0 }
 0x320   :  { %v7622_v54 = vpop.f32.mrf.mxu0 }
 0x321   :  { %v3121_v58 = vpack.c.bf16 %v7622_v54, %v7621_v47 }
 0x322   :  { %v3060_v55 = vpop.f32.mrf.mxu0 }
 0x323   :  { %v3120_v56 = vpack.c.bf16 %v3060_v55, %v3057_v50 }
 0x324   :  { %v7625_v60 = vpop.f32.mrf.mxu0 }
 0x325   :  { %7643 = vmatprep.mubr.msk.bf16.mxu1 %vm651_vm0, %v3120_v56 }
 0x326   :  { %v7309_v62 = vpop.f32.mrf.mxu1  ;;  %v3073_v52 = vpop.f32.mrf.mxu0  ;;  %7644 = vmatmul.mubr.msk.bf16.vlgmr.msra.gmra.mxu1 %vm651_vm0, %v3121_v58 }
 0x327   :  { %v1244_v63 = vadd.f32 %v7309_v62, %v8911_v18 }
 0x328   :  { %v1179_v4 = vpop.f32.mrf.mxu1  ;;  %v7626_v5 = vpop.f32.mrf.mxu0 }
 0x329   :  { %v1242_v10 = vadd.f32 %v1179_v4, %v8915_v21  ;;  %v3123_v53 = vpack.c.bf16 %v7626_v5, %v7625_v60 }
 0x32a   :  { %v7310_v11 = vpop.f32.mrf.mxu1  ;;  %v3076_v12 = vpop.f32.mrf.mxu0 }
 0x32b   :  { %v1245_v13 = vadd.f32 %v7310_v11, %v8917_v25  ;;  %v3122_v14 = vpack.c.bf16 %v3076_v12, %v3073_v52 }
 0x32c   :  { %v9020_v15 = vpop.f32.mrf.mxu1  ;;  %v7629_v16 = vpop.f32.mrf.mxu0 }
 0x32d   :  { %7647 = vmatprep.mubr.msk.bf16.mxu1 %vm651_vm0, %v3122_v14 }
 0x32e   :  { %v7313_v17 = vpop.f32.mrf.mxu1  ;;  %v3089_v19 = vpop.f32.mrf.mxu0  ;;  %7648 = vmatmul.mubr.msk.bf16.gmra.mxu1 %vm651_vm0, %v3123_v53 }
 0x32f   :  { %v1248_v18 = vadd.f32 %v7313_v17, %v8925_v0 }
 0x330   :  { %v1195_v20 = vpop.f32.mrf.mxu1  ;;  %v7630_v22 = vpop.f32.mrf.mxu0 }
 0x331   :  { %v1246_v21 = vadd.f32 %v1195_v20, %v8929_v3  ;;  %v3125_v29 = vpack.c.bf16 %v7630_v22, %v7629_v16 }
 0x332   :  { %v7314_v23 = vpop.f32.mrf.mxu1  ;;  %v3092_v24 = vpop.f32.mrf.mxu0 }
 0x333   :  { %v1249_v25 = vadd.f32 %v7314_v23, %v8931_v34  ;;  %v3124_v26 = vpack.c.bf16 %v3092_v24, %v3089_v19 }
 0x334   :  { %v9027_v48 = vpop.f32.mrf.mxu1  ;;  %v7633_v30 = vpop.f32.mrf.mxu0 }
 0x335   :  { %7651 = vmatprep.mubr.msk.bf16.mxu1 %vm651_vm0, %v3124_v26 }
 0x336   :  { %v7317_v1 = vpop.f32.mrf.mxu1  ;;  %v3105_v2 = vpop.f32.mrf.mxu0  ;;  %7652 = vmatmul.mubr.msk.bf16.gmra.mxu1 %vm651_vm0, %v3125_v29 }
 0x337   :  { %v1252_v0 = vadd.f32 %v7317_v1, %v8939_v41 }
 0x338   :  { %v1211_v31 = vpop.f32.mrf.mxu1  ;;  %v7634_v32 = vpop.f32.mrf.mxu0 }
 0x339   :  { %v1250_v3 = vadd.f32 %v1211_v31, %v8943_v36  ;;  %v3127_v40 = vpack.c.bf16 %v7634_v32, %v7633_v30 }
 0x33a   :  { %v7318_v33 = vpop.f32.mrf.mxu1  ;;  %v3108_v37 = vpop.f32.mrf.mxu0 }
 0x33b   :  { %v1253_v34 = vadd.f32 %v7318_v33, %v8945_v8  ;;  %v3126_v35 = vpack.c.bf16 %v3108_v37, %v3105_v2 }
 0x33c   :  { %v9034_v42 = vpop.f32.mrf.mxu1 }
 0x33d   :  { %7655 = vmatprep.mubr.msk.bf16.mxu1 %vm651_vm0, %v3126_v35 }
 0x33e   :  { %v7321_v6 = vpop.f32.mrf.mxu1  ;;  %7656 = vmatmul.mubr.msk.bf16.gmra.mxu1 %vm651_vm0, %v3127_v40 }
 0x33f   :  { %v1256_v43 = vadd.f32 %v7321_v6, %v8953_v51 }
 0x340   :  { %v1227_v41 = vpop.f32.mrf.mxu1 }
 0x341   :  { %v1254_v44 = vadd.f32 %v1227_v41, %v8957_v49 }
 0x342   :  { %v7322_v7 = vpop.f32.mrf.mxu1 }
 0x343   :  { %v1257_v36 = vadd.f32 %v7322_v7, %v8959_v59 }
 0x344   :  { %v9041_v45 = vpop.f32.mrf.mxu1 }
 0x346   :  { %v7365_v8 = vpop.f32.mrf.mxu1 }
 0x347   :  { %v1584_v47 = vadd.f32 %v7365_v8, %v1244_v63 }
 0x348   :  { %v1519_v50 = vpop.f32.mrf.mxu1 }
 0x349   :  { %v1582_v54 = vadd.f32 %v1519_v50, %v1242_v10 }
 0x34a   :  { %v7366_v55 = vpop.f32.mrf.mxu1 }
 0x34b   :  { %v1585_v56 = vadd.f32 %v7366_v55, %v1245_v13 }
 0x34c   :  { %v9043_v58 = vpop.f32.mrf.mxu1 }
 0x34e   :  { %v7369_v60 = vpop.f32.mrf.mxu1 }
 0x34f   :  { %v1588_v62 = vadd.f32 %v7369_v60, %v1248_v18 }
 0x350   :  { %v1535_v52 = vpop.f32.mrf.mxu1 }
 0x351   :  { %v1586_v51 = vadd.f32 %v1535_v52, %v1246_v21 }
 0x352   :  { %v7370_v4 = vpop.f32.mrf.mxu1 }
 0x353   :  { %v1589_v5 = vadd.f32 %v7370_v4, %v1249_v25 }
 0x354   :  { %v9045_v49 = vpop.f32.mrf.mxu1 }
 0x356   :  { %v7373_v11 = vpop.f32.mrf.mxu1 }
 0x357   :  { %v1592_v59 = vadd.f32 %v7373_v11, %v1252_v0 }
 0x358   :  { %v1551_v12 = vpop.f32.mrf.mxu1 }
 0x359   :  { %v1590_v14 = vadd.f32 %v1551_v12, %v1250_v3 }
 0x35a   :  { %v7374_v53 = vpop.f32.mrf.mxu1 }
 0x35b   :  { %v1593_v63 = vadd.f32 %v7374_v53, %v1253_v34 }
 0x35c   :  { %v9047_v16 = vpop.f32.mrf.mxu1 }
 0x35e   :  { %v7377_v10 = vpop.f32.mrf.mxu1 }
 0x35f   :  { %v1596_v13 = vadd.f32 %v7377_v10, %v1256_v43 }
 0x360   :  { %v1567_v17 = vpop.f32.mrf.mxu1 }
 0x361   :  { %v1594_v19 = vadd.f32 %v1567_v17, %v1254_v44 }
 0x362   :  { %v7378_v20 = vpop.f32.mrf.mxu1 }
 0x363   :  { %v1597_v18 = vadd.f32 %v7378_v20, %v1257_v36 }
 0x364   :  { %v9049_v22 = vpop.f32.mrf.mxu1 }
 0x366   :  { %v7421_v21 = vpop.f32.mrf.mxu1 }
 0x367   :  { %v1924_v23 = vadd.f32 %v7421_v21, %v1584_v47 }
 0x368   :  { %v1859_v24 = vpop.f32.mrf.mxu1 }
 0x369   :  { %v1922_v25 = vadd.f32 %v1859_v24, %v1582_v54 }
 0x36a   :  { %v7422_v26 = vpop.f32.mrf.mxu1 }
 0x36b   :  { %v1925_v29 = vadd.f32 %v7422_v26, %v1585_v56 }
 0x36c   :  { %v9051_v30 = vpop.f32.mrf.mxu1 }
 0x36e   :  { %v7425_v1 = vpop.f32.mrf.mxu1 }
 0x36f   :  { %v1928_v2 = vadd.f32 %v7425_v1, %v1588_v62 }
 0x370   :  { %v1875_v0 = vpop.f32.mrf.mxu1 }
 0x371   :  { %v1926_v31 = vadd.f32 %v1875_v0, %v1586_v51 }
 0x372   :  { %v7426_v32 = vpop.f32.mrf.mxu1 }
 0x373   :  { %v1929_v3 = vadd.f32 %v7426_v32, %v1589_v5 }
 0x374   :  { %v9053_v33 = vpop.f32.mrf.mxu1 }
 0x376   :  { %v7429_v37 = vpop.f32.mrf.mxu1 }
 0x377   :  { %v1932_v34 = vadd.f32 %v7429_v37, %v1592_v59  ;;  %v8201_v37 = vld [vmem:[#allocation8 + $0x10] sm:$0xff]  }
 0x378   :  { %v1891_v35 = vpop.f32.mrf.mxu1  ;;  %7695 = vmatprep.mubr.bf16.mxu1 %v8201_v37 }
 0x379   :  { %v1930_v40 = vadd.f32 %v1891_v35, %v1590_v14 }
 0x37a   :  { %v7430_v6 = vpop.f32.mrf.mxu1 }
 0x37b   :  { %v1933_v43 = vadd.f32 %v7430_v6, %v1593_v63 }
 0x37c   :  { %v9055_v41 = vpop.f32.mrf.mxu1 }
 0x37e   :  { %v7433_v44 = vpop.f32.mrf.mxu1 }
 0x37f   :  { %v1936_v7 = vadd.f32 %v7433_v44, %v1596_v13 }
 0x380   :  { %v1907_v36 = vpop.f32.mrf.mxu1 }
 0x381   :  { %v1934_v8 = vadd.f32 %v1907_v36, %v1594_v19 }
 0x382   :  { %v7434_v47 = vpop.f32.mrf.mxu1 }
 0x383   :  { %v1937_v50 = vadd.f32 %v7434_v47, %v1597_v18 }
 0x384   :  { %v9057_v54 = vpop.f32.mrf.mxu1 }
 0x386   :  { %v7477_v55 = vpop.f32.mrf.mxu1 }
 0x387   :  { %v2264_v56 = vadd.f32 %v7477_v55, %v1924_v23 }
 0x388   :  { %v2199_v60 = vpop.f32.mrf.mxu1 }
 0x389   :  { %v2262_v62 = vadd.f32 %v2199_v60, %v1922_v25 }
 0x38a   :  { %v7478_v52 = vpop.f32.mrf.mxu1 }
 0x38b   :  { %v2265_v51 = vadd.f32 %v7478_v52, %v1925_v29 }
 0x38c   :  { %v9059_v4 = vpop.f32.mrf.mxu1 }
 0x38e   :  { %v7481_v5 = vpop.f32.mrf.mxu1 }
 0x38f   :  { %v2268_v11 = vadd.f32 %v7481_v5, %v1928_v2 }
 0x390   :  { %v2215_v59 = vpop.f32.mrf.mxu1 }
 0x391   :  { %v2266_v12 = vadd.f32 %v2215_v59, %v1926_v31 }
 0x392   :  { %v7482_v14 = vpop.f32.mrf.mxu1 }
 0x393   :  { %v2269_v53 = vadd.f32 %v7482_v14, %v1929_v3  ;;  %v8200_v3 = vld [vmem:[#allocation8] sm:$0xff]  }
 0x394   :  { %v9061_v63 = vpop.f32.mrf.mxu1  ;;  %7675 = vmatprep.mubr.bf16.mxu0 %v8200_v3 }
 0x396   :  { %v7485_v10 = vpop.f32.mrf.mxu1 }
 0x397   :  { %v2272_v13 = vadd.f32 %v7485_v10, %v1932_v34 }
 0x398   :  { %v2231_v17 = vpop.f32.mrf.mxu1 }
 0x399   :  { %v2270_v19 = vadd.f32 %v2231_v17, %v1930_v40 }
 0x39a   :  { %v7486_v20 = vpop.f32.mrf.mxu1 }
 0x39b   :  { %v2273_v18 = vadd.f32 %v7486_v20, %v1933_v43 }
 0x39c   :  { %v9063_v21 = vpop.f32.mrf.mxu1 }
 0x39e   :  { %v7489_v23 = vpop.f32.mrf.mxu1 }
 0x39f   :  { %v2276_v24 = vadd.f32 %v7489_v23, %v1936_v7 }
 0x3a0   :  { %v2247_v25 = vpop.f32.mrf.mxu1 }
 0x3a1   :  { %v2274_v26 = vadd.f32 %v2247_v25, %v1934_v8 }
 0x3a2   :  { %v7490_v29 = vpop.f32.mrf.mxu1 }
 0x3a3   :  { %v9065_v1 = vadd.f32 %v7490_v29, %v1937_v50 }
 0x3a4   :  { %v9067_v2 = vpop.f32.mrf.mxu1 }
 0x3a6   :  { %v7533_v0 = vpop.f32.mrf.mxu1 }
 0x3a7   :  { %v2604_v31 = vadd.f32 %v7533_v0, %v2264_v56 }
 0x3a8   :  { %v2539_v32 = vpop.f32.mrf.mxu1 }
 0x3a9   :  { %v2602_v34 = vadd.f32 %v2539_v32, %v2262_v62 }
 0x3aa   :  { %v7534_v35 = vpop.f32.mrf.mxu1 }
 0x3ab   :  { %v2605_v40 = vadd.f32 %v7534_v35, %v2265_v51 }
 0x3ac   :  { %v2542_v6 = vpop.f32.mrf.mxu1 }
 0x3ae   :  { %v7537_v43 = vpop.f32.mrf.mxu1 }
 0x3af   :  { %v2608_v44 = vadd.f32 %v7537_v43, %v2268_v11 }
 0x3b0   :  { %v2555_v7 = vpop.f32.mrf.mxu1 }
 0x3b1   :  { %v2606_v36 = vadd.f32 %v2555_v7, %v2266_v12 }
 0x3b2   :  { %v7538_v8 = vpop.f32.mrf.mxu1 }
 0x3b3   :  { %v9069_v47 = vadd.f32 %v7538_v8, %v2269_v53 }
 0x3b4   :  { %v9071_v50 = vpop.f32.mrf.mxu1 }
 0x3b6   :  { %v7541_v55 = vpop.f32.mrf.mxu1 }
 0x3b7   :  { %v9073_v56 = vadd.f32 %v7541_v55, %v2272_v13 }
 0x3b8   :  { %v2571_v60 = vpop.f32.mrf.mxu1 }
 0x3b9   :  { %v9075_v52 = vadd.f32 %v2571_v60, %v2270_v19 }
 0x3ba   :  { %v7542_v62 = vpop.f32.mrf.mxu1 }
 0x3bb   :  { %v9077_v5 = vadd.f32 %v7542_v62, %v2273_v18  ;;  %v875_v62 = vadd.f32 %v8936_v39, %v8934_v38 }
 0x3bc   :  { %v9079_v51 = vpop.f32.mrf.mxu1 }
 0x3be   :  { %v7545_v59 = vpop.f32.mrf.mxu1 }
 0x3bf   :  { %v9081_v11 = vadd.f32 %v7545_v59, %v2276_v24 }
 0x3c0   :  { %v2587_v12 = vpop.f32.mrf.mxu1 }
 0x3c1   :  { %v9083_v14 = vadd.f32 %v2587_v12, %v2274_v26 }
 0x3c2   :  { %v9085_v53 = vpop.f32.mrf.mxu1 }
 0x3c4   :  { %v9087_v10 = vpop.f32.mrf.mxu1 }
 0x3c6   :  { %v7589_v13 = vpop.f32.mrf.mxu1 }
 0x3c7   :  { %v2944_v17 = vadd.f32 %v7589_v13, %v2604_v31  ;;  %v859_v31 = vadd.f32 %v8922_v28, %v8920_v27  ;;  %v1247_v27 = vadd.f32 %v9027_v48, %v875_v62  ;;  %v9110_v28 = vld [vmem:[#allocation7] ss:$0 sm:$0xff] }
 0x3c8   :  { %v2879_v20 = vpop.f32.mrf.mxu1 }
 0x3c9   :  { %v2942_v19 = vadd.f32 %v2879_v20, %v2602_v34 }
 0x3ca   :  { %v7590_v23 = vpop.f32.mrf.mxu1 }
 0x3cb   :  { %v2945_v25 = vadd.f32 %v7590_v23, %v2605_v40  ;;  %v1243_v40 = vadd.f32 %v9020_v15, %v859_v31 }
 0x3cc   :  { %v2882_v18 = vpop.f32.mrf.mxu1 }
 0x3ce   :  { %v7593_v29 = vpop.f32.mrf.mxu1 }
 0x3cf   :  { %v2948_v0 = vadd.f32 %v7593_v29, %v2608_v44 }
 0x3d0   :  { %v2895_v32 = vpop.f32.mrf.mxu1 }
 0x3d1   :  { %v2946_v3 = vadd.f32 %v2895_v32, %v2606_v36  ;;  %v1583_v36 = vadd.f32 %v9043_v58, %v1243_v40  ;;  %v1587_v58 = vadd.f32 %v9045_v49, %v1247_v27  ;;  %v891_v40 = vadd.f32 %v8950_v46, %v8948_v9 }
 0x3d2   :  { %v7594_v24 = vpop.f32.mrf.mxu1 }
 0x3d3   :  { %v1923_v60 = vadd.f32 %v9051_v30, %v1583_v36  ;;  %v1927_v38 = vadd.f32 %v9053_v33, %v1587_v58  ;;  %v2949_v62 = vadd.f32 %v7594_v24, %v9069_v47 }
 0x3d4   :  { %v2898_v37 = vpop.f32.mrf.mxu1 }
 0x3d5   :  { %v2263_v12 = vadd.f32 %v9059_v4, %v1923_v60 }
 0x3d6   :  { %v7597_v35 = vpop.f32.mrf.mxu1 }
 0x3d7   :  { %v2603_v20 = vadd.f32 %v2542_v6, %v2263_v12  ;;  %v2267_v6 = vadd.f32 %v9061_v63, %v1927_v38  ;;  %v2952_v47 = vadd.f32 %v7597_v35, %v9073_v56 }
 0x3d8   :  { %v2911_v26 = vpop.f32.mrf.mxu1 }
 0x3d9   :  { %v2943_v32 = vadd.f32 %v2882_v18, %v2603_v20  ;;  %v2607_v33 = vadd.f32 %v9071_v50, %v2267_v6 }
 0x3da   :  { %v9089_v43 = vpop.f32.mrf.mxu1 }
 0x3dc   :  { %v9091_v7 = vpop.f32.mrf.mxu1 }
 0x3de   :  { %v9093_v8 = vpop.f32.mrf.mxu1 }
 0x3e0   :  { %v9097_v34 = vpop.f32.mrf.mxu1 }
 0x3e2   :  { %v9100_v44 = vpop.f32.mrf.mxu1 }
 0x3e4   :  { %v9103_v55 = vpop.f32.mrf.mxu1 }
 0x3e6   :  { %v7645_v59 = vpop.f32.mrf.mxu1 }
 0x3e7   :  { %v3284_v13 = vadd.f32 %v7645_v59, %v2944_v17 }
 0x3e8   :  { %v3219_v15 = vpop.f32.mrf.mxu1 }
 0x3e9   :  { %v3282_v23 = vadd.f32 %v3219_v15, %v2942_v19  ;;  %v3307_v30 = vadd.f32 %v9110_v28, %v3284_v13  ;;  %v2947_v15 = vadd.f32 %v2898_v37, %v2607_v33  ;;  %v2950_v37 = vadd.f32 %v2911_v26, %v9075_v52 }
 0x3ea   :  { %v7646_v29 = vpop.f32.mrf.mxu1 }
 0x3eb   :  { %v3285_v31 = vadd.f32 %v7646_v29, %v2945_v25  ;;  %v3305_v4 = vadd.f32 %v9110_v28, %v3282_v23  ;;  %v3323_v49 = vmax.f32 %v3307_v30, 0.0  ;;  %v1251_v25 = vadd.f32 %v9034_v42, %v891_v40 }
 0x3ec   :  { %v3222_v39 = vpop.f32.mrf.mxu1 }
 0x3ed   :  { %v3308_v17 = vadd.f32 %v9110_v28, %v3285_v31  ;;  %v3283_v48 = vadd.f32 %v3222_v39, %v2943_v32  ;;  %v3321_v12 = vmax.f32 %v3305_v4, 0.0  ;;  %v1591_v46 = vadd.f32 %v9047_v16, %v1251_v25 }
 0x3ee   :  { %v7649_v19 = vpop.f32.mrf.mxu1  ;;  %v907_v16 = vadd.f32 %v9013_v57, %v8962_v61  ;;  %v2953_v39 = vadd.f32 %v9089_v43, %v9077_v5  ;;  %v2956_v5 = vadd.f32 %v9093_v8, %v9081_v11 }
 0x3ef   :  { %v3324_v36 = vmax.f32 %v3308_v17, 0.0  ;;  %v3306_v18 = vadd.f32 %v9110_v28, %v3283_v48  ;;  %v3288_v60 = vadd.f32 %v7649_v19, %v2948_v0  ;;  %v1931_v42 = vadd.f32 %v9055_v41, %v1591_v46 }
 0x3f0   :  { %v3235_v59 = vpop.f32.mrf.mxu1  ;;  %v1255_v56 = vadd.f32 %v9041_v45, %v907_v16  ;;  %v8205_v16 = vld [vmem:[#allocation8 + $0x30] sm:$0xff]  }
 0x3f1   :  { %v9124_v13 = vpack.c.bf16 %v3324_v36, %v3323_v49  ;;  %v3322_v27 = vmax.f32 %v3306_v18, 0.0  ;;  %v3286_v9 = vadd.f32 %v3235_v59, %v2946_v3  ;;  %v3311_v0 = vadd.f32 %v9110_v28, %v3288_v60 }
 0x3f2   :  { %v7650_v63 = vpop.f32.mrf.mxu1  ;;  %v2271_v3 = vadd.f32 %v9063_v21, %v1931_v42  ;;  %v1595_v52 = vadd.f32 %v9049_v22, %v1255_v56  ;;  %v2954_v18 = vadd.f32 %v9097_v34, %v9083_v14 }
 0x3f3   :  { %v9127_v20 = vpack.c.bf16 %v3322_v27, %v3321_v12  ;;  %v3289_v23 = vadd.f32 %v7650_v63, %v2949_v62  ;;  %v3309_v24 = vadd.f32 %v9110_v28, %v3286_v9  ;;  %v3327_v30 = vmax.f32 %v3311_v0, 0.0 }
 0x3f4   :  { %v3238_v50 = vpop.f32.mrf.mxu1  ;;  %v2611_v35 = vadd.f32 %v9079_v51, %v2271_v3  ;;  %v1935_v51 = vadd.f32 %v9057_v54, %v1595_v52  ;;  %v8206_v3 = vld [vmem:[#allocation8 + $0x28] sm:$0xff]  }
 0x3f5   :  { %v3312_v58 = vadd.f32 %v9110_v28, %v3289_v23  ;;  %v3287_v29 = vadd.f32 %v3238_v50, %v2947_v15  ;;  %v3325_v17 = vmax.f32 %v3309_v24, 0.0 }
 0x3f6   :  { %v7653_v32 = vpop.f32.mrf.mxu1  ;;  %v2951_v48 = vadd.f32 %v9091_v7, %v2611_v35  ;;  %v2275_v22 = vadd.f32 %v9067_v2, %v1935_v51  ;;  %v2617_v7 = vadd.f32 %v9085_v53, %v9065_v1 }
 0x3f7   :  { %v3328_v31 = vmax.f32 %v3312_v58, 0.0  ;;  %v3310_v41 = vadd.f32 %v9110_v28, %v3287_v29  ;;  %v3292_v38 = vadd.f32 %v7653_v32, %v2952_v47  ;;  %v8204_v29 = vld [vmem:[#allocation8 + $0x20] sm:$0xff]  }
 0x3f8   :  { %v3251_v4 = vpop.f32.mrf.mxu1  ;;  %v2615_v11 = vadd.f32 %v9087_v10, %v2275_v22  ;;  %v2957_v8 = vadd.f32 %v9100_v44, %v2617_v7  ;;  %v3768_v32 = vld [vmem:[#allocation10 + $0x4] sm:$0xf] }
 0x3f9   :  { %v9143_v61 = vpack.c.bf16 %v3328_v31, %v3327_v30  ;;  %v3326_v57 = vmax.f32 %v3310_v41, 0.0  ;;  %v3290_v21 = vadd.f32 %v3251_v4, %v2950_v37  ;;  %v3315_v45 = vadd.f32 %v9110_v28, %v3292_v38  ;;  %v8207_v37 = vld [vmem:[#allocation8 + $0x38] sm:$0xff]  }
 0x3fa   :  { %v7654_v26 = vpop.f32.mrf.mxu1  ;;  %v2955_v53 = vadd.f32 %v9103_v55, %v2615_v11  ;;  %v8202_v55 = vld [vmem:[#allocation8 + $0x8] sm:$0xff]   ;;  %v3778_v30 = vsel %vm3776_vm1, %v3768_v32, 0  ;;  %v8211_v11 = vld [vmem:[%s9581_s5 + $0x18] sm:$0xff]  }
 0x3fb   :  { %v9147_v40 = vpack.c.bf16 %v3326_v57, %v3325_v17  ;;  %v3293_v6 = vadd.f32 %v7654_v26, %v2953_v39  ;;  %v3313_v43 = vadd.f32 %v9110_v28, %v3290_v21  ;;  %v3331_v25 = vmax.f32 %v3315_v45, 0.0 }
 0x3fc   :  { %v3254_v19 = vpop.f32.mrf.mxu1 }
 0x3fd   :  { %v3316_v49 = vadd.f32 %v9110_v28, %v3293_v6  ;;  %v3291_v36 = vadd.f32 %v3254_v19, %v2951_v48  ;;  %v3329_v12 = vmax.f32 %v3313_v43, 0.0 }
 0x3fe   :  { %v7657_v60 = vpop.f32.mrf.mxu1 }
 0x3ff   :  { %v3332_v54 = vmax.f32 %v3316_v49, 0.0  ;;  %v3314_v33 = vadd.f32 %v9110_v28, %v3291_v36  ;;  %v3296_v62 = vadd.f32 %v7657_v60, %v2956_v5 }
 0x400   :  { %v3267_v59 = vpop.f32.mrf.mxu1 }
 0x401   :  { %v9163_v27 = vpack.c.bf16 %v3332_v54, %v3331_v25  ;;  %v3330_v2 = vmax.f32 %v3314_v33, 0.0  ;;  %v3294_v9 = vadd.f32 %v3267_v59, %v2954_v18  ;;  %v3319_v34 = vadd.f32 %v9110_v28, %v3296_v62  ;;  %v8209_v33 = vld [vmem:[%s9581_s5 + $0x8] sm:$0xff]   ;;  %v8210_v62 = vld [vmem:[%s9581_s5 + $0x10] sm:$0xff]  }
 0x402   :  { %v7658_v1 = vpop.f32.mrf.mxu1 }
 0x403   :  { %v9166_v14 = vpack.c.bf16 %v3330_v2, %v3329_v12  ;;  %v3297_v46 = vadd.f32 %v7658_v1, %v2957_v8  ;;  %v3317_v15 = vadd.f32 %v9110_v28, %v3294_v9  ;;  %v3335_v0 = vmax.f32 %v3319_v34, 0.0  ;;  %v3694_v8 = vld [vmem:[#allocation10] sm:$0xf] }
 0x404   :  { %v3270_v63 = vpop.f32.mrf.mxu1  ;;  %v3836_v59 = vsel %vm3776_vm1, %v3694_v8, 0 }
 0x405   :  { %v3320_v10 = vadd.f32 %v9110_v28, %v3297_v46  ;;  %v3295_v44 = vadd.f32 %v3270_v63, %v2955_v53  ;;  %v3333_v50 = vmax.f32 %v3317_v15, 0.0 }
 0x407   :  { %v3336_v23 = vmax.f32 %v3320_v10, 0.0  ;;  %v3318_v42 = vadd.f32 %v9110_v28, %v3295_v44  ;;  %v8203_v28 = vld [vmem:[#allocation8 + $0x18] sm:$0xff]  }
 0x408   :  { %v8212_v10 = vld [vmem:[%s9581_s5 + $0x20] sm:$0xff]  }
 0x409   :  { %v3344_v47 = vpack.c.bf16 %v3336_v23, %v3335_v0  ;;  %v3334_v24 = vmax.f32 %v3318_v42, 0.0  ;;  %v8213_v0 = vld [vmem:[%s9581_s5 + $0x28] sm:$0xff]   ;;  %v8214_v23 = vld [vmem:[%s9581_s5 + $0x30] sm:$0xff]   ;;  %v8215_v42 = vld [vmem:[%s9581_s5 + $0x38] sm:$0xff]  }
 0x40b   :  { %v3343_v58 = vpack.c.bf16 %v3334_v24, %v3333_v50  ;;  %7659 = vmatprep.subr.bf16.mxu0 %v3344_v47  ;;  %7679 = vmatprep.subr.bf16.mxu1 %v3344_v47  ;;  %v8216_v50 = vld [vmem:[%s9581_s5 + $0x40] sm:$0xff]   ;;  %v8218_v24 = vld [vmem:[%s9581_s5 + $0x50] sm:$0xff]  }
 0x40c   :  { %7660 = vmatpush3.bf16.msra.mxu0 %v3344_v47  ;;  %7680 = vmatpush3.bf16.msra.mxu1 %v3344_v47 }
 0x40d   :  { %7661 = vmatprep.subr.bf16.mxu0 %v3343_v58  ;;  %7681 = vmatprep.subr.bf16.mxu1 %v3343_v58 }
 0x410   :  { %7662 = vmatpush3.bf16.msra.mxu0 %v3343_v58  ;;  %7682 = vmatpush3.bf16.msra.mxu1 %v3343_v58 }
 0x411   :  { %7663 = vmatprep.subr.bf16.mxu0 %v9163_v27  ;;  %7683 = vmatprep.subr.bf16.mxu1 %v9163_v27 }
 0x414   :  { %7664 = vmatpush3.bf16.msra.mxu0 %v9163_v27  ;;  %7684 = vmatpush3.bf16.msra.mxu1 %v9163_v27 }
 0x415   :  { %7665 = vmatprep.subr.bf16.mxu0 %v9166_v14  ;;  %7685 = vmatprep.subr.bf16.mxu1 %v9166_v14 }
 0x418   :  { %7666 = vmatpush3.bf16.msra.mxu0 %v9166_v14  ;;  %7686 = vmatpush3.bf16.msra.mxu1 %v9166_v14 }
 0x419   :  { %7667 = vmatprep.subr.bf16.mxu0 %v9143_v61  ;;  %7687 = vmatprep.subr.bf16.mxu1 %v9143_v61 }
 0x41c   :  { %7668 = vmatpush3.bf16.msra.mxu0 %v9143_v61  ;;  %7688 = vmatpush3.bf16.msra.mxu1 %v9143_v61 }
 0x41d   :  { %7669 = vmatprep.subr.bf16.mxu0 %v9147_v40  ;;  %7689 = vmatprep.subr.bf16.mxu1 %v9147_v40 }
 0x420   :  { %7670 = vmatpush3.bf16.msra.mxu0 %v9147_v40  ;;  %7690 = vmatpush3.bf16.msra.mxu1 %v9147_v40 }
 0x421   :  { %7671 = vmatprep.subr.bf16.mxu0 %v9124_v13  ;;  %7691 = vmatprep.subr.bf16.mxu1 %v9124_v13 }
 0x424   :  { %7672 = vmatpush3.bf16.msra.mxu0 %v9124_v13  ;;  %7692 = vmatpush3.bf16.msra.mxu1 %v9124_v13 }
 0x425   :  { %7673 = vmatprep.subr.bf16.mxu0 %v9127_v20  ;;  %7693 = vmatprep.subr.bf16.mxu1 %v9127_v20 }
 0x428   :  { %7674 = vmatpush3.bf16.msra.mxu0 %v9127_v20  ;;  %7694 = vmatpush3.bf16.msra.mxu1 %v9127_v20 }
 0x429   :  { %7699 = vmatprep.subr.bf16.mxu0 %v3344_v47  ;;  %7719 = vmatprep.subr.bf16.mxu1 %v3344_v47 }
 0x42b   :  { %7676 = vmatmul.mubr.bf16.vlgmr.msra.gmra.mxu0 %v8202_v55  ;;  %7696 = vmatmul.mubr.bf16.vlgmr.msra.gmra.mxu1 %v8203_v28  ;;  %v8220_v55 = vld [vmem:[%s9581_s5 + $0x60] sm:$0xff]   ;;  %v8221_v28 = vld [vmem:[%s9581_s5 + $0x68] sm:$0xff]  }
 0x42c   :  { %7700 = vmatpush3.bf16.msra.mxu0 %v3344_v47  ;;  %7720 = vmatpush3.bf16.msra.mxu1 %v3344_v47  ;;  %v8217_v47 = vld [vmem:[%s9581_s5 + $0x48] sm:$0xff]  }
 0x42d   :  { %7701 = vmatprep.subr.bf16.mxu0 %v3343_v58  ;;  %7721 = vmatprep.subr.bf16.mxu1 %v3343_v58 }
 0x42e   :  { %7715 = vmatprep.mubr.bf16.mxu0 %v8204_v29  ;;  %7735 = vmatprep.mubr.bf16.mxu1 %v8205_v16  ;;  %v8222_v29 = vld [vmem:[%s9581_s5 + $0x70] sm:$0xff]   ;;  %v8223_v16 = vld [vmem:[%s9581_s5 + $0x78] sm:$0xff]  }
 0x430   :  { %7702 = vmatpush3.bf16.msra.mxu0 %v3343_v58  ;;  %7722 = vmatpush3.bf16.msra.mxu1 %v3343_v58  ;;  %v8219_v58 = vld [vmem:[%s9581_s5 + $0x58] sm:$0xff]  }
 0x431   :  { %7703 = vmatprep.subr.bf16.mxu0 %v9163_v27  ;;  %7723 = vmatprep.subr.bf16.mxu1 %v9163_v27 }
 0x434   :  { %7704 = vmatpush3.bf16.msra.mxu0 %v9163_v27  ;;  %7724 = vmatpush3.bf16.msra.mxu1 %v9163_v27 }
 0x435   :  { %7705 = vmatprep.subr.bf16.mxu0 %v9166_v14  ;;  %7725 = vmatprep.subr.bf16.mxu1 %v9166_v14 }
 0x438   :  { %7706 = vmatpush3.bf16.msra.mxu0 %v9166_v14  ;;  %7726 = vmatpush3.bf16.msra.mxu1 %v9166_v14 }
 0x439   :  { %7707 = vmatprep.subr.bf16.mxu0 %v9143_v61  ;;  %7727 = vmatprep.subr.bf16.mxu1 %v9143_v61 }
 0x43c   :  { %7708 = vmatpush3.bf16.msra.mxu0 %v9143_v61  ;;  %7728 = vmatpush3.bf16.msra.mxu1 %v9143_v61 }
 0x43d   :  { %7709 = vmatprep.subr.bf16.mxu0 %v9147_v40  ;;  %7729 = vmatprep.subr.bf16.mxu1 %v9147_v40 }
 0x440   :  { %7710 = vmatpush3.bf16.msra.mxu0 %v9147_v40  ;;  %7730 = vmatpush3.bf16.msra.mxu1 %v9147_v40 }
 0x441   :  { %7711 = vmatprep.subr.bf16.mxu0 %v9124_v13  ;;  %7731 = vmatprep.subr.bf16.mxu1 %v9124_v13 }
 0x444   :  { %7712 = vmatpush3.bf16.msra.mxu0 %v9124_v13  ;;  %7732 = vmatpush3.bf16.msra.mxu1 %v9124_v13  ;;  %v8208_v13 = vld [vmem:[%s9581_s5] sm:$0xff]  }
 0x445   :  { %7713 = vmatprep.subr.bf16.mxu0 %v9127_v20  ;;  %7733 = vmatprep.subr.bf16.mxu1 %v9127_v20 }
 0x448   :  { %7714 = vmatpush3.bf16.msra.mxu0 %v9127_v20  ;;  %7734 = vmatpush3.bf16.msra.mxu1 %v9127_v20 }
 0x449   :  { %8059 = vmatprep.subr.msk.bf16.mxu0 %vm3776_vm1, %v3768_v32  ;;  %v3960_v32 = vld [vmem:[#allocation10 + $0x8] sm:$0xf] }
 0x44b   :  { %7716 = vmatmul.mubr.bf16.vlgmr.msra.gmra.mxu0 %v8206_v3  ;;  %7736 = vmatmul.mubr.bf16.vlgmr.msra.gmra.mxu1 %v8207_v37  ;;  %v8224_v3 = vld [vmem:[%s9581_s5 + $0x80] sm:$0xff]   ;;  %v8225_v37 = vld [vmem:[%s9581_s5 + $0x88] sm:$0xff]  }
 0x44c   :  { %7756 = vmatpush3.bf16.msra.mxu0 %v3778_v30  ;;  %7743 = vmatprep.mubr.msk.bf16.mxu1 %vm3636_vm2, %v8208_v13  ;;  %v3968_v30 = vsel %vm3776_vm1, %v3960_v32, 0  ;;  %v4096_v13 = vld [vmem:[#allocation10 + $0xc] sm:$0xf] }
 0x4eb   :  { %v7677_v31 = vpop.f32.mrf.mxu0  ;;  %v7697_v41 = vpop.f32.mrf.mxu1 }
 0x4ec   :  { %v3478_v57 = vmax.f32 %v7677_v31, %v7697_v41 }
 0x4ed   :  { %v3395_v38 = vpop.f32.mrf.mxu0  ;;  %v3461_v20 = vpop.f32.mrf.mxu1 }
 0x4ee   :  { %v3476_v26 = vmax.f32 %v3395_v38, %v3461_v20 }
 0x4ef   :  { %v7678_v56 = vpop.f32.mrf.mxu0  ;;  %v7698_v35 = vpop.f32.mrf.mxu1 }
 0x4f0   :  { %v3479_v48 = vmax.f32 %v7678_v56, %v7698_v35 }
 0x4f1   :  { %v3398_v39 = vpop.f32.mrf.mxu0  ;;  %v3464_v4 = vpop.f32.mrf.mxu1 }
 0x4f2   :  { %v3477_v51 = vmax.f32 %v3398_v39, %v3464_v4 }
 0x50b   :  { %v7717_v17 = vpop.f32.mrf.mxu0  ;;  %v7737_v61 = vpop.f32.mrf.mxu1 }
 0x50c   :  { %v3548_v40 = vmax.f32 %v3478_v57, %v7717_v17 }
 0x50d   :  { %v3531_v21 = vpop.f32.mrf.mxu0  ;;  %v3601_v52 = vpop.f32.mrf.mxu1 }
 0x50e   :  { %v3546_v19 = vmax.f32 %v3476_v26, %v3531_v21  ;;  %v3618_v49 = vmax.f32 %v3548_v40, %v7737_v61  ;;  %v4104_v21 = vsel %vm3776_vm1, %v4096_v13, 0 }
 0x50f   :  { %v7718_v45 = vpop.f32.mrf.mxu0  ;;  %v7738_v6 = vpop.f32.mrf.mxu1 }
 0x510   :  { %v3549_v5 = vmax.f32 %v3479_v48, %v7718_v45  ;;  %v3616_v18 = vmax.f32 %v3546_v19, %v3601_v52  ;;  %v4232_v52 = vld [vmem:[#allocation10 + $0x10] sm:$0xf] }
 0x511   :  { %v3534_v43 = vpop.f32.mrf.mxu0  ;;  %v3604_v7 = vpop.f32.mrf.mxu1  ;;  %v4240_v19 = vsel %vm3776_vm1, %v4232_v52, 0 }
 0x512   :  { %v3619_v36 = vmax.f32 %v3549_v5, %v7738_v6  ;;  %v3547_v22 = vmax.f32 %v3477_v51, %v3534_v43  ;;  %v4368_v5 = vld [vmem:[#allocation10 + $0x14] sm:$0xf] }
 0x514   :  { %v9226_v60 = vpack.c.bf16 %v3619_v36, %v3618_v49  ;;  %v3617_v25 = vmax.f32 %v3547_v22, %v3604_v7 }
 0x516   :  { %v9228_v54 = vpack.c.bf16 %v3617_v25, %v3616_v18  ;;  %7739 = vmatprep.subr.bf16.mxu1 %v9226_v60  ;;  %7767 = vmatprep.subr.bf16.mxu0 %v9226_v60  ;;  %v4504_v25 = vld [vmem:[#allocation10 + $0x18] sm:$0xf] }
 0x517   :  { %7740 = vmatpush3.bf16.msra.mxu1 %v9226_v60 }
 0x518   :  { %7741 = vmatprep.subr.bf16.mxu1 %v9228_v54 }
 0x51b   :  { %7742 = vmatpush3.bf16.msra.mxu1 %v9228_v54 }
 0x51c   :  { %7747 = vmatprep.subr.bf16.mxu1 %v9226_v60 }
 0x51e   :  { %7744 = vmatmul.mubr.msk.bf16.vlgmr.msra.gmra.mxu1 %vm3636_vm2, %v8209_v33 }
 0x51f   :  { %7748 = vmatpush3.bf16.msra.mxu1 %v9226_v60  ;;  %7751 = vmatprep.mubr.msk.bf16.mxu1 %vm3636_vm2, %v8210_v62 }
 0x520   :  { %7749 = vmatprep.subr.bf16.mxu1 %v9228_v54 }
 0x523   :  { %7750 = vmatpush3.bf16.msra.mxu1 %v9228_v54 }
 0x524   :  { %8060 = vmatprep.subr.msk.bf16.mxu1 %vm3776_vm1, %v3694_v8 }
 0x526   :  { %7752 = vmatmul.mubr.msk.bf16.vlgmr.msra.gmra.mxu1 %vm3636_vm2, %v8211_v11 }
 0x527   :  { %7762 = vmatpush3.bf16.msra.mxu1 %v3836_v59 }
 0x528   :  { %8061 = vmatprep.subr.msk.bf16.mxu1 %vm3776_vm1, %v3960_v32 }
 0x5de   :  { %v7745_v12 = vpop.f32.mrf.mxu1 }
 0x5e0   :  { %v3677_v27 = vpop.f32.mrf.mxu1 }
 0x5e2   :  { %v7746_v2 = vpop.f32.mrf.mxu1 }
 0x5e3   :  { %v3693_v53 = vpack.c.bf16 %v7746_v2, %v7745_v12  ;;  %v4512_v12 = vsel %vm3776_vm1, %v4504_v25, 0 }
 0x5e4   :  { %v3680_v9 = vpop.f32.mrf.mxu1 }
 0x5e5   :  { %v3692_v1 = vpack.c.bf16 %v3680_v9, %v3677_v27  ;;  %v4640_v27 = vld [vmem:[#allocation10 + $0x1c] sm:$0xf] }
 0x5e6   :  { %v7753_v14 = vpop.f32.mrf.mxu1 }
 0x5e7   :  { %7763 = vmatprep.mubr.msk.bf16.mxu1 %vm3769_vm3, %v3692_v1 }
 0x5e8   :  { %v3750_v34 = vpop.f32.mrf.mxu1  ;;  %7764 = vmatmul.mubr.msk.bf16.vlgmr.msra.gmra.mxu1 %vm3769_vm3, %v3693_v53 }
 0x5e9   :  { %7776 = vmatpush3.bf16.msra.mxu1 %v3968_v30 }
 0x5ea   :  { %v7754_v46 = vpop.f32.mrf.mxu1  ;;  %8062 = vmatprep.subr.msk.bf16.mxu1 %vm3776_vm1, %v4096_v13 }
 0x5eb   :  { %v3766_v44 = vpack.c.bf16 %v7754_v46, %v7753_v14  ;;  %v4648_v46 = vsel %vm3776_vm1, %v4640_v27, 0 }
 0x5ec   :  { %v3753_v63 = vpop.f32.mrf.mxu1 }
 0x5ed   :  { %v3765_v15 = vpack.c.bf16 %v3753_v63, %v3750_v34  ;;  %v4776_v63 = vld [vmem:[#allocation10 + $0x20] sm:$0xf] }
 0x5ef   :  { %7757 = vmatprep.mubr.msk.bf16.mxu0 %vm3769_vm3, %v3765_v15 }
 0x5f0   :  { %7758 = vmatmul.mubr.msk.bf16.vlgmr.msra.gmra.mxu0 %vm3769_vm3, %v3766_v44 }
 0x5f1   :  { %7768 = vmatpush3.bf16.msra.mxu0 %v9226_v60  ;;  %7771 = vmatprep.mubr.msk.bf16.mxu0 %vm3636_vm2, %v8212_v10 }
 0x5f2   :  { %7769 = vmatprep.subr.bf16.mxu0 %v9228_v54 }
 0x5f5   :  { %7770 = vmatpush3.bf16.msra.mxu0 %v9228_v54 }
 0x5f6   :  { %7781 = vmatprep.subr.bf16.mxu0 %v9226_v60 }
 0x5f8   :  { %7772 = vmatmul.mubr.msk.bf16.vlgmr.msra.gmra.mxu0 %vm3636_vm2, %v8213_v0 }
 0x5f9   :  { %7782 = vmatpush3.bf16.msra.mxu0 %v9226_v60  ;;  %7785 = vmatprep.mubr.msk.bf16.mxu0 %vm3636_vm2, %v8214_v23 }
 0x5fa   :  { %7783 = vmatprep.subr.bf16.mxu0 %v9228_v54 }
 0x5fd   :  { %7784 = vmatpush3.bf16.msra.mxu0 %v9228_v54 }
 0x5fe   :  { %7795 = vmatprep.subr.bf16.mxu0 %v9226_v60 }
 0x600   :  { %7786 = vmatmul.mubr.msk.bf16.vlgmr.msra.gmra.mxu0 %vm3636_vm2, %v8215_v42 }
 0x601   :  { %7796 = vmatpush3.bf16.msra.mxu0 %v9226_v60  ;;  %7799 = vmatprep.mubr.msk.bf16.mxu0 %vm3636_vm2, %v8216_v50  ;;  %v4784_v50 = vsel %vm3776_vm1, %v4776_v63, 0 }
 0x602   :  { %7797 = vmatprep.subr.bf16.mxu0 %v9228_v54 }
 0x605   :  { %7798 = vmatpush3.bf16.msra.mxu0 %v9228_v54 }
 0x606   :  { %7809 = vmatprep.subr.bf16.mxu0 %v9226_v60 }
 0x608   :  { %7800 = vmatmul.mubr.msk.bf16.vlgmr.msra.gmra.mxu0 %vm3636_vm2, %v8217_v47 }
 0x609   :  { %7810 = vmatpush3.bf16.msra.mxu0 %v9226_v60  ;;  %7813 = vmatprep.mubr.msk.bf16.mxu0 %vm3636_vm2, %v8218_v24 }
 0x60a   :  { %7811 = vmatprep.subr.bf16.mxu0 %v9228_v54 }
 0x60d   :  { %7812 = vmatpush3.bf16.msra.mxu0 %v9228_v54 }
 0x60e   :  { %7823 = vmatprep.subr.bf16.mxu0 %v9226_v60 }
 0x610   :  { %7814 = vmatmul.mubr.msk.bf16.vlgmr.msra.gmra.mxu0 %vm3636_vm2, %v8219_v58 }
 0x611   :  { %7824 = vmatpush3.bf16.msra.mxu0 %v9226_v60  ;;  %7827 = vmatprep.mubr.msk.bf16.mxu0 %vm3636_vm2, %v8220_v55 }
 0x612   :  { %7825 = vmatprep.subr.bf16.mxu0 %v9228_v54 }
 0x615   :  { %7826 = vmatpush3.bf16.msra.mxu0 %v9228_v54 }
 0x616   :  { %7837 = vmatprep.subr.bf16.mxu0 %v9226_v60 }
 0x618   :  { %7828 = vmatmul.mubr.msk.bf16.vlgmr.msra.gmra.mxu0 %vm3636_vm2, %v8221_v28 }
 0x619   :  { %7838 = vmatpush3.bf16.msra.mxu0 %v9226_v60  ;;  %7841 = vmatprep.mubr.msk.bf16.mxu0 %vm3636_vm2, %v8222_v29  ;;  %v8523_v29 = vmov 0.0  }
 0x61a   :  { %7839 = vmatprep.subr.bf16.mxu0 %v9228_v54 }
 0x61d   :  { %7840 = vmatpush3.bf16.msra.mxu0 %v9228_v54 }
 0x61e   :  { %7851 = vmatprep.subr.bf16.mxu0 %v9226_v60 }
 0x620   :  { %7842 = vmatmul.mubr.msk.bf16.vlgmr.msra.gmra.mxu0 %vm3636_vm2, %v8223_v16 }
 0x621   :  { %7852 = vmatpush3.bf16.msra.mxu0 %v9226_v60  ;;  %7855 = vmatprep.mubr.msk.bf16.mxu0 %vm3636_vm2, %v8224_v3  ;;  %v4376_v60 = vsel %vm3776_vm1, %v4368_v5, 0 }
 0x622   :  { %7853 = vmatprep.subr.bf16.mxu0 %v9228_v54 }
 0x625   :  { %7854 = vmatpush3.bf16.msra.mxu0 %v9228_v54 }
 0x626   :  { %7865 = vmatprep.subr.bf16.mxu0 %v8523_v29 }
 0x628   :  { %7856 = vmatmul.mubr.msk.bf16.vlgmr.msra.gmra.mxu0 %vm3636_vm2, %v8225_v37 }
 0x629   :  { %7869 = vmatprep.mubr.msk.bf16.mxu0 %vm8524_vm4, %v8523_v29 }
 0x6a8   :  { %v7765_v16 = vpop.f32.mrf.mxu1 }
 0x6aa   :  { %v3872_v3 = vpop.f32.mrf.mxu1 }
 0x6ac   :  { %v7766_v37 = vpop.f32.mrf.mxu1 }
 0x6ae   :  { %v3875_v32 = vpop.f32.mrf.mxu1 }
 0x6b0   :  { %v9343_v31 = vpop.f32.mrf.mxu0 }
 0x6b2   :  { %v9345_v41 = vpop.f32.mrf.mxu0 }
 0x6b4   :  { %v9347_v38 = vpop.f32.mrf.mxu0 }
 0x6b6   :  { %v9349_v20 = vpop.f32.mrf.mxu0 }
 0x6b8   :  { %v7773_v56 = vpop.f32.mrf.mxu0 }
 0x6ba   :  { %v3942_v35 = vpop.f32.mrf.mxu0 }
 0x6bc   :  { %v7774_v39 = vpop.f32.mrf.mxu0 }
 0x6bd   :  { %v3958_v61 = vpack.c.bf16 %v7774_v39, %v7773_v56 }
 0x6be   :  { %v3945_v4 = vpop.f32.mrf.mxu0 }
 0x6bf   :  { %v3957_v17 = vpack.c.bf16 %v3945_v4, %v3942_v35 }
 0x6c0   :  { %v7787_v57 = vpop.f32.mrf.mxu0 }
 0x6c1   :  { %7777 = vmatprep.mubr.msk.bf16.mxu1 %vm3769_vm3, %v3957_v17 }
 0x6c2   :  { %7778 = vmatmul.mubr.msk.bf16.vlgmr.msra.gmra.mxu1 %vm3769_vm3, %v3958_v61  ;;  %v4078_v26 = vpop.f32.mrf.mxu0 }
 0x6c3   :  { %7790 = vmatpush3.bf16.msra.mxu1 %v4104_v21 }
 0x6c4   :  { %v7788_v48 = vpop.f32.mrf.mxu0  ;;  %8063 = vmatprep.subr.msk.bf16.mxu1 %vm3776_vm1, %v4232_v52 }
 0x6c5   :  { %v4094_v6 = vpack.c.bf16 %v7788_v48, %v7787_v57 }
 0x6c6   :  { %v4081_v40 = vpop.f32.mrf.mxu0 }
 0x6c7   :  { %v4093_v45 = vpack.c.bf16 %v4081_v40, %v4078_v26 }
 0x6c8   :  { %v7801_v51 = vpop.f32.mrf.mxu0 }
 0x6c9   :  { %7791 = vmatprep.mubr.msk.bf16.mxu1 %vm3769_vm3, %v4093_v45 }
 0x6ca   :  { %7792 = vmatmul.mubr.msk.bf16.vlgmr.msra.gmra.mxu1 %vm3769_vm3, %v4094_v6  ;;  %v4214_v43 = vpop.f32.mrf.mxu0 }
 0x6cb   :  { %7804 = vmatpush3.bf16.msra.mxu1 %v4240_v19 }
 0x6cc   :  { %v7802_v49 = vpop.f32.mrf.mxu0  ;;  %8064 = vmatprep.subr.msk.bf16.mxu1 %vm3776_vm1, %v4368_v5  ;;  %v3881_v5 = vadd.f32 %v7765_v16, %v9343_v31 }
 0x6cd   :  { %v4230_v7 = vpack.c.bf16 %v7802_v49, %v7801_v51  ;;  %v3873_v49 = vadd.f32 %v3872_v3, %v9345_v41 }
 0x6ce   :  { %v4217_v36 = vpop.f32.mrf.mxu0 }
 0x6cf   :  { %v4229_v22 = vpack.c.bf16 %v4217_v36, %v4214_v43 }
 0x6d0   :  { %v7815_v18 = vpop.f32.mrf.mxu0 }
 0x6d1   :  { %7805 = vmatprep.mubr.msk.bf16.mxu1 %vm3769_vm3, %v4229_v22 }
 0x6d2   :  { %7806 = vmatmul.mubr.msk.bf16.vlgmr.msra.gmra.mxu1 %vm3769_vm3, %v4230_v7  ;;  %v4350_v54 = vpop.f32.mrf.mxu0  ;;  %v3884_v7 = vadd.f32 %v7766_v37, %v9347_v38 }
 0x6d3   :  { %7818 = vmatpush3.bf16.msra.mxu1 %v4376_v60 }
 0x6d4   :  { %v7816_v33 = vpop.f32.mrf.mxu0  ;;  %8065 = vmatprep.subr.msk.bf16.mxu1 %vm3776_vm1, %v4504_v25 }
 0x6d5   :  { %v4366_v8 = vpack.c.bf16 %v7816_v33, %v7815_v18 }
 0x6d6   :  { %v4353_v62 = vpop.f32.mrf.mxu0 }
 0x6d7   :  { %v4365_v11 = vpack.c.bf16 %v4353_v62, %v4350_v54  ;;  %v3876_v54 = vadd.f32 %v3875_v32, %v9349_v20 }
 0x6d8   :  { %v7829_v59 = vpop.f32.mrf.mxu0 }
 0x6d9   :  { %7819 = vmatprep.mubr.msk.bf16.mxu1 %vm3769_vm3, %v4365_v11 }
 0x6da   :  { %7820 = vmatmul.mubr.msk.bf16.vlgmr.msra.gmra.mxu1 %vm3769_vm3, %v4366_v8  ;;  %v4486_v2 = vpop.f32.mrf.mxu0 }
 0x6db   :  { %7832 = vmatpush3.bf16.msra.mxu1 %v4512_v12 }
 0x6dc   :  { %v7830_v9 = vpop.f32.mrf.mxu0  ;;  %8066 = vmatprep.subr.msk.bf16.mxu1 %vm3776_vm1, %v4640_v27 }
 0x6dd   :  { %v4502_v14 = vpack.c.bf16 %v7830_v9, %v7829_v59 }
 0x6de   :  { %v4489_v1 = vpop.f32.mrf.mxu0 }
 0x6df   :  { %v4501_v53 = vpack.c.bf16 %v4489_v1, %v4486_v2 }
 0x6e0   :  { %v7843_v34 = vpop.f32.mrf.mxu0 }
 0x6e1   :  { %7833 = vmatprep.mubr.msk.bf16.mxu1 %vm3769_vm3, %v4501_v53 }
 0x6e2   :  { %7834 = vmatmul.mubr.msk.bf16.vlgmr.msra.gmra.mxu1 %vm3769_vm3, %v4502_v14  ;;  %v4622_v15 = vpop.f32.mrf.mxu0 }
 0x6e3   :  { %7846 = vmatpush3.bf16.msra.mxu1 %v4648_v46 }
 0x6e4   :  { %v7844_v10 = vpop.f32.mrf.mxu0  ;;  %8067 = vmatprep.subr.msk.bf16.mxu1 %vm3776_vm1, %v4776_v63 }
 0x6e5   :  { %v4638_v23 = vpack.c.bf16 %v7844_v10, %v7843_v34 }
 0x6e6   :  { %v4625_v44 = vpop.f32.mrf.mxu0 }
 0x6e7   :  { %v4637_v0 = vpack.c.bf16 %v4625_v44, %v4622_v15 }
 0x6e8   :  { %v7857_v42 = vpop.f32.mrf.mxu0 }
 0x6e9   :  { %7847 = vmatprep.mubr.msk.bf16.mxu1 %vm3769_vm3, %v4637_v0 }
 0x6ea   :  { %7848 = vmatmul.mubr.msk.bf16.vlgmr.msra.gmra.mxu1 %vm3769_vm3, %v4638_v23  ;;  %v4758_v47 = vpop.f32.mrf.mxu0  ;;  %v6669_v23 = vld [vmem:[#allocation11] ss:$0 sm:$0xff] }
 0x6eb   :  { %7860 = vmatpush3.bf16.msra.mxu1 %v4784_v50 }
 0x6ec   :  { %v7858_v24 = vpop.f32.mrf.mxu0  ;;  %7873 = vmatprep.subr.bf16.mxu1 %v8523_v29 }
 0x6ed   :  { %v4774_v28 = vpack.c.bf16 %v7858_v24, %v7857_v42 }
 0x6ee   :  { %v4761_v58 = vpop.f32.mrf.mxu0 }
 0x6ef   :  { %v4773_v55 = vpack.c.bf16 %v4761_v58, %v4758_v47 }
 0x6f1   :  { %7861 = vmatprep.mubr.msk.bf16.mxu1 %vm3769_vm3, %v4773_v55 }
 0x6f2   :  { %7862 = vmatmul.mubr.msk.bf16.vlgmr.msra.gmra.mxu1 %vm3769_vm3, %v4774_v28 }
 0x6f3   :  { %7877 = vmatprep.mubr.msk.bf16.mxu1 %vm8524_vm4, %v8523_v29 }
 0x782   :  { %v7779_v30 = vpop.f32.mrf.mxu1 }
 0x783   :  { %v4021_v36 = vadd.f32 %v7779_v30, %v3881_v5 }
 0x784   :  { %v4004_v13 = vpop.f32.mrf.mxu1 }
 0x785   :  { %v4019_v18 = vadd.f32 %v4004_v13, %v3873_v49 }
 0x786   :  { %v7780_v56 = vpop.f32.mrf.mxu1 }
 0x787   :  { %v4022_v33 = vadd.f32 %v7780_v56, %v3884_v7 }
 0x788   :  { %v4007_v35 = vpop.f32.mrf.mxu1 }
 0x789   :  { %v4020_v59 = vadd.f32 %v4007_v35, %v3876_v54 }
 0x78a   :  { %v7793_v39 = vpop.f32.mrf.mxu1 }
 0x78b   :  { %v4157_v60 = vadd.f32 %v7793_v39, %v4021_v36 }
 0x78c   :  { %v4140_v4 = vpop.f32.mrf.mxu1 }
 0x78d   :  { %v4155_v62 = vadd.f32 %v4140_v4, %v4019_v18 }
 0x78e   :  { %v7794_v17 = vpop.f32.mrf.mxu1 }
 0x78f   :  { %v4158_v12 = vadd.f32 %v7794_v17, %v4022_v33 }
 0x790   :  { %v4143_v61 = vpop.f32.mrf.mxu1 }
 0x791   :  { %v4156_v9 = vadd.f32 %v4143_v61, %v4020_v59 }
 0x792   :  { %v7807_v57 = vpop.f32.mrf.mxu1 }
 0x793   :  { %v4293_v11 = vadd.f32 %v7807_v57, %v4157_v60  ;;  %v4856_v57 = vld [vmem:[#allocation13] sm:$0xf] }
 0x794   :  { %v4276_v21 = vpop.f32.mrf.mxu1 }
 0x795   :  { %v4291_v27 = vadd.f32 %v4276_v21, %v4155_v62  ;;  %v4901_v21 = vld [vmem:[#allocation13 + $0x4] sm:$0xf] }
 0x796   :  { %v7808_v52 = vpop.f32.mrf.mxu1 }
 0x797   :  { %v4294_v41 = vadd.f32 %v7808_v52, %v4158_v12  ;;  %v4947_v52 = vld [vmem:[#allocation13 + $0x8] sm:$0xf]  ;;  %v5039_v12 = vld [vmem:[%s9585_s9] sm:$0xf] }
 0x798   :  { %v4279_v26 = vpop.f32.mrf.mxu1 }
 0x799   :  { %v4292_v38 = vadd.f32 %v4279_v26, %v4156_v9  ;;  %v4993_v26 = vld [vmem:[#allocation13 + $0xc] sm:$0xf] }
 0x79a   :  { %v7821_v48 = vpop.f32.mrf.mxu1 }
 0x79b   :  { %v4429_v31 = vadd.f32 %v7821_v48, %v4293_v11 }
 0x79c   :  { %v4412_v40 = vpop.f32.mrf.mxu1 }
 0x79d   :  { %v4427_v1 = vadd.f32 %v4412_v40, %v4291_v27  ;;  %v6675_v27 = vld [vmem:[%s9585_s9 + $0x4] sm:$0xf] }
 0x79e   :  { %v7822_v45 = vpop.f32.mrf.mxu1 }
 0x79f   :  { %v4430_v34 = vadd.f32 %v7822_v45, %v4294_v41 }
 0x7a0   :  { %v4415_v6 = vpop.f32.mrf.mxu1 }
 0x7a1   :  { %v4428_v20 = vadd.f32 %v4415_v6, %v4292_v38 }
 0x7a2   :  { %v7835_v51 = vpop.f32.mrf.mxu1 }
 0x7a3   :  { %v4565_v53 = vadd.f32 %v7835_v51, %v4429_v31  ;;  %v8226_v31 = vld [vmem:[#allocation14 + $0x8] sm:$0xff]  }
 0x7a4   :  { %v4548_v19 = vpop.f32.mrf.mxu1 }
 0x7a5   :  { %v4563_v46 = vadd.f32 %v4548_v19, %v4427_v1 }
 0x7a6   :  { %v7836_v43 = vpop.f32.mrf.mxu1 }
 0x7a7   :  { %v4566_v10 = vadd.f32 %v7836_v43, %v4430_v34 }
 0x7a8   :  { %v4551_v22 = vpop.f32.mrf.mxu1 }
 0x7a9   :  { %v4564_v50 = vadd.f32 %v4551_v22, %v4428_v20  ;;  %v6681_v20 = vld [vmem:[%s9585_s9 + $0x8] sm:$0xf] }
 0x7aa   :  { %v7849_v25 = vpop.f32.mrf.mxu1 }
 0x7ab   :  { %v4701_v63 = vadd.f32 %v7849_v25, %v4565_v53 }
 0x7ac   :  { %v4684_v8 = vpop.f32.mrf.mxu1 }
 0x7ad   :  { %v4699_v44 = vadd.f32 %v4684_v8, %v4563_v46 }
 0x7ae   :  { %v7850_v2 = vpop.f32.mrf.mxu1 }
 0x7af   :  { %v4702_v47 = vadd.f32 %v7850_v2, %v4566_v10  ;;  %v8227_v2 = vld [vmem:[#allocation14] sm:$0xff]   ;;  %v6685_v10 = vld [vmem:[%s9585_s9 + $0xc] sm:$0xf] }
 0x7b0   :  { %v4687_v14 = vpop.f32.mrf.mxu1 }
 0x7b1   :  { %v4700_v55 = vadd.f32 %v4687_v14, %v4564_v50  ;;  %v6705_v50 = vld [vmem:[%s9585_s9 + $0x20] sm:$0xf] }
 0x7b2   :  { %v7863_v15 = vpop.f32.mrf.mxu1 }
 0x7b3   :  { %v4837_v0 = vadd.f32 %v7863_v15, %v4701_v63 }
 0x7b4   :  { %v4820_v42 = vpop.f32.mrf.mxu1 }
 0x7b5   :  { %v4835_v24 = vadd.f32 %v4820_v42, %v4699_v44  ;;  %v4848_v28 = vadd.f32 %v6669_v23, %v4837_v0  ;;  %v6689_v44 = vld [vmem:[%s9585_s9 + $0x10] sm:$0xf]  ;;  %v6693_v0 = vld [vmem:[%s9585_s9 + $0x14] sm:$0xf]  ;;  %v6701_v42 = vld [vmem:[%s9585_s9 + $0x1c] sm:$0xf] }
 0x7b6   :  { %v7864_v58 = vpop.f32.mrf.mxu1 }
 0x7b7   :  { %v4838_v16 = vadd.f32 %v7864_v58, %v4702_v47  ;;  %v4846_v37 = vadd.f32 %v6669_v23, %v4835_v24  ;;  %v4852_v13 = vmax.f32 %v4848_v28, 0.0  ;;  %v8228_v47 = vld [vmem:[#allocation14 + $0x10] sm:$0xff]  }
 0x7b8   :  { %v4823_v3 = vpop.f32.mrf.mxu1 }
 0x7b9   :  { %v4849_v32 = vadd.f32 %v6669_v23, %v4838_v16  ;;  %v4836_v30 = vadd.f32 %v4823_v3, %v4700_v55  ;;  %v4850_v39 = vmax.f32 %v4846_v37, 0.0 }
 0x7bb   :  { %v4853_v56 = vmax.f32 %v4849_v32, 0.0  ;;  %v4847_v35 = vadd.f32 %v6669_v23, %v4836_v30  ;;  %v6697_v23 = vld [vmem:[%s9585_s9 + $0x18] sm:$0xf] }
 0x7bd   :  { %v4855_v4 = vpack.c.bf16 %v4853_v56, %v4852_v13  ;;  %v4851_v17 = vmax.f32 %v4847_v35, 0.0  ;;  %v8229_v56 = vld [vmem:[#allocation14 + $0x18] sm:$0xff]  }
 0x7bf   :  { %v4854_v61 = vpack.c.bf16 %v4851_v17, %v4850_v39  ;;  %7866 = vmatpush3.bf16.msra.mxu0 %v4855_v4  ;;  %7874 = vmatpush3.bf16.msra.mxu1 %v4855_v4 }
 0x7c0   :  { %7867 = vmatprep.subr.bf16.mxu0 %v8523_v29  ;;  %7875 = vmatprep.subr.bf16.mxu1 %v8523_v29 }
 0x7c3   :  { %7868 = vmatpush3.bf16.msra.mxu0 %v4854_v61  ;;  %7876 = vmatpush3.bf16.msra.mxu1 %v4854_v61 }
 0x7c4   :  { %7881 = vmatprep.subr.bf16.mxu0 %v8523_v29  ;;  %7889 = vmatprep.subr.bf16.mxu1 %v8523_v29 }
 0x7c6   :  { %7870 = vmatmul.mubr.msk.bf16.vlgmr.msra.gmra.mxu0 %vm3636_vm2, %v4856_v57  ;;  %7878 = vmatmul.mubr.msk.bf16.vlgmr.msra.gmra.mxu1 %vm3636_vm2, %v4901_v21  ;;  %v8230_v57 = vld [vmem:[#allocation14 + $0x20] sm:$0xff]  }
 0x7c7   :  { %7882 = vmatpush3.bf16.msra.mxu0 %v4855_v4  ;;  %7890 = vmatpush3.bf16.msra.mxu1 %v4855_v4 }
 0x7c8   :  { %7883 = vmatprep.subr.bf16.mxu0 %v8523_v29  ;;  %7891 = vmatprep.subr.bf16.mxu1 %v8523_v29 }
 0x7c9   :  { %7885 = vmatprep.mubr.msk.bf16.mxu0 %vm8524_vm4, %v8523_v29  ;;  %7893 = vmatprep.mubr.msk.bf16.mxu1 %vm8524_vm4, %v8523_v29 }
 0x7cb   :  { %7884 = vmatpush3.bf16.msra.mxu0 %v4854_v61  ;;  %7892 = vmatpush3.bf16.msra.mxu1 %v4854_v61 }
 0x7cc   :  { %7897 = vmatprep.subr.bf16.mxu0 %v8523_v29  ;;  %7903 = vmatprep.subr.bf16.mxu1 %v8523_v29 }
 0x7ce   :  { %7886 = vmatmul.mubr.msk.bf16.vlgmr.msra.gmra.mxu0 %vm3636_vm2, %v4947_v52  ;;  %7894 = vmatmul.mubr.msk.bf16.vlgmr.msra.gmra.mxu1 %vm3636_vm2, %v4993_v26 }
 0x7cf   :  { %7899 = vmatprep.mubr.msk.bf16.mxu0 %vm8524_vm4, %v8523_v29  ;;  %7905 = vmatprep.mubr.msk.bf16.mxu1 %vm8524_vm4, %v8523_v29 }
 0x886   :  { %v4894_v48 = vpop.f32.mrf.mxu0  ;;  %v4939_v40 = vpop.f32.mrf.mxu1 }
 0x887   :  { %v4945_v49 = vmax.f32 %v4894_v48, %v4939_v40 }
 0x888   :  { %v7871_v45 = vpop.f32.mrf.mxu0  ;;  %v7879_v6 = vpop.f32.mrf.mxu1 }
 0x889   :  { %v8231_v45 = vld [vmem:[#allocation14 + $0x28] sm:$0xff]  }
 0x88a   :  { %v4897_v51 = vpop.f32.mrf.mxu0  ;;  %v4942_v19 = vpop.f32.mrf.mxu1 }
 0x88c   :  { %v7872_v5 = vpop.f32.mrf.mxu0  ;;  %v7880_v43 = vpop.f32.mrf.mxu1 }
 0x88e   :  { %v4985_v36 = vpop.f32.mrf.mxu0  ;;  %v5031_v22 = vpop.f32.mrf.mxu1 }
 0x88f   :  { %v4991_v7 = vmax.f32 %v4945_v49, %v4985_v36  ;;  %v8232_v49 = vld [vmem:[#allocation14 + $0x30] sm:$0xff]  }
 0x890   :  { %v7887_v18 = vpop.f32.mrf.mxu0  ;;  %v7895_v60 = vpop.f32.mrf.mxu1 }
 0x891   :  { %v5037_v25 = vmax.f32 %v4991_v7, %v5031_v22 }
 0x892   :  { %v4988_v54 = vpop.f32.mrf.mxu0  ;;  %v5034_v33 = vpop.f32.mrf.mxu1 }
 0x893   :  { %v5038_v62 = vpack.c.bf16 %v5037_v25, %v5037_v25  ;;  %v8233_v25 = vld [vmem:[#allocation14 + $0x38] sm:$0xff]  }
 0x894   :  { %v7888_v11 = vpop.f32.mrf.mxu0  ;;  %v7896_v8 = vpop.f32.mrf.mxu1 }
 0x895   :  { %v5044_v59 = vsel %vm3776_vm1, %v5038_v62, 0 }
 0x896   :  { %7898 = vmatpush3.bf16.msra.mxu0 %v5044_v59  ;;  %7904 = vmatpush3.bf16.msra.mxu1 %v5044_v59 }
 0x897   :  { %7909 = vmatprep.subr.bf16.mxu0 %v8523_v29  ;;  %7915 = vmatprep.subr.bf16.mxu1 %v8523_v29 }
 0x899   :  { %7900 = vmatmul.mubr.msk.bf16.vlgmr.msra.gmra.mxu0 %vm3769_vm3, %v5039_v12  ;;  %7906 = vmatmul.mubr.msk.bf16.vlgmr.msra.gmra.mxu1 %vm3769_vm3, %v6675_v27 }
 0x89a   :  { %7910 = vmatpush3.bf16.msra.mxu0 %v8226_v31  ;;  %7911 = vmatprep.mubr.msk.bf16.mxu0 %vm8524_vm4, %v8523_v29 }
 0x89b   :  { %7917 = vmatprep.mubr.msk.bf16.mxu1 %vm8524_vm4, %v8523_v29  ;;  %7921 = vmatprep.subr.bf16.mxu0 %v8523_v29 }
 0x89c   :  { %7916 = vmatpush3.bf16.msra.mxu1 %v8227_v2 }
 0x89d   :  { %7927 = vmatprep.subr.bf16.mxu1 %v8523_v29 }
 0x959   :  { %v5080_v9 = vpop.f32.mrf.mxu0  ;;  %v5128_v41 = vpop.f32.mrf.mxu1 }
 0x95a   :  { %v5086_v1 = vpack.c.bf16 %v5080_v9, %v5080_v9  ;;  %v5134_v53 = vpack.c.bf16 %v5128_v41, %v5128_v41 }
 0x95b   :  { %v7907_v14 = vpop.f32.mrf.mxu1  ;;  %v7901_v38 = vpop.f32.mrf.mxu0 }
 0x95c   :  { %7912 = vmatmul.mubr.msk.bf16.vlgmr.msra.gmra.mxu0 %vm5144_vm5, %v5134_v53  ;;  %7918 = vmatmul.mubr.msk.bf16.vlgmr.msra.gmra.mxu1 %vm5144_vm5, %v5086_v1 }
 0x95d   :  { %7922 = vmatpush3.bf16.msra.mxu0 %v5044_v59  ;;  %v5131_v34 = vpop.f32.mrf.mxu1  ;;  %7923 = vmatprep.mubr.msk.bf16.mxu0 %vm8524_vm4, %v8523_v29  ;;  %v5083_v46 = vpop.f32.mrf.mxu0 }
 0x95e   :  { %7933 = vmatprep.subr.bf16.mxu0 %v8523_v29  ;;  %7929 = vmatprep.mubr.msk.bf16.mxu1 %vm8524_vm4, %v8523_v29 }
 0x95f   :  { %v7908_v63 = vpop.f32.mrf.mxu1  ;;  %v7902_v15 = vpop.f32.mrf.mxu0  ;;  %7928 = vmatpush3.bf16.msra.mxu1 %v8228_v47 }
 0x960   :  { %7939 = vmatprep.subr.bf16.mxu1 %v8523_v29 }
 0x964   :  { %7924 = vmatmul.mubr.msk.bf16.vlgmr.msra.gmra.mxu0 %vm3769_vm3, %v6681_v20 }
 0x965   :  { %7934 = vmatpush3.bf16.msra.mxu0 %v5044_v59  ;;  %7935 = vmatprep.mubr.msk.bf16.mxu0 %vm8524_vm4, %v8523_v29 }
 0x966   :  { %7945 = vmatprep.subr.bf16.mxu0 %v8523_v29 }
 0x96c   :  { %7936 = vmatmul.mubr.msk.bf16.vlgmr.msra.gmra.mxu0 %vm3769_vm3, %v6685_v10 }
 0x96d   :  { %7946 = vmatpush3.bf16.msra.mxu0 %v5044_v59  ;;  %7947 = vmatprep.mubr.msk.bf16.mxu0 %vm8524_vm4, %v8523_v29 }
 0x96e   :  { %7957 = vmatprep.subr.bf16.mxu0 %v8523_v29 }
 0x974   :  { %7948 = vmatmul.mubr.msk.bf16.vlgmr.msra.gmra.mxu0 %vm3769_vm3, %v6689_v44 }
 0x975   :  { %7958 = vmatpush3.bf16.msra.mxu0 %v5044_v59  ;;  %7959 = vmatprep.mubr.msk.bf16.mxu0 %vm8524_vm4, %v8523_v29 }
 0x976   :  { %7969 = vmatprep.subr.bf16.mxu0 %v8523_v29 }
 0x97c   :  { %7960 = vmatmul.mubr.msk.bf16.vlgmr.msra.gmra.mxu0 %vm3769_vm3, %v6693_v0 }
 0x97d   :  { %7970 = vmatpush3.bf16.msra.mxu0 %v5044_v59  ;;  %7971 = vmatprep.mubr.msk.bf16.mxu0 %vm8524_vm4, %v8523_v29 }
 0x97e   :  { %7981 = vmatprep.subr.bf16.mxu0 %v8523_v29 }
 0x984   :  { %7972 = vmatmul.mubr.msk.bf16.vlgmr.msra.gmra.mxu0 %vm3769_vm3, %v6697_v23 }
 0x985   :  { %7982 = vmatpush3.bf16.msra.mxu0 %v5044_v59  ;;  %7983 = vmatprep.mubr.msk.bf16.mxu0 %vm8524_vm4, %v8523_v29 }
 0x986   :  { %7993 = vmatprep.subr.bf16.mxu0 %v8523_v29 }
 0x98c   :  { %7984 = vmatmul.mubr.msk.bf16.vlgmr.msra.gmra.mxu0 %vm3769_vm3, %v6701_v42 }
 0x98d   :  { %7994 = vmatpush3.bf16.msra.mxu0 %v5044_v59  ;;  %7995 = vmatprep.mubr.msk.bf16.mxu0 %vm8524_vm4, %v8523_v29  ;;  %v8234_v59 = vld [vmem:[#allocation14 + $0x40] sm:$0xff]  }
 0x98e   :  { %8005 = vmatprep.subr.bf16.mxu0 %v8523_v29 }
 0x994   :  { %7996 = vmatmul.mubr.msk.bf16.vlgmr.msra.gmra.mxu0 %vm3769_vm3, %v6705_v50 }
 0x995   :  { %8007 = vmatprep.mubr.msk.bf16.mxu0 %vm8524_vm4, %v8523_v29 }
 0xa1c   :  { %v5182_v24 = vpop.f32.mrf.mxu0  ;;  %v5231_v58 = vpop.f32.mrf.mxu1 }
 0xa1d   :  { %v9479_v55 = vadd.f32 %v5231_v58, %v5182_v24 }
 0xa1e   :  { %v7913_v28 = vpop.f32.mrf.mxu0  ;;  %v7919_v16 = vpop.f32.mrf.mxu1 }
 0xa20   :  { %v5185_v3 = vpop.f32.mrf.mxu0  ;;  %v5234_v37 = vpop.f32.mrf.mxu1 }
 0xa22   :  { %v7914_v32 = vpop.f32.mrf.mxu0  ;;  %v7920_v30 = vpop.f32.mrf.mxu1 }
 0xa24   :  { %v5276_v13 = vpop.f32.mrf.mxu0 }
 0xa25   :  { %v5282_v35 = vpack.c.bf16 %v5276_v13, %v5276_v13 }
 0xa26   :  { %v7925_v39 = vpop.f32.mrf.mxu0 }
 0xa27   :  { %7930 = vmatmul.mubr.msk.bf16.vlgmr.msra.gmra.mxu1 %vm5144_vm5, %v5282_v35 }
 0xa28   :  { %v5279_v4 = vpop.f32.mrf.mxu0  ;;  %7940 = vmatpush3.bf16.msra.mxu1 %v8229_v56  ;;  %7941 = vmatprep.mubr.msk.bf16.mxu1 %vm8524_vm4, %v8523_v29 }
 0xa29   :  { %7951 = vmatprep.subr.bf16.mxu1 %v8523_v29 }
 0xa2a   :  { %v7926_v17 = vpop.f32.mrf.mxu0 }
 0xa2c   :  { %v5375_v61 = vpop.f32.mrf.mxu0 }
 0xa2d   :  { %v5381_v21 = vpack.c.bf16 %v5375_v61, %v5375_v61 }
 0xa2e   :  { %v7937_v52 = vpop.f32.mrf.mxu0 }
 0xa2f   :  { %7942 = vmatmul.mubr.msk.bf16.vlgmr.msra.gmra.mxu1 %vm5144_vm5, %v5381_v21 }
 0xa30   :  { %v5378_v26 = vpop.f32.mrf.mxu0  ;;  %7952 = vmatpush3.bf16.msra.mxu1 %v8230_v57  ;;  %7953 = vmatprep.mubr.msk.bf16.mxu1 %vm8524_vm4, %v8523_v29 }
 0xa31   :  { %7963 = vmatprep.subr.bf16.mxu1 %v8523_v29  ;;  %v6709_v26 = vld [vmem:[#allocation16] ss:$0 sm:$0xff] }
 0xa32   :  { %v7938_v48 = vpop.f32.mrf.mxu0 }
 0xa34   :  { %v5474_v40 = vpop.f32.mrf.mxu0 }
 0xa35   :  { %v5480_v6 = vpack.c.bf16 %v5474_v40, %v5474_v40 }
 0xa36   :  { %v7949_v51 = vpop.f32.mrf.mxu0 }
 0xa37   :  { %7954 = vmatmul.mubr.msk.bf16.vlgmr.msra.gmra.mxu1 %vm5144_vm5, %v5480_v6 }
 0xa38   :  { %v5477_v19 = vpop.f32.mrf.mxu0  ;;  %7964 = vmatpush3.bf16.msra.mxu1 %v8231_v45  ;;  %7965 = vmatprep.mubr.msk.bf16.mxu1 %vm8524_vm4, %v8523_v29 }
 0xa39   :  { %7975 = vmatprep.subr.bf16.mxu1 %v8523_v29 }
 0xa3a   :  { %v7950_v5 = vpop.f32.mrf.mxu0 }
 0xa3c   :  { %v5573_v43 = vpop.f32.mrf.mxu0 }
 0xa3d   :  { %v5579_v36 = vpack.c.bf16 %v5573_v43, %v5573_v43  ;;  %v5940_v43 = vld [vmem:[%s9588_s12] sm:$0x1] }
 0xa3e   :  { %v7961_v22 = vpop.f32.mrf.mxu0 }
 0xa3f   :  { %7966 = vmatmul.mubr.msk.bf16.vlgmr.msra.gmra.mxu1 %vm5144_vm5, %v5579_v36  ;;  %v6713_v36 = vld [vmem:[%s9588_s12 + $0x2] sm:$0x1]  ;;  %v6715_v22 = vld [vmem:[%s9588_s12 + $0x3] sm:$0x1] }
 0xa40   :  { %v5576_v7 = vpop.f32.mrf.mxu0  ;;  %7976 = vmatpush3.bf16.msra.mxu1 %v8232_v49  ;;  %7977 = vmatprep.mubr.msk.bf16.mxu1 %vm8524_vm4, %v8523_v29  ;;  %v6711_v49 = vld [vmem:[%s9588_s12 + $0x1] sm:$0x1] }
 0xa41   :  { %7987 = vmatprep.subr.bf16.mxu1 %v8523_v29  ;;  %v8235_v7 = vld [vmem:[#allocation17 + $0x8] sm:$0xff]  }
 0xa42   :  { %v7962_v18 = vpop.f32.mrf.mxu0 }
 0xa43   :  { %v8236_v18 = vld [vmem:[#allocation17] sm:$0xff]  }
 0xa44   :  { %v5672_v60 = vpop.f32.mrf.mxu0 }
 0xa45   :  { %v5678_v54 = vpack.c.bf16 %v5672_v60, %v5672_v60  ;;  %v8237_v60 = vld [vmem:[#allocation19 + $0x10] ss:$0 sps:$4 sm:$0xff]  }
 0xa46   :  { %v7973_v33 = vpop.f32.mrf.mxu0 }
 0xa47   :  { %7978 = vmatmul.mubr.msk.bf16.vlgmr.msra.gmra.mxu1 %vm5144_vm5, %v5678_v54 }
 0xa48   :  { %v5675_v62 = vpop.f32.mrf.mxu0  ;;  %7988 = vmatpush3.bf16.msra.mxu1 %v8233_v25  ;;  %7989 = vmatprep.mubr.msk.bf16.mxu1 %vm8524_vm4, %v8523_v29  ;;  %v6226_v25 = vsel %vm3776_vm1, %v8237_v60, 0 }
 0xa49   :  { %7999 = vmatprep.subr.bf16.mxu1 %v8523_v29 }
 0xa4a   :  { %v7974_v11 = vpop.f32.mrf.mxu0 }
 0xa4c   :  { %v5771_v8 = vpop.f32.mrf.mxu0 }
 0xa4d   :  { %v5777_v12 = vpack.c.bf16 %v5771_v8, %v5771_v8 }
 0xa4e   :  { %v7985_v27 = vpop.f32.mrf.mxu0 }
 0xa4f   :  { %7990 = vmatmul.mubr.msk.bf16.vlgmr.msra.gmra.mxu1 %vm5144_vm5, %v5777_v12 }
 0xa50   :  { %v5774_v31 = vpop.f32.mrf.mxu0  ;;  %8000 = vmatpush3.bf16.msra.mxu1 %v8234_v59  ;;  %8001 = vmatprep.mubr.msk.bf16.mxu1 %vm8524_vm4, %v8523_v29 }
 0xa51   :  { %8011 = vmatprep.subr.bf16.mxu1 %v8523_v29 }
 0xa52   :  { %v7986_v2 = vpop.f32.mrf.mxu0 }
 0xa54   :  { %v5870_v9 = vpop.f32.mrf.mxu0 }
 0xa55   :  { %v5876_v41 = vpack.c.bf16 %v5870_v9, %v5870_v9 }
 0xa56   :  { %v7997_v1 = vpop.f32.mrf.mxu0 }
 0xa57   :  { %8002 = vmatmul.mubr.msk.bf16.vlgmr.msra.gmra.mxu1 %vm5144_vm5, %v5876_v41 }
 0xa58   :  { %v5873_v53 = vpop.f32.mrf.mxu0  ;;  %8013 = vmatprep.mubr.msk.bf16.mxu1 %vm8524_vm4, %v8523_v29 }
 0xa5a   :  { %v7998_v14 = vpop.f32.mrf.mxu0 }
 0xae7   :  { %v5329_v38 = vpop.f32.mrf.mxu1 }
 0xae8   :  { %v5335_v32 = vadd.f32 %v5329_v38, %v9479_v55 }
 0xae9   :  { %v7931_v34 = vpop.f32.mrf.mxu1 }
 0xaeb   :  { %v5332_v46 = vpop.f32.mrf.mxu1 }
 0xaed   :  { %v7932_v63 = vpop.f32.mrf.mxu1 }
 0xaef   :  { %v5428_v15 = vpop.f32.mrf.mxu1 }
 0xaf0   :  { %v5434_v13 = vadd.f32 %v5428_v15, %v5335_v32  ;;  %v8243_v32 = vld [vmem:[%s9593_s17] sm:$0xff]  }
 0xaf1   :  { %v7943_v20 = vpop.f32.mrf.mxu1 }
 0xaf2   :  { %v8238_v20 = vld [vmem:[#allocation19 + $0x8] sm:$0xff]  }
 0xaf3   :  { %v5431_v10 = vpop.f32.mrf.mxu1 }
 0xaf4   :  { %v8239_v10 = vld [vmem:[#allocation19] sm:$0xff]  }
 0xaf5   :  { %v7944_v44 = vpop.f32.mrf.mxu1 }
 0xaf6   :  { %v8240_v44 = vld [vmem:[%s9593_s17 + $0x18] ss:$0 sps:$4 sm:$0x11]  }
 0xaf7   :  { %v5527_v0 = vpop.f32.mrf.mxu1 }
 0xaf8   :  { %v5533_v35 = vadd.f32 %v5527_v0, %v5434_v13  ;;  %v6311_v0 = vsel %vm6309_vm6, %v8240_v44, 0 }
 0xaf9   :  { %v7955_v23 = vpop.f32.mrf.mxu1 }
 0xafa   :  { %v8241_v23 = vld [vmem:[%s9593_s17 + $0x10] sm:$0xff]  }
 0xafb   :  { %v5530_v42 = vpop.f32.mrf.mxu1 }
 0xafc   :  { %v6717_v42 = vld [vmem:[%s9590_s14] ss:$0 sm:$0xff] }
 0xafd   :  { %v7956_v50 = vpop.f32.mrf.mxu1 }
 0xaff   :  { %v5626_v47 = vpop.f32.mrf.mxu1 }
 0xb00   :  { %v5632_v4 = vadd.f32 %v5626_v47, %v5533_v35 }
 0xb01   :  { %v7967_v24 = vpop.f32.mrf.mxu1 }
 0xb03   :  { %v5629_v58 = vpop.f32.mrf.mxu1 }
 0xb05   :  { %v7968_v28 = vpop.f32.mrf.mxu1 }
 0xb07   :  { %v5725_v16 = vpop.f32.mrf.mxu1 }
 0xb08   :  { %v5731_v61 = vadd.f32 %v5725_v16, %v5632_v4 }
 0xb09   :  { %v7979_v3 = vpop.f32.mrf.mxu1 }
 0xb0b   :  { %v5728_v37 = vpop.f32.mrf.mxu1 }
 0xb0c   :  { %v8242_v37 = vld [vmem:[%s9593_s17 + $0x8] sm:$0xff]  }
 0xb0d   :  { %v7980_v30 = vpop.f32.mrf.mxu1 }
 0xb0e   :  { %v6721_v30 = vld [vmem:[%s9592_s16] ss:$0 sm:$0xff]  ;;  %s8525_s16 = smov [#allocation20]  }
 0xb0f   :  { %v5824_v56 = vpop.f32.mrf.mxu1  ;;  %s6372_s17 = sshll.u32 %s8525_s16, 4  ;;  %s6373_s17 = int_to_ptr.vmem [resolvable:$true] %s6372_s17 }
 0xb10   :  { %v5830_v21 = vadd.f32 %v5824_v56, %v5731_v61  ;;  %p8481_p0 = scmp.lt.s32.totalorder %s6373_s17, %s6373_s17 }
 0xb11   :  { %v7991_v39 = vpop.f32.mrf.mxu1 }
 0xb13   :  { %v5827_v17 = vpop.f32.mrf.mxu1 }
 0xb15   :  { %v7992_v57 = vpop.f32.mrf.mxu1 }
 0xb17   :  { %v5923_v52 = vpop.f32.mrf.mxu1 }
 0xb18   :  { %v5929_v48 = vadd.f32 %v5923_v52, %v5830_v21 }
 0xb19   :  { %v8003_v40 = vpop.f32.mrf.mxu1 }
 0xb1a   :  { %v5937_v45 = vadd.f32 %v6709_v26, %v5929_v48 }
 0xb1b   :  { %v5926_v6 = vpop.f32.mrf.mxu1 }
 0xb1c   :  { %v5938_v51 = vmax.f32 %v5937_v45, 0.0 }
 0xb1d   :  { %v8004_v19 = vpop.f32.mrf.mxu1 }
 0xb1e   :  { %v5939_v5 = vpack.c.bf16 %v5938_v51, %v5938_v51 }
 0xb20   :  { %v5945_v55 = vsel %vm3776_vm1, %v5939_v5, 0 }
 0xb21   :  { %8006 = vmatpush3.bf16.msra.mxu0 %v5945_v55  ;;  %8012 = vmatpush3.bf16.msra.mxu1 %v5945_v55 }
 0xb22   :  { %8017 = vmatprep.subr.bf16.mxu0 %v8523_v29  ;;  %8023 = vmatprep.subr.bf16.mxu1 %v8523_v29 }
 0xb24   :  { %8008 = vmatmul.mubr.msk.bf16.vlgmr.msra.gmra.mxu0 %vm3769_vm3, %v5940_v43  ;;  %8014 = vmatmul.mubr.msk.bf16.vlgmr.msra.gmra.mxu1 %vm3769_vm3, %v6711_v49 }
 0xb25   :  { %8018 = vmatpush3.bf16.msra.mxu0 %v5945_v55  ;;  %8024 = vmatpush3.bf16.msra.mxu1 %v5945_v55 }
 0xb26   :  { %8019 = vmatprep.mubr.msk.bf16.mxu0 %vm8524_vm4, %v8523_v29  ;;  %8025 = vmatprep.mubr.msk.bf16.mxu1 %vm8524_vm4, %v8523_v29 }
 0xb27   :  { %8029 = vmatprep.subr.bf16.mxu0 %v8523_v29  ;;  %8037 = vmatprep.subr.bf16.mxu1 %v8523_v29 }
 0xb2c   :  { %8020 = vmatmul.mubr.msk.bf16.vlgmr.msra.gmra.mxu0 %vm3769_vm3, %v6713_v36  ;;  %8026 = vmatmul.mubr.msk.bf16.vlgmr.msra.gmra.mxu1 %vm3769_vm3, %v6715_v22 }
 0xb2d   :  { %8033 = vmatprep.mubr.msk.bf16.mxu0 %vm8524_vm4, %v8523_v29  ;;  %8043 = vmatprep.mubr.msk.bf16.mxu1 %vm8524_vm4, %v8523_v29 }
 0xb2e   :  { %8030 = vmatpush3.bf16.msra.mxu0 %v8235_v7  ;;  %8038 = vmatpush3.bf16.msra.mxu1 %v6226_v25 }
 0xb2f   :  { %8031 = vmatprep.subr.bf16.mxu0 %v8523_v29  ;;  %8039 = vmatprep.subr.bf16.mxu1 %v8523_v29 }
 0xb32   :  { %8032 = vmatpush3.bf16.msra.mxu0 %v8236_v18  ;;  %8040 = vmatpush3.bf16.msra.mxu1 %v8238_v20 }
 0xb33   :  { %8047 = vmatprep.subr.bf16.mxu0 %v8523_v29  ;;  %8041 = vmatprep.subr.bf16.mxu1 %v8523_v29 }
 0xb36   :  { %8042 = vmatpush3.bf16.msra.mxu1 %v8239_v10 }
 0xbe4   :  { %v5981_v54 = vpop.f32.mrf.mxu0  ;;  %v6026_v33 = vpop.f32.mrf.mxu1 }
 0xbe5   :  { %v6032_v31 = vmax.f32 %v5981_v54, %v6026_v33 }
 0xbe6   :  { %v8009_v62 = vpop.f32.mrf.mxu0  ;;  %v8015_v11 = vpop.f32.mrf.mxu1 }
 0xbe8   :  { %v5984_v8 = vpop.f32.mrf.mxu0  ;;  %v6029_v59 = vpop.f32.mrf.mxu1 }
 0xbea   :  { %v8010_v12 = vpop.f32.mrf.mxu0  ;;  %v8016_v27 = vpop.f32.mrf.mxu1 }
 0xbec   :  { %v6072_v2 = vpop.f32.mrf.mxu0  ;;  %v6118_v9 = vpop.f32.mrf.mxu1 }
 0xbed   :  { %v6078_v41 = vmax.f32 %v6032_v31, %v6072_v2 }
 0xbee   :  { %v8021_v1 = vpop.f32.mrf.mxu0  ;;  %v8027_v53 = vpop.f32.mrf.mxu1 }
 0xbef   :  { %v6124_v14 = vmax.f32 %v6078_v41, %v6118_v9 }
 0xbf0   :  { %v6075_v38 = vpop.f32.mrf.mxu0  ;;  %v6121_v34 = vpop.f32.mrf.mxu1 }
 0xbf1   :  { %v6125_v46 = vpack.c.bf16 %v6124_v14, %v6124_v14 }
 0xbf2   :  { %v8022_v63 = vpop.f32.mrf.mxu0  ;;  %v8028_v15 = vpop.f32.mrf.mxu1 }
 0xbf3   :  { %8034 = vmatmul.mubr.msk.bf16.vlgmr.msra.gmra.mxu0 %vm3636_vm2, %v6125_v46 }
 0xbf4   :  { %8055 = vmatprep.mubr.msk.bf16.mxu0 %vm8524_vm4, %v8523_v29  ;;  %8048 = vmatpush3.bf16.msra.mxu0 %v6311_v0 }
 0xbf5   :  { %8049 = vmatprep.subr.bf16.mxu0 %v8523_v29 }
 0xbf8   :  { %8050 = vmatpush3.bf16.msra.mxu0 %v8241_v23 }
 0xbf9   :  { %8051 = vmatprep.subr.bf16.mxu0 %v8523_v29 }
 0xbfc   :  { %8052 = vmatpush3.bf16.msra.mxu0 %v8242_v37 }
 0xbfd   :  { %8053 = vmatprep.subr.bf16.mxu0 %v8523_v29  ;;  %v6726_v29 = vld [vmem:[%s9594_s18] ss:$0 sm:$0xff]  ;;  %s8476_s18 = scalar_lea.vmem %s6373_s17, 32 }
 0xbfe   :  { %p8477_p13 = scmp.ne.s32.totalorder %s6373_s17, %s8476_s18  ;;  %p8482_p1 = scmp.lt.s32.totalorder %s8476_s18, %s8476_s18 }
 0xc00   :  { %8054 = vmatpush3.bf16.msra.mxu0 %v8243_v32  ;;  %p8483_p2 = por %p8482_p1, %p8481_p0 }
 0xc02   :  { %p8484_p3 = pnand %p8483_p2, %p8477_p13 }
 0xcb3   :  { %v6186_v50 = vpop.f32.mrf.mxu0 }
 0xcb4   :  { %v6187_v47 = vadd.f32 %v6717_v42, %v6186_v50 }
 0xcb5   :  { %v8035_v24 = vpop.f32.mrf.mxu0 }
 0xcb6   :  { %v6192_v58 = vmax.f32 %v6187_v47, 0.0 }
 0xcb7   :  { %v6189_v28 = vpop.f32.mrf.mxu0 }
 0xcb8   :  { %v6193_v16 = vpack.c.bf16 %v6192_v58, %v6192_v58 }
 0xcb9   :  { %v8036_v3 = vpop.f32.mrf.mxu0 }
 0xcba   :  { %8044 = vmatmul.mubr.msk.bf16.vlgmr.msra.gmra.mxu1 %vm6221_vm7, %v6193_v16 }
 0xd7a   :  { %v6262_v13 = vpop.f32.mrf.mxu1 }
 0xd7b   :  { %v6263_v56 = vadd.f32 %v6721_v30, %v6262_v13 }
 0xd7c   :  { %v8045_v35 = vpop.f32.mrf.mxu1 }
 0xd7d   :  { %v6268_v39 = vmax.f32 %v6263_v56, 0.0 }
 0xd7e   :  { %v6265_v4 = vpop.f32.mrf.mxu1 }
 0xd7f   :  { %v6269_v17 = vpack.c.bf16 %v6268_v39, %v6268_v39 }
 0xd80   :  { %v8046_v61 = vpop.f32.mrf.mxu1 }
 0xd81   :  { %8056 = vmatmul.mubr.msk.bf16.vlgmr.msra.gmra.mxu0 %vm6305_vm8, %v6269_v17 }
 0xe41   :  { %v6347_v57 = vpop.f32.mrf.mxu0 }
 0xe42   :  { %v6348_v21 = vadd.f32 %v6726_v29, %v6347_v57 }
 0xe43   :  { %v8057_v52 = vpop.f32.mrf.mxu0 }
 0xe44   :  { %v6354_v26 = vsel %vm6353_vm9, %v6348_v21, -inf }
 0xe45   :  { %6355 = vmax.xlane.f32.xlu0 %v6354_v26  ;;  %v6350_v48 = vpop.f32.mrf.mxu0 }
 0xe47   :  { %v8058_v40 = vpop.f32.mrf.mxu0 }
 0xece   :  { %v6356_v45 = vpop.xlane.xlu0 %6355 }
 0xecf   :  { %v6357_v6 = vsub.f32 %v6348_v21, %v6356_v45 }
 0xed1   :  { %v6358_v51 = vmul.f32 1.442695, %v6357_v6 }
 0xed3   :  { %8244 = vpow2.f32 %v6358_v51 }
 0xee0   :  { %v8245_v19 = vpop.eup %8244 }
 0xee1   :  { %v6360_v5 = vsel %vm6353_vm9, %v8245_v19, 0.0 }
 0xee2   :  { %6361 = vadd.xlane.f32.xlu0 %v6360_v5 }
 0xf6b   :  { %v6362_v55 = vpop.xlane.xlu0 %6361 }
 0xf6c   :  { %8246 = vrcp.f32 %v6362_v55 }
 0xf79   :  { %v8247_v43 = vpop.eup %8246 }
 0xf7a   :  { %v6364_v49 = vmul.f32 %v8247_v43, %v8245_v19 }
 0xf7c   :  { %6365 = vst.msk [vmem:[#allocation20] sm:$0x3] %vm6353_vm9, %v6364_v49 }
 0xf7d   :  { %8487 = shalt.err (!%p8484_p3)
}
 0xf7e   :  { %6375 = dma.vmem_to_hbm [thread:$0]  %s6373_s17, 32, %s9595_s19, [#allocation4]  }
 0xf7f   :  { %8508 = dma.done.wait [#allocation4], 32  }
 0xf80   :  { %8509 = vsyncadd [#allocation4], 4294967264 }
 0xf81   :  { %6379 = vsyncpa [#allocation3], 1 }
 0xf82   :  { %6380 = vsyncpa [#allocation6], 1 }
 0xf83   :  { %6381 = vsyncpa [#allocation9], 1 }
 0xf84   :  { %6382 = vsyncpa [#allocation12], 1 }
 0xf85   :  { %6383 = vsyncpa [#allocation15], 1 }
 0xf86   :  { %6384 = vsyncpa [#allocation18], 1 }
 0xf87   :  { %6385 = vsyncpa [#allocation4], 1 }

</bundles_post_ra>
